<compile_context>
chip_gen: v6e
topology: v6e:2x2x1
jax: 0.10.0
libtpu: 0.0.40
codegen_flags: <defaults>
</compile_context>

<pallas_src>
import functools

import jax
import jax.numpy as jnp
from jax.experimental import pallas as pl
from jax.experimental.pallas import tpu as pltpu


def stgat_kernel(heads, hidden,
                 x_ref, mask_ref, lhat_ref, hmask_ref,
                 w1_ref, as1_ref, ad1_ref, b1_ref,
                 w2_ref, as2_ref, ad2_ref, b2_ref,
                 wc_ref, bc_ref,
                 wl_ref, bl_ref,
                 out_ref):
    x = x_ref[...]            # (S, F_in), S = T * N rows (one batch element)
    mask = mask_ref[...]      # (S, S) additive attention mask (block-diag graph)
    hmask = hmask_ref[...]    # (heads, heads*hidden) per-head lane mask

    def gat_layer(h_in, W, a_src_bd, a_dst_bd, bias):
        # h_in: (S, F) ; W: (F, heads*hidden)
        h = jnp.dot(h_in, W, preferred_element_type=jnp.float32)         # (S, HF)
        # Per-head score reductions as MXU matmuls against block-diag matrices.
        asrc = jnp.dot(h, a_src_bd, preferred_element_type=jnp.float32)  # (S, heads)
        adst = jnp.dot(h, a_dst_bd, preferred_element_type=jnp.float32)  # (S, heads)
        asrc_t = jnp.transpose(asrc)                   # (heads, S): 1 transpose, all heads
        out = jnp.zeros_like(h)
        for hd in range(heads):                        # static unroll (heads = 4)
            e = adst[:, hd:hd + 1] + asrc_t[hd:hd + 1, :]   # (S_dst, S_src)
            e = jnp.where(e > 0, e, 0.2 * e)                # LeakyReLU(0.2)
            # Additive mask: 0 on intra-slab edges (incl. self loops), -1e30 else.
            e = e + mask
            e = e - jnp.max(e, axis=-1, keepdims=True)
            p = jnp.exp(e)
            inv = pl.reciprocal(jnp.sum(p, axis=-1, keepdims=True), approx=True)
            att = p * inv                                   # softmax over sources
            # Lane-masked head accumulation: no sub-tile lane slices / concats.
            out = out + jnp.dot(att, h * hmask[hd:hd + 1, :],
                                preferred_element_type=jnp.float32)
        return jnp.maximum(out + bias, 0.0)                 # module-level ReLU

    h1 = gat_layer(x, w1_ref[...], as1_ref[...], ad1_ref[...], b1_ref[...])
    h2 = gat_layer(h1, w2_ref[...], as2_ref[...], ad2_ref[...], b2_ref[...])

    # --- GConvGRU (ChebConv K=2) single cell step, zero initial hidden state ---
    lx = jnp.dot(lhat_ref[...], h2, preferred_element_type=jnp.float32)  # T_1(L_hat) X
    xcat = jnp.concatenate([h2, lx], axis=-1)            # (S, 2*HF), tile-aligned concat
    zc = jnp.dot(xcat, wc_ref[...], preferred_element_type=jnp.float32) + bc_ref[...]
    z = jax.nn.sigmoid(zc[:, :hidden])                   # lanes [0, hidden)
    h_tilde = jnp.tanh(zc[:, hidden:])                   # lanes [hidden, 2*hidden)
    h_gru = (1.0 - z) * h_tilde                          # (S, hidden)

    # --- final Linear(hidden -> out_channels) ---
    out_ref[...] = (jnp.dot(h_gru, wl_ref[...], preferred_element_type=jnp.float32)
                    + bl_ref[...])


def stgat_forward(x, adj_gat, lhat, params, *, heads, hidden, out_channels):
    """x: (B, T, N, F_in); adj_gat: (N, N) dense adjacency WITH self loops;
    lhat: (N, N) ChebConv scaled Laplacian (-D^-1/2 A D^-1/2)."""
    B, T, N, Fin = x.shape
    HF = heads * hidden
    S = T * N

    (w1, att_src1, att_dst1, b1,
     w2, att_src2, att_dst2, b2,
     wxz0, wxz1, bz, wxh0, wxh1, bh,
     wl, bl) = params

    # ---- host-side constant preprocessing ---------------------------------
    eye_t = jnp.eye(T, dtype=jnp.float32)
    adj_bd = jnp.kron(eye_t, adj_gat)                                   # (S, S)
    mask_bias = jnp.where(adj_bd > 0, 0.0, -1e30).astype(jnp.float32)   # additive mask
    lhat_bd = jnp.kron(eye_t, lhat).astype(jnp.float32)                 # (S, S)
    head_mask = jnp.kron(jnp.eye(heads, dtype=jnp.float32),
                         jnp.ones((1, hidden), jnp.float32))            # (heads, HF)

    def block_diag_att(a):  # (heads, hidden) -> (HF, heads), block-diagonal columns
        return (a[:, :, None] * jnp.eye(heads, dtype=a.dtype)[:, None, :]
                ).reshape(HF, heads)

    as1_bd, ad1_bd = block_diag_att(att_src1), block_diag_att(att_dst1)
    as2_bd, ad2_bd = block_diag_att(att_src2), block_diag_att(att_dst2)

    # Fuse the four ChebConv matmuls into one (2*HF, 2*hidden) matmul.
    wc = jnp.concatenate(
        [jnp.concatenate([wxz0, wxh0], axis=1),
         jnp.concatenate([wxz1, wxh1], axis=1)], axis=0)                # (2*HF, 2*hidden)
    bc = jnp.concatenate([bz, bh], axis=1)                              # (1, 2*hidden)

    x3 = x.reshape(B, S, Fin).astype(jnp.float32)

    def const_spec(shape):
        nd = len(shape)
        return pl.BlockSpec(shape, lambda b, _nd=nd: (0,) * _nd)

    in_specs = [
        pl.BlockSpec((None, S, Fin), lambda b: (b, 0, 0)),              # x slab
        const_spec((S, S)),                                             # mask_bias
        const_spec((S, S)),                                             # lhat_bd
        const_spec((heads, HF)),                                        # head_mask
        const_spec((Fin, HF)), const_spec((HF, heads)),                 # gat1
        const_spec((HF, heads)), const_spec((1, HF)),
        const_spec((HF, HF)), const_spec((HF, heads)),                  # gat2
        const_spec((HF, heads)), const_spec((1, HF)),
        const_spec((2 * HF, 2 * hidden)), const_spec((1, 2 * hidden)),  # cheb (fused)
        const_spec((hidden, out_channels)), const_spec((1, out_channels)),  # linear
    ]
    out_spec = pl.BlockSpec((None, S, out_channels), lambda b: (b, 0, 0))

    kernel = functools.partial(stgat_kernel, heads, hidden)
    out = pl.pallas_call(
        kernel,
        out_shape=jax.ShapeDtypeStruct((B, S, out_channels), jnp.float32),
        grid_spec=pltpu.PrefetchScalarGridSpec(
            num_scalar_prefetch=0,
            grid=(B,),
            in_specs=in_specs,
            out_specs=out_spec),
        compiler_params=pltpu.CompilerParams(
            dimension_semantics=("parallel",)),
    )(x3, mask_bias, lhat_bd, head_mask,
      w1, as1_bd, ad1_bd, b1,
      w2, as2_bd, ad2_bd, b2,
      wc, bc, wl, bl)
    return out.reshape(B, T, N, out_channels)


def _glorot(key, shape):
    fan_in, fan_out = shape[0], shape[-1]
    lim = jnp.sqrt(6.0 / (fan_in + fan_out))
    return jax.random.uniform(key, shape, jnp.float32, -lim, lim)


if __name__ == "__main__":
    B, T, N = 2, 4, 16
    in_ch, hidden, heads, out_ch = 8, 32, 4, 8
    HF = heads * hidden

    key = jax.random.PRNGKey(0)
    keys = jax.random.split(key, 24)

    # Input features.
    x = jax.random.normal(keys[0], (B, T, N, in_ch), jnp.float32)

    # Simple bidirectional ring graph; edge_index is (2, E) [src; dst].
    src = jnp.arange(N)
    dst = (src + 1) % N
    edge_index = jnp.stack([jnp.concatenate([src, dst]),
                            jnp.concatenate([dst, src])])               # (2, 2N)
    A = jnp.zeros((N, N), jnp.float32).at[edge_index[1], edge_index[0]].set(1.0)
    adj_gat = jnp.maximum(A, jnp.eye(N, dtype=jnp.float32))             # + self loops
    deg = jnp.sum(A, axis=1)
    d_inv_sqrt = jnp.where(deg > 0, 1.0 / jnp.sqrt(deg), 0.0)
    lhat = -(d_inv_sqrt[:, None] * A * d_inv_sqrt[None, :])             # ChebConv L_hat

    # Deterministic parameter init (shapes follow the module's __init__).
    params = [
        _glorot(keys[1], (in_ch, HF)),             # gat1 W
        _glorot(keys[2], (heads, hidden)),         # gat1 att_src
        _glorot(keys[3], (heads, hidden)),         # gat1 att_dst
        0.01 * jax.random.normal(keys[4], (1, HF), jnp.float32),        # gat1 bias
        _glorot(keys[5], (HF, HF)),                # gat2 W
        _glorot(keys[6], (heads, hidden)),         # gat2 att_src
        _glorot(keys[7], (heads, hidden)),         # gat2 att_dst
        0.01 * jax.random.normal(keys[8], (1, HF), jnp.float32),        # gat2 bias
        _glorot(keys[9], (HF, hidden)),            # cheb xz W0
        _glorot(keys[10], (HF, hidden)),           # cheb xz W1
        0.01 * jax.random.normal(keys[11], (1, hidden), jnp.float32),   # b_xz + b_hz
        _glorot(keys[12], (HF, hidden)),           # cheb xh W0
        _glorot(keys[13], (HF, hidden)),           # cheb xh W1
        0.01 * jax.random.normal(keys[14], (1, hidden), jnp.float32),   # b_xh + b_hh
        _glorot(keys[15], (hidden, out_ch)),       # linear W (pre-transposed)
        0.01 * jax.random.normal(keys[16], (1, out_ch), jnp.float32),   # linear bias
    ]

    y = stgat_forward(x, adj_gat, lhat, params,
                      heads=heads, hidden=hidden, out_channels=out_ch)
    jax.block_until_ready(y)
    assert y.shape == (B, T, N, out_ch), y.shape
    assert bool(jnp.all(jnp.isfinite(y)))
    print("KERNEL_OK")
</pallas_src>

<mosaic_0001>
module attributes {stable_mosaic.version = 11 : i64} {
  func.func @stgat_kernel(%arg0: i32, %arg1: memref<1x64x8xf32, #tpu.memory_space<vmem>>, %arg2: memref<64x64xf32, #tpu.memory_space<vmem>>, %arg3: memref<64x64xf32, #tpu.memory_space<vmem>>, %arg4: memref<4x128xf32, #tpu.memory_space<vmem>>, %arg5: memref<8x128xf32, #tpu.memory_space<vmem>>, %arg6: memref<128x4xf32, #tpu.memory_space<vmem>>, %arg7: memref<128x4xf32, #tpu.memory_space<vmem>>, %arg8: memref<1x128xf32, #tpu.memory_space<vmem>>, %arg9: memref<128x128xf32, #tpu.memory_space<vmem>>, %arg10: memref<128x4xf32, #tpu.memory_space<vmem>>, %arg11: memref<128x4xf32, #tpu.memory_space<vmem>>, %arg12: memref<1x128xf32, #tpu.memory_space<vmem>>, %arg13: memref<256x64xf32, #tpu.memory_space<vmem>>, %arg14: memref<1x64xf32, #tpu.memory_space<vmem>>, %arg15: memref<32x8xf32, #tpu.memory_space<vmem>>, %arg16: memref<1x8xf32, #tpu.memory_space<vmem>>, %arg17: memref<1x64x8xf32, #tpu.memory_space<vmem>>) attributes {dimension_semantics = [#tpu.dimension_semantics<parallel>], iteration_bounds = array<i64: 2>, scalar_prefetch = 0 : i64, scratch_operands = 0 : i64, tpu.core_type = #tpu.core_type<tc>, window_params = [{transform_indices = @transform_0, window_bounds = array<i64: 1, 64, 8>}, {pipeline_mode = #tpu.pipeline_mode<synchronous>, transform_indices = @transform_1, window_bounds = array<i64: 64, 64>}, {pipeline_mode = #tpu.pipeline_mode<synchronous>, transform_indices = @transform_2, window_bounds = array<i64: 64, 64>}, {pipeline_mode = #tpu.pipeline_mode<synchronous>, transform_indices = @transform_3, window_bounds = array<i64: 4, 128>}, {pipeline_mode = #tpu.pipeline_mode<synchronous>, transform_indices = @transform_4, window_bounds = array<i64: 8, 128>}, {pipeline_mode = #tpu.pipeline_mode<synchronous>, transform_indices = @transform_5, window_bounds = array<i64: 128, 4>}, {pipeline_mode = #tpu.pipeline_mode<synchronous>, transform_indices = @transform_6, window_bounds = array<i64: 128, 4>}, {pipeline_mode = #tpu.pipeline_mode<synchronous>, transform_indices = @transform_7, window_bounds = array<i64: 1, 128>}, {pipeline_mode = #tpu.pipeline_mode<synchronous>, transform_indices = @transform_8, window_bounds = array<i64: 128, 128>}, {pipeline_mode = #tpu.pipeline_mode<synchronous>, transform_indices = @transform_9, window_bounds = array<i64: 128, 4>}, {pipeline_mode = #tpu.pipeline_mode<synchronous>, transform_indices = @transform_10, window_bounds = array<i64: 128, 4>}, {pipeline_mode = #tpu.pipeline_mode<synchronous>, transform_indices = @transform_11, window_bounds = array<i64: 1, 128>}, {pipeline_mode = #tpu.pipeline_mode<synchronous>, transform_indices = @transform_12, window_bounds = array<i64: 256, 64>}, {pipeline_mode = #tpu.pipeline_mode<synchronous>, transform_indices = @transform_13, window_bounds = array<i64: 1, 64>}, {pipeline_mode = #tpu.pipeline_mode<synchronous>, transform_indices = @transform_14, window_bounds = array<i64: 32, 8>}, {pipeline_mode = #tpu.pipeline_mode<synchronous>, transform_indices = @transform_15, window_bounds = array<i64: 1, 8>}, {transform_indices = @transform_16, window_bounds = array<i64: 1, 64, 8>}]} {
    %c0 = arith.constant 0 : index
    %c0_0 = arith.constant 0 : index
    %c0_1 = arith.constant 0 : index
    %0 = vector.load %arg1[%c0, %c0_0, %c0_1] : memref<1x64x8xf32, #tpu.memory_space<vmem>>, vector<1x64x8xf32>
    %1 = vector.shape_cast %0 : vector<1x64x8xf32> to vector<64x8xf32>
    %c0_2 = arith.constant 0 : index
    %c0_3 = arith.constant 0 : index
    %2 = vector.load %arg2[%c0_2, %c0_3] : memref<64x64xf32, #tpu.memory_space<vmem>>, vector<64x64xf32>
    %c0_4 = arith.constant 0 : index
    %c0_5 = arith.constant 0 : index
    %3 = vector.load %arg4[%c0_4, %c0_5] : memref<4x128xf32, #tpu.memory_space<vmem>>, vector<4x128xf32>
    %c0_6 = arith.constant 0 : index
    %c0_7 = arith.constant 0 : index
    %4 = vector.load %arg5[%c0_6, %c0_7] : memref<8x128xf32, #tpu.memory_space<vmem>>, vector<8x128xf32>
    %c0_8 = arith.constant 0 : index
    %c0_9 = arith.constant 0 : index
    %5 = vector.load %arg6[%c0_8, %c0_9] : memref<128x4xf32, #tpu.memory_space<vmem>>, vector<128x4xf32>
    %c0_10 = arith.constant 0 : index
    %c0_11 = arith.constant 0 : index
    %6 = vector.load %arg7[%c0_10, %c0_11] : memref<128x4xf32, #tpu.memory_space<vmem>>, vector<128x4xf32>
    %c0_12 = arith.constant 0 : index
    %c0_13 = arith.constant 0 : index
    %7 = vector.load %arg8[%c0_12, %c0_13] : memref<1x128xf32, #tpu.memory_space<vmem>>, vector<1x128xf32>
    %cst = arith.constant dense<0.000000e+00> : vector<64x128xf32>
    %8 = tpu.matmul %1, %4, %cst {dimension_numbers = #tpu.dot_dimension_numbers<[1], [0], [0], [1], [0, 0, 1, 1], [], []>} : vector<64x8xf32>, vector<8x128xf32>, vector<64x128xf32> -> vector<64x128xf32>
    %cst_14 = arith.constant dense<0.000000e+00> : vector<64x4xf32>
    %9 = tpu.matmul %8, %5, %cst_14 {dimension_numbers = #tpu.dot_dimension_numbers<[1], [0], [0], [1], [0, 0, 1, 1], [], []>} : vector<64x128xf32>, vector<128x4xf32>, vector<64x4xf32> -> vector<64x4xf32>
    %cst_15 = arith.constant dense<0.000000e+00> : vector<64x4xf32>
    %10 = tpu.matmul %8, %6, %cst_15 {dimension_numbers = #tpu.dot_dimension_numbers<[1], [0], [0], [1], [0, 0, 1, 1], [], []>} : vector<64x128xf32>, vector<128x4xf32>, vector<64x4xf32> -> vector<64x4xf32>
    %11 = tpu.transpose %9, [1, 0] : vector<64x4xf32> -> vector<4x64xf32>
    %cst_16 = arith.constant 0.000000e+00 : f32
    %12 = vector.broadcast %cst_16 : f32 to vector<64x128xf32>
    %13 = vector.extract_strided_slice %10 {offsets = [0, 0], sizes = [64, 1], strides = [1, 1]} : vector<64x4xf32> to vector<64x1xf32>
    %14 = vector.extract_strided_slice %11 {offsets = [0, 0], sizes = [1, 64], strides = [1, 1]} : vector<4x64xf32> to vector<1x64xf32>
    %15 = vector.broadcast %13 : vector<64x1xf32> to vector<64x64xf32>
    %16 = vector.broadcast %14 : vector<1x64xf32> to vector<64x64xf32>
    %17 = arith.addf %15, %16 : vector<64x64xf32>
    %cst_17 = arith.constant 0.000000e+00 : f32
    %18 = vector.broadcast %cst_17 : f32 to vector<64x64xf32>
    %19 = arith.cmpf ogt, %17, %18 : vector<64x64xf32>
    %cst_18 = arith.constant 2.000000e-01 : f32
    %20 = vector.broadcast %cst_18 : f32 to vector<64x64xf32>
    %21 = arith.mulf %20, %17 : vector<64x64xf32>
    %22 = arith.select %19, %17, %21 : vector<64x64xi1>, vector<64x64xf32>
    %23 = arith.addf %22, %2 : vector<64x64xf32>
    %cst_19 = arith.constant dense<0xFF800000> : vector<64xf32>
    %24 = vector.multi_reduction <maximumf>, %23, %cst_19 [1] : vector<64x64xf32> to vector<64xf32>
    %25 = vector.shape_cast %24 : vector<64xf32> to vector<64x1xf32>
    %26 = vector.broadcast %25 : vector<64x1xf32> to vector<64x64xf32>
    %27 = arith.subf %23, %26 : vector<64x64xf32>
    %28 = math.exp %27 : vector<64x64xf32>
    %cst_20 = arith.constant dense<0.000000e+00> : vector<64xf32>
    %29 = vector.multi_reduction <add>, %28, %cst_20 [1] : vector<64x64xf32> to vector<64xf32>
    %30 = vector.shape_cast %29 : vector<64xf32> to vector<64x1xf32>
    %31 = tpu.reciprocal %30 {approx = true} : vector<64x1xf32> -> vector<64x1xf32>
    %32 = vector.broadcast %31 : vector<64x1xf32> to vector<64x64xf32>
    %33 = arith.mulf %28, %32 : vector<64x64xf32>
    %34 = vector.extract_strided_slice %3 {offsets = [0, 0], sizes = [1, 128], strides = [1, 1]} : vector<4x128xf32> to vector<1x128xf32>
    %35 = vector.broadcast %34 : vector<1x128xf32> to vector<64x128xf32>
    %36 = arith.mulf %8, %35 : vector<64x128xf32>
    %cst_21 = arith.constant dense<0.000000e+00> : vector<64x128xf32>
    %37 = tpu.matmul %33, %36, %cst_21 {dimension_numbers = #tpu.dot_dimension_numbers<[1], [0], [0], [1], [0, 0, 1, 1], [], []>} : vector<64x64xf32>, vector<64x128xf32>, vector<64x128xf32> -> vector<64x128xf32>
    %38 = arith.addf %12, %37 : vector<64x128xf32>
    %39 = vector.extract_strided_slice %10 {offsets = [0, 1], sizes = [64, 1], strides = [1, 1]} : vector<64x4xf32> to vector<64x1xf32>
    %40 = vector.extract_strided_slice %11 {offsets = [1, 0], sizes = [1, 64], strides = [1, 1]} : vector<4x64xf32> to vector<1x64xf32>
    %41 = vector.broadcast %39 : vector<64x1xf32> to vector<64x64xf32>
    %42 = vector.broadcast %40 : vector<1x64xf32> to vector<64x64xf32>
    %43 = arith.addf %41, %42 : vector<64x64xf32>
    %cst_22 = arith.constant 0.000000e+00 : f32
    %44 = vector.broadcast %cst_22 : f32 to vector<64x64xf32>
    %45 = arith.cmpf ogt, %43, %44 : vector<64x64xf32>
    %cst_23 = arith.constant 2.000000e-01 : f32
    %46 = vector.broadcast %cst_23 : f32 to vector<64x64xf32>
    %47 = arith.mulf %46, %43 : vector<64x64xf32>
    %48 = arith.select %45, %43, %47 : vector<64x64xi1>, vector<64x64xf32>
    %49 = arith.addf %48, %2 : vector<64x64xf32>
    %cst_24 = arith.constant dense<0xFF800000> : vector<64xf32>
    %50 = vector.multi_reduction <maximumf>, %49, %cst_24 [1] : vector<64x64xf32> to vector<64xf32>
    %51 = vector.shape_cast %50 : vector<64xf32> to vector<64x1xf32>
    %52 = vector.broadcast %51 : vector<64x1xf32> to vector<64x64xf32>
    %53 = arith.subf %49, %52 : vector<64x64xf32>
    %54 = math.exp %53 : vector<64x64xf32>
    %cst_25 = arith.constant dense<0.000000e+00> : vector<64xf32>
    %55 = vector.multi_reduction <add>, %54, %cst_25 [1] : vector<64x64xf32> to vector<64xf32>
    %56 = vector.shape_cast %55 : vector<64xf32> to vector<64x1xf32>
    %57 = tpu.reciprocal %56 {approx = true} : vector<64x1xf32> -> vector<64x1xf32>
    %58 = vector.broadcast %57 : vector<64x1xf32> to vector<64x64xf32>
    %59 = arith.mulf %54, %58 : vector<64x64xf32>
    %60 = vector.extract_strided_slice %3 {offsets = [1, 0], sizes = [1, 128], strides = [1, 1]} : vector<4x128xf32> to vector<1x128xf32>
    %61 = vector.broadcast %60 : vector<1x128xf32> to vector<64x128xf32>
    %62 = arith.mulf %8, %61 : vector<64x128xf32>
    %cst_26 = arith.constant dense<0.000000e+00> : vector<64x128xf32>
    %63 = tpu.matmul %59, %62, %cst_26 {dimension_numbers = #tpu.dot_dimension_numbers<[1], [0], [0], [1], [0, 0, 1, 1], [], []>} : vector<64x64xf32>, vector<64x128xf32>, vector<64x128xf32> -> vector<64x128xf32>
    %64 = arith.addf %38, %63 : vector<64x128xf32>
    %65 = vector.extract_strided_slice %10 {offsets = [0, 2], sizes = [64, 1], strides = [1, 1]} : vector<64x4xf32> to vector<64x1xf32>
    %66 = vector.extract_strided_slice %11 {offsets = [2, 0], sizes = [1, 64], strides = [1, 1]} : vector<4x64xf32> to vector<1x64xf32>
    %67 = vector.broadcast %65 : vector<64x1xf32> to vector<64x64xf32>
    %68 = vector.broadcast %66 : vector<1x64xf32> to vector<64x64xf32>
    %69 = arith.addf %67, %68 : vector<64x64xf32>
    %cst_27 = arith.constant 0.000000e+00 : f32
    %70 = vector.broadcast %cst_27 : f32 to vector<64x64xf32>
    %71 = arith.cmpf ogt, %69, %70 : vector<64x64xf32>
    %cst_28 = arith.constant 2.000000e-01 : f32
    %72 = vector.broadcast %cst_28 : f32 to vector<64x64xf32>
    %73 = arith.mulf %72, %69 : vector<64x64xf32>
    %74 = arith.select %71, %69, %73 : vector<64x64xi1>, vector<64x64xf32>
    %75 = arith.addf %74, %2 : vector<64x64xf32>
    %cst_29 = arith.constant dense<0xFF800000> : vector<64xf32>
    %76 = vector.multi_reduction <maximumf>, %75, %cst_29 [1] : vector<64x64xf32> to vector<64xf32>
    %77 = vector.shape_cast %76 : vector<64xf32> to vector<64x1xf32>
    %78 = vector.broadcast %77 : vector<64x1xf32> to vector<64x64xf32>
    %79 = arith.subf %75, %78 : vector<64x64xf32>
    %80 = math.exp %79 : vector<64x64xf32>
    %cst_30 = arith.constant dense<0.000000e+00> : vector<64xf32>
    %81 = vector.multi_reduction <add>, %80, %cst_30 [1] : vector<64x64xf32> to vector<64xf32>
    %82 = vector.shape_cast %81 : vector<64xf32> to vector<64x1xf32>
    %83 = tpu.reciprocal %82 {approx = true} : vector<64x1xf32> -> vector<64x1xf32>
    %84 = vector.broadcast %83 : vector<64x1xf32> to vector<64x64xf32>
    %85 = arith.mulf %80, %84 : vector<64x64xf32>
    %86 = vector.extract_strided_slice %3 {offsets = [2, 0], sizes = [1, 128], strides = [1, 1]} : vector<4x128xf32> to vector<1x128xf32>
    %87 = vector.broadcast %86 : vector<1x128xf32> to vector<64x128xf32>
    %88 = arith.mulf %8, %87 : vector<64x128xf32>
    %cst_31 = arith.constant dense<0.000000e+00> : vector<64x128xf32>
    %89 = tpu.matmul %85, %88, %cst_31 {dimension_numbers = #tpu.dot_dimension_numbers<[1], [0], [0], [1], [0, 0, 1, 1], [], []>} : vector<64x64xf32>, vector<64x128xf32>, vector<64x128xf32> -> vector<64x128xf32>
    %90 = arith.addf %64, %89 : vector<64x128xf32>
    %91 = vector.extract_strided_slice %10 {offsets = [0, 3], sizes = [64, 1], strides = [1, 1]} : vector<64x4xf32> to vector<64x1xf32>
    %92 = vector.extract_strided_slice %11 {offsets = [3, 0], sizes = [1, 64], strides = [1, 1]} : vector<4x64xf32> to vector<1x64xf32>
    %93 = vector.broadcast %91 : vector<64x1xf32> to vector<64x64xf32>
    %94 = vector.broadcast %92 : vector<1x64xf32> to vector<64x64xf32>
    %95 = arith.addf %93, %94 : vector<64x64xf32>
    %cst_32 = arith.constant 0.000000e+00 : f32
    %96 = vector.broadcast %cst_32 : f32 to vector<64x64xf32>
    %97 = arith.cmpf ogt, %95, %96 : vector<64x64xf32>
    %cst_33 = arith.constant 2.000000e-01 : f32
    %98 = vector.broadcast %cst_33 : f32 to vector<64x64xf32>
    %99 = arith.mulf %98, %95 : vector<64x64xf32>
    %100 = arith.select %97, %95, %99 : vector<64x64xi1>, vector<64x64xf32>
    %101 = arith.addf %100, %2 : vector<64x64xf32>
    %cst_34 = arith.constant dense<0xFF800000> : vector<64xf32>
    %102 = vector.multi_reduction <maximumf>, %101, %cst_34 [1] : vector<64x64xf32> to vector<64xf32>
    %103 = vector.shape_cast %102 : vector<64xf32> to vector<64x1xf32>
    %104 = vector.broadcast %103 : vector<64x1xf32> to vector<64x64xf32>
    %105 = arith.subf %101, %104 : vector<64x64xf32>
    %106 = math.exp %105 : vector<64x64xf32>
    %cst_35 = arith.constant dense<0.000000e+00> : vector<64xf32>
    %107 = vector.multi_reduction <add>, %106, %cst_35 [1] : vector<64x64xf32> to vector<64xf32>
    %108 = vector.shape_cast %107 : vector<64xf32> to vector<64x1xf32>
    %109 = tpu.reciprocal %108 {approx = true} : vector<64x1xf32> -> vector<64x1xf32>
    %110 = vector.broadcast %109 : vector<64x1xf32> to vector<64x64xf32>
    %111 = arith.mulf %106, %110 : vector<64x64xf32>
    %112 = vector.extract_strided_slice %3 {offsets = [3, 0], sizes = [1, 128], strides = [1, 1]} : vector<4x128xf32> to vector<1x128xf32>
    %113 = vector.broadcast %112 : vector<1x128xf32> to vector<64x128xf32>
    %114 = arith.mulf %8, %113 : vector<64x128xf32>
    %cst_36 = arith.constant dense<0.000000e+00> : vector<64x128xf32>
    %115 = tpu.matmul %111, %114, %cst_36 {dimension_numbers = #tpu.dot_dimension_numbers<[1], [0], [0], [1], [0, 0, 1, 1], [], []>} : vector<64x64xf32>, vector<64x128xf32>, vector<64x128xf32> -> vector<64x128xf32>
    %116 = arith.addf %90, %115 : vector<64x128xf32>
    %117 = vector.broadcast %7 : vector<1x128xf32> to vector<64x128xf32>
    %118 = arith.addf %116, %117 : vector<64x128xf32>
    %cst_37 = arith.constant 0.000000e+00 : f32
    %119 = vector.broadcast %cst_37 : f32 to vector<64x128xf32>
    %120 = arith.maximumf %118, %119 : vector<64x128xf32>
    %c0_38 = arith.constant 0 : index
    %c0_39 = arith.constant 0 : index
    %121 = vector.load %arg9[%c0_38, %c0_39] : memref<128x128xf32, #tpu.memory_space<vmem>>, vector<128x128xf32>
    %c0_40 = arith.constant 0 : index
    %c0_41 = arith.constant 0 : index
    %122 = vector.load %arg10[%c0_40, %c0_41] : memref<128x4xf32, #tpu.memory_space<vmem>>, vector<128x4xf32>
    %c0_42 = arith.constant 0 : index
    %c0_43 = arith.constant 0 : index
    %123 = vector.load %arg11[%c0_42, %c0_43] : memref<128x4xf32, #tpu.memory_space<vmem>>, vector<128x4xf32>
    %c0_44 = arith.constant 0 : index
    %c0_45 = arith.constant 0 : index
    %124 = vector.load %arg12[%c0_44, %c0_45] : memref<1x128xf32, #tpu.memory_space<vmem>>, vector<1x128xf32>
    %cst_46 = arith.constant dense<0.000000e+00> : vector<64x128xf32>
    %125 = tpu.matmul %120, %121, %cst_46 {dimension_numbers = #tpu.dot_dimension_numbers<[1], [0], [0], [1], [0, 0, 1, 1], [], []>} : vector<64x128xf32>, vector<128x128xf32>, vector<64x128xf32> -> vector<64x128xf32>
    %cst_47 = arith.constant dense<0.000000e+00> : vector<64x4xf32>
    %126 = tpu.matmul %125, %122, %cst_47 {dimension_numbers = #tpu.dot_dimension_numbers<[1], [0], [0], [1], [0, 0, 1, 1], [], []>} : vector<64x128xf32>, vector<128x4xf32>, vector<64x4xf32> -> vector<64x4xf32>
    %cst_48 = arith.constant dense<0.000000e+00> : vector<64x4xf32>
    %127 = tpu.matmul %125, %123, %cst_48 {dimension_numbers = #tpu.dot_dimension_numbers<[1], [0], [0], [1], [0, 0, 1, 1], [], []>} : vector<64x128xf32>, vector<128x4xf32>, vector<64x4xf32> -> vector<64x4xf32>
    %128 = tpu.transpose %126, [1, 0] : vector<64x4xf32> -> vector<4x64xf32>
    %cst_49 = arith.constant 0.000000e+00 : f32
    %129 = vector.broadcast %cst_49 : f32 to vector<64x128xf32>
    %130 = vector.extract_strided_slice %127 {offsets = [0, 0], sizes = [64, 1], strides = [1, 1]} : vector<64x4xf32> to vector<64x1xf32>
    %131 = vector.extract_strided_slice %128 {offsets = [0, 0], sizes = [1, 64], strides = [1, 1]} : vector<4x64xf32> to vector<1x64xf32>
    %132 = vector.broadcast %130 : vector<64x1xf32> to vector<64x64xf32>
    %133 = vector.broadcast %131 : vector<1x64xf32> to vector<64x64xf32>
    %134 = arith.addf %132, %133 : vector<64x64xf32>
    %cst_50 = arith.constant 0.000000e+00 : f32
    %135 = vector.broadcast %cst_50 : f32 to vector<64x64xf32>
    %136 = arith.cmpf ogt, %134, %135 : vector<64x64xf32>
    %cst_51 = arith.constant 2.000000e-01 : f32
    %137 = vector.broadcast %cst_51 : f32 to vector<64x64xf32>
    %138 = arith.mulf %137, %134 : vector<64x64xf32>
    %139 = arith.select %136, %134, %138 : vector<64x64xi1>, vector<64x64xf32>
    %140 = arith.addf %139, %2 : vector<64x64xf32>
    %cst_52 = arith.constant dense<0xFF800000> : vector<64xf32>
    %141 = vector.multi_reduction <maximumf>, %140, %cst_52 [1] : vector<64x64xf32> to vector<64xf32>
    %142 = vector.shape_cast %141 : vector<64xf32> to vector<64x1xf32>
    %143 = vector.broadcast %142 : vector<64x1xf32> to vector<64x64xf32>
    %144 = arith.subf %140, %143 : vector<64x64xf32>
    %145 = math.exp %144 : vector<64x64xf32>
    %cst_53 = arith.constant dense<0.000000e+00> : vector<64xf32>
    %146 = vector.multi_reduction <add>, %145, %cst_53 [1] : vector<64x64xf32> to vector<64xf32>
    %147 = vector.shape_cast %146 : vector<64xf32> to vector<64x1xf32>
    %148 = tpu.reciprocal %147 {approx = true} : vector<64x1xf32> -> vector<64x1xf32>
    %149 = vector.broadcast %148 : vector<64x1xf32> to vector<64x64xf32>
    %150 = arith.mulf %145, %149 : vector<64x64xf32>
    %151 = vector.extract_strided_slice %3 {offsets = [0, 0], sizes = [1, 128], strides = [1, 1]} : vector<4x128xf32> to vector<1x128xf32>
    %152 = vector.broadcast %151 : vector<1x128xf32> to vector<64x128xf32>
    %153 = arith.mulf %125, %152 : vector<64x128xf32>
    %cst_54 = arith.constant dense<0.000000e+00> : vector<64x128xf32>
    %154 = tpu.matmul %150, %153, %cst_54 {dimension_numbers = #tpu.dot_dimension_numbers<[1], [0], [0], [1], [0, 0, 1, 1], [], []>} : vector<64x64xf32>, vector<64x128xf32>, vector<64x128xf32> -> vector<64x128xf32>
    %155 = arith.addf %129, %154 : vector<64x128xf32>
    %156 = vector.extract_strided_slice %127 {offsets = [0, 1], sizes = [64, 1], strides = [1, 1]} : vector<64x4xf32> to vector<64x1xf32>
    %157 = vector.extract_strided_slice %128 {offsets = [1, 0], sizes = [1, 64], strides = [1, 1]} : vector<4x64xf32> to vector<1x64xf32>
    %158 = vector.broadcast %156 : vector<64x1xf32> to vector<64x64xf32>
    %159 = vector.broadcast %157 : vector<1x64xf32> to vector<64x64xf32>
    %160 = arith.addf %158, %159 : vector<64x64xf32>
    %cst_55 = arith.constant 0.000000e+00 : f32
    %161 = vector.broadcast %cst_55 : f32 to vector<64x64xf32>
    %162 = arith.cmpf ogt, %160, %161 : vector<64x64xf32>
    %cst_56 = arith.constant 2.000000e-01 : f32
    %163 = vector.broadcast %cst_56 : f32 to vector<64x64xf32>
    %164 = arith.mulf %163, %160 : vector<64x64xf32>
    %165 = arith.select %162, %160, %164 : vector<64x64xi1>, vector<64x64xf32>
    %166 = arith.addf %165, %2 : vector<64x64xf32>
    %cst_57 = arith.constant dense<0xFF800000> : vector<64xf32>
    %167 = vector.multi_reduction <maximumf>, %166, %cst_57 [1] : vector<64x64xf32> to vector<64xf32>
    %168 = vector.shape_cast %167 : vector<64xf32> to vector<64x1xf32>
    %169 = vector.broadcast %168 : vector<64x1xf32> to vector<64x64xf32>
    %170 = arith.subf %166, %169 : vector<64x64xf32>
    %171 = math.exp %170 : vector<64x64xf32>
    %cst_58 = arith.constant dense<0.000000e+00> : vector<64xf32>
    %172 = vector.multi_reduction <add>, %171, %cst_58 [1] : vector<64x64xf32> to vector<64xf32>
    %173 = vector.shape_cast %172 : vector<64xf32> to vector<64x1xf32>
    %174 = tpu.reciprocal %173 {approx = true} : vector<64x1xf32> -> vector<64x1xf32>
    %175 = vector.broadcast %174 : vector<64x1xf32> to vector<64x64xf32>
    %176 = arith.mulf %171, %175 : vector<64x64xf32>
    %177 = vector.extract_strided_slice %3 {offsets = [1, 0], sizes = [1, 128], strides = [1, 1]} : vector<4x128xf32> to vector<1x128xf32>
    %178 = vector.broadcast %177 : vector<1x128xf32> to vector<64x128xf32>
    %179 = arith.mulf %125, %178 : vector<64x128xf32>
    %cst_59 = arith.constant dense<0.000000e+00> : vector<64x128xf32>
    %180 = tpu.matmul %176, %179, %cst_59 {dimension_numbers = #tpu.dot_dimension_numbers<[1], [0], [0], [1], [0, 0, 1, 1], [], []>} : vector<64x64xf32>, vector<64x128xf32>, vector<64x128xf32> -> vector<64x128xf32>
    %181 = arith.addf %155, %180 : vector<64x128xf32>
    %182 = vector.extract_strided_slice %127 {offsets = [0, 2], sizes = [64, 1], strides = [1, 1]} : vector<64x4xf32> to vector<64x1xf32>
    %183 = vector.extract_strided_slice %128 {offsets = [2, 0], sizes = [1, 64], strides = [1, 1]} : vector<4x64xf32> to vector<1x64xf32>
    %184 = vector.broadcast %182 : vector<64x1xf32> to vector<64x64xf32>
    %185 = vector.broadcast %183 : vector<1x64xf32> to vector<64x64xf32>
    %186 = arith.addf %184, %185 : vector<64x64xf32>
    %cst_60 = arith.constant 0.000000e+00 : f32
    %187 = vector.broadcast %cst_60 : f32 to vector<64x64xf32>
    %188 = arith.cmpf ogt, %186, %187 : vector<64x64xf32>
    %cst_61 = arith.constant 2.000000e-01 : f32
    %189 = vector.broadcast %cst_61 : f32 to vector<64x64xf32>
    %190 = arith.mulf %189, %186 : vector<64x64xf32>
    %191 = arith.select %188, %186, %190 : vector<64x64xi1>, vector<64x64xf32>
    %192 = arith.addf %191, %2 : vector<64x64xf32>
    %cst_62 = arith.constant dense<0xFF800000> : vector<64xf32>
    %193 = vector.multi_reduction <maximumf>, %192, %cst_62 [1] : vector<64x64xf32> to vector<64xf32>
    %194 = vector.shape_cast %193 : vector<64xf32> to vector<64x1xf32>
    %195 = vector.broadcast %194 : vector<64x1xf32> to vector<64x64xf32>
    %196 = arith.subf %192, %195 : vector<64x64xf32>
    %197 = math.exp %196 : vector<64x64xf32>
    %cst_63 = arith.constant dense<0.000000e+00> : vector<64xf32>
    %198 = vector.multi_reduction <add>, %197, %cst_63 [1] : vector<64x64xf32> to vector<64xf32>
    %199 = vector.shape_cast %198 : vector<64xf32> to vector<64x1xf32>
    %200 = tpu.reciprocal %199 {approx = true} : vector<64x1xf32> -> vector<64x1xf32>
    %201 = vector.broadcast %200 : vector<64x1xf32> to vector<64x64xf32>
    %202 = arith.mulf %197, %201 : vector<64x64xf32>
    %203 = vector.extract_strided_slice %3 {offsets = [2, 0], sizes = [1, 128], strides = [1, 1]} : vector<4x128xf32> to vector<1x128xf32>
    %204 = vector.broadcast %203 : vector<1x128xf32> to vector<64x128xf32>
    %205 = arith.mulf %125, %204 : vector<64x128xf32>
    %cst_64 = arith.constant dense<0.000000e+00> : vector<64x128xf32>
    %206 = tpu.matmul %202, %205, %cst_64 {dimension_numbers = #tpu.dot_dimension_numbers<[1], [0], [0], [1], [0, 0, 1, 1], [], []>} : vector<64x64xf32>, vector<64x128xf32>, vector<64x128xf32> -> vector<64x128xf32>
    %207 = arith.addf %181, %206 : vector<64x128xf32>
    %208 = vector.extract_strided_slice %127 {offsets = [0, 3], sizes = [64, 1], strides = [1, 1]} : vector<64x4xf32> to vector<64x1xf32>
    %209 = vector.extract_strided_slice %128 {offsets = [3, 0], sizes = [1, 64], strides = [1, 1]} : vector<4x64xf32> to vector<1x64xf32>
    %210 = vector.broadcast %208 : vector<64x1xf32> to vector<64x64xf32>
    %211 = vector.broadcast %209 : vector<1x64xf32> to vector<64x64xf32>
    %212 = arith.addf %210, %211 : vector<64x64xf32>
    %cst_65 = arith.constant 0.000000e+00 : f32
    %213 = vector.broadcast %cst_65 : f32 to vector<64x64xf32>
    %214 = arith.cmpf ogt, %212, %213 : vector<64x64xf32>
    %cst_66 = arith.constant 2.000000e-01 : f32
    %215 = vector.broadcast %cst_66 : f32 to vector<64x64xf32>
    %216 = arith.mulf %215, %212 : vector<64x64xf32>
    %217 = arith.select %214, %212, %216 : vector<64x64xi1>, vector<64x64xf32>
    %218 = arith.addf %217, %2 : vector<64x64xf32>
    %cst_67 = arith.constant dense<0xFF800000> : vector<64xf32>
    %219 = vector.multi_reduction <maximumf>, %218, %cst_67 [1] : vector<64x64xf32> to vector<64xf32>
    %220 = vector.shape_cast %219 : vector<64xf32> to vector<64x1xf32>
    %221 = vector.broadcast %220 : vector<64x1xf32> to vector<64x64xf32>
    %222 = arith.subf %218, %221 : vector<64x64xf32>
    %223 = math.exp %222 : vector<64x64xf32>
    %cst_68 = arith.constant dense<0.000000e+00> : vector<64xf32>
    %224 = vector.multi_reduction <add>, %223, %cst_68 [1] : vector<64x64xf32> to vector<64xf32>
    %225 = vector.shape_cast %224 : vector<64xf32> to vector<64x1xf32>
    %226 = tpu.reciprocal %225 {approx = true} : vector<64x1xf32> -> vector<64x1xf32>
    %227 = vector.broadcast %226 : vector<64x1xf32> to vector<64x64xf32>
    %228 = arith.mulf %223, %227 : vector<64x64xf32>
    %229 = vector.extract_strided_slice %3 {offsets = [3, 0], sizes = [1, 128], strides = [1, 1]} : vector<4x128xf32> to vector<1x128xf32>
    %230 = vector.broadcast %229 : vector<1x128xf32> to vector<64x128xf32>
    %231 = arith.mulf %125, %230 : vector<64x128xf32>
    %cst_69 = arith.constant dense<0.000000e+00> : vector<64x128xf32>
    %232 = tpu.matmul %228, %231, %cst_69 {dimension_numbers = #tpu.dot_dimension_numbers<[1], [0], [0], [1], [0, 0, 1, 1], [], []>} : vector<64x64xf32>, vector<64x128xf32>, vector<64x128xf32> -> vector<64x128xf32>
    %233 = arith.addf %207, %232 : vector<64x128xf32>
    %234 = vector.broadcast %124 : vector<1x128xf32> to vector<64x128xf32>
    %235 = arith.addf %233, %234 : vector<64x128xf32>
    %cst_70 = arith.constant 0.000000e+00 : f32
    %236 = vector.broadcast %cst_70 : f32 to vector<64x128xf32>
    %237 = arith.maximumf %235, %236 : vector<64x128xf32>
    %c0_71 = arith.constant 0 : index
    %c0_72 = arith.constant 0 : index
    %238 = vector.load %arg3[%c0_71, %c0_72] : memref<64x64xf32, #tpu.memory_space<vmem>>, vector<64x64xf32>
    %cst_73 = arith.constant dense<0.000000e+00> : vector<64x128xf32>
    %239 = tpu.matmul %238, %237, %cst_73 {dimension_numbers = #tpu.dot_dimension_numbers<[1], [0], [0], [1], [0, 0, 1, 1], [], []>} : vector<64x64xf32>, vector<64x128xf32>, vector<64x128xf32> -> vector<64x128xf32>
    %240 = tpu.concatenate %237, %239 in 1 : vector<64x128xf32>, vector<64x128xf32> -> vector<64x256xf32>
    %c0_74 = arith.constant 0 : index
    %c0_75 = arith.constant 0 : index
    %241 = vector.load %arg13[%c0_74, %c0_75] : memref<256x64xf32, #tpu.memory_space<vmem>>, vector<256x64xf32>
    %cst_76 = arith.constant dense<0.000000e+00> : vector<64x64xf32>
    %242 = tpu.matmul %240, %241, %cst_76 {dimension_numbers = #tpu.dot_dimension_numbers<[1], [0], [0], [1], [0, 0, 1, 1], [], []>} : vector<64x256xf32>, vector<256x64xf32>, vector<64x64xf32> -> vector<64x64xf32>
    %c0_77 = arith.constant 0 : index
    %c0_78 = arith.constant 0 : index
    %243 = vector.load %arg14[%c0_77, %c0_78] : memref<1x64xf32, #tpu.memory_space<vmem>>, vector<1x64xf32>
    %244 = vector.broadcast %243 : vector<1x64xf32> to vector<64x64xf32>
    %245 = arith.addf %242, %244 : vector<64x64xf32>
    %246 = vector.extract_strided_slice %245 {offsets = [0, 0], sizes = [64, 32], strides = [1, 1]} : vector<64x64xf32> to vector<64x32xf32>
    %247 = arith.negf %246 : vector<64x32xf32>
    %248 = math.exp %247 : vector<64x32xf32>
    %cst_79 = arith.constant 1.000000e+00 : f32
    %249 = vector.broadcast %cst_79 : f32 to vector<64x32xf32>
    %250 = arith.addf %249, %248 : vector<64x32xf32>
    %251 = arith.divf %249, %250 : vector<64x32xf32>
    %252 = vector.extract_strided_slice %245 {offsets = [0, 32], sizes = [64, 32], strides = [1, 1]} : vector<64x64xf32> to vector<64x32xf32>
    %253 = math.tanh %252 : vector<64x32xf32>
    %cst_80 = arith.constant 1.000000e+00 : f32
    %254 = vector.broadcast %cst_80 : f32 to vector<64x32xf32>
    %255 = arith.subf %254, %251 : vector<64x32xf32>
    %256 = arith.mulf %255, %253 : vector<64x32xf32>
    %c0_81 = arith.constant 0 : index
    %c0_82 = arith.constant 0 : index
    %257 = vector.load %arg15[%c0_81, %c0_82] : memref<32x8xf32, #tpu.memory_space<vmem>>, vector<32x8xf32>
    %cst_83 = arith.constant dense<0.000000e+00> : vector<64x8xf32>
    %258 = tpu.matmul %256, %257, %cst_83 {dimension_numbers = #tpu.dot_dimension_numbers<[1], [0], [0], [1], [0, 0, 1, 1], [], []>} : vector<64x32xf32>, vector<32x8xf32>, vector<64x8xf32> -> vector<64x8xf32>
    %c0_84 = arith.constant 0 : index
    %c0_85 = arith.constant 0 : index
    %259 = vector.load %arg16[%c0_84, %c0_85] : memref<1x8xf32, #tpu.memory_space<vmem>>, vector<1x8xf32>
    %260 = vector.broadcast %259 : vector<1x8xf32> to vector<64x8xf32>
    %261 = arith.addf %258, %260 : vector<64x8xf32>
    %c0_86 = arith.constant 0 : index
    %c0_87 = arith.constant 0 : index
    %c0_88 = arith.constant 0 : index
    %262 = vector.load %arg17[%c0_86, %c0_87, %c0_88] : memref<1x64x8xf32, #tpu.memory_space<vmem>>, vector<1x64x8xf32>
    %263 = vector.shape_cast %262 : vector<1x64x8xf32> to vector<64x8xf32>
    %264 = vector.shape_cast %261 : vector<64x8xf32> to vector<1x64x8xf32>
    tpu.vector_store %arg17[%c0_86, %c0_87, %c0_88], %264 {strides = array<i32>} : memref<1x64x8xf32, #tpu.memory_space<vmem>>, vector<1x64x8xf32>,
    return
  }
  func.func @transform_0(%arg0: i32) -> (i32, i32, i32) {
    %c0_i32 = arith.constant 0 : i32
    %c0_i32_0 = arith.constant 0 : i32
    %c0_i32_1 = arith.constant 0 : i32
    return %arg0, %c0_i32, %c0_i32_0 : i32, i32, i32
  }
  func.func @transform_1(%arg0: i32) -> (i32, i32) {
    %c0_i32 = arith.constant 0 : i32
    %c0_i32_0 = arith.constant 0 : i32
    %c0_i32_1 = arith.constant 0 : i32
    return %c0_i32, %c0_i32_0 : i32, i32
  }
  func.func @transform_2(%arg0: i32) -> (i32, i32) {
    %c0_i32 = arith.constant 0 : i32
    %c0_i32_0 = arith.constant 0 : i32
    %c0_i32_1 = arith.constant 0 : i32
    return %c0_i32, %c0_i32_0 : i32, i32
  }
  func.func @transform_3(%arg0: i32) -> (i32, i32) {
    %c0_i32 = arith.constant 0 : i32
    %c0_i32_0 = arith.constant 0 : i32
    %c0_i32_1 = arith.constant 0 : i32
    return %c0_i32, %c0_i32_0 : i32, i32
  }
  func.func @transform_4(%arg0: i32) -> (i32, i32) {
    %c0_i32 = arith.constant 0 : i32
    %c0_i32_0 = arith.constant 0 : i32
    %c0_i32_1 = arith.constant 0 : i32
    return %c0_i32, %c0_i32_0 : i32, i32
  }
  func.func @transform_5(%arg0: i32) -> (i32, i32) {
    %c0_i32 = arith.constant 0 : i32
    %c0_i32_0 = arith.constant 0 : i32
    %c0_i32_1 = arith.constant 0 : i32
    return %c0_i32, %c0_i32_0 : i32, i32
  }
  func.func @transform_6(%arg0: i32) -> (i32, i32) {
    %c0_i32 = arith.constant 0 : i32
    %c0_i32_0 = arith.constant 0 : i32
    %c0_i32_1 = arith.constant 0 : i32
    return %c0_i32, %c0_i32_0 : i32, i32
  }
  func.func @transform_7(%arg0: i32) -> (i32, i32) {
    %c0_i32 = arith.constant 0 : i32
    %c0_i32_0 = arith.constant 0 : i32
    %c0_i32_1 = arith.constant 0 : i32
    return %c0_i32, %c0_i32_0 : i32, i32
  }
  func.func @transform_8(%arg0: i32) -> (i32, i32) {
    %c0_i32 = arith.constant 0 : i32
    %c0_i32_0 = arith.constant 0 : i32
    %c0_i32_1 = arith.constant 0 : i32
    return %c0_i32, %c0_i32_0 : i32, i32
  }
  func.func @transform_9(%arg0: i32) -> (i32, i32) {
    %c0_i32 = arith.constant 0 : i32
    %c0_i32_0 = arith.constant 0 : i32
    %c0_i32_1 = arith.constant 0 : i32
    return %c0_i32, %c0_i32_0 : i32, i32
  }
  func.func @transform_10(%arg0: i32) -> (i32, i32) {
    %c0_i32 = arith.constant 0 : i32
    %c0_i32_0 = arith.constant 0 : i32
    %c0_i32_1 = arith.constant 0 : i32
    return %c0_i32, %c0_i32_0 : i32, i32
  }
  func.func @transform_11(%arg0: i32) -> (i32, i32) {
    %c0_i32 = arith.constant 0 : i32
    %c0_i32_0 = arith.constant 0 : i32
    %c0_i32_1 = arith.constant 0 : i32
    return %c0_i32, %c0_i32_0 : i32, i32
  }
  func.func @transform_12(%arg0: i32) -> (i32, i32) {
    %c0_i32 = arith.constant 0 : i32
    %c0_i32_0 = arith.constant 0 : i32
    %c0_i32_1 = arith.constant 0 : i32
    return %c0_i32, %c0_i32_0 : i32, i32
  }
  func.func @transform_13(%arg0: i32) -> (i32, i32) {
    %c0_i32 = arith.constant 0 : i32
    %c0_i32_0 = arith.constant 0 : i32
    %c0_i32_1 = arith.constant 0 : i32
    return %c0_i32, %c0_i32_0 : i32, i32
  }
  func.func @transform_14(%arg0: i32) -> (i32, i32) {
    %c0_i32 = arith.constant 0 : i32
    %c0_i32_0 = arith.constant 0 : i32
    %c0_i32_1 = arith.constant 0 : i32
    return %c0_i32, %c0_i32_0 : i32, i32
  }
  func.func @transform_15(%arg0: i32) -> (i32, i32) {
    %c0_i32 = arith.constant 0 : i32
    %c0_i32_0 = arith.constant 0 : i32
    %c0_i32_1 = arith.constant 0 : i32
    return %c0_i32, %c0_i32_0 : i32, i32
  }
  func.func @transform_16(%arg0: i32) -> (i32, i32, i32) {
    %c0_i32 = arith.constant 0 : i32
    %c0_i32_0 = arith.constant 0 : i32
    %c0_i32_1 = arith.constant 0 : i32
    return %arg0, %c0_i32, %c0_i32_0 : i32, i32, i32
  }
}

</mosaic_0001>

<bundles_post_ra>
// kernel: tpu_custom_call.1
= control target key start
LH: loop header
LB: loop body
LE: loop exit
PB: predicated region body
PF: predicated region fallthrough
CT: control target
= control target key end

     0   :  { %s5891_s21 = smov 0   ;;  %s7693_s0 = inlined_call_operand.vmem [shape: f32[2,64,8], index: 0, kind: input, shape index: {}]   ;;  %s7694_s1 = inlined_call_operand.vmem [shape: f32[64,64], index: 1, kind: input, shape index: {}]   ;;  %s7695_s2 = inlined_call_operand.vmem [shape: f32[64,64], index: 2, kind: input, shape index: {}]   ;;  %s7696_s3 = inlined_call_operand.vmem [shape: f32[4,128], index: 3, kind: input, shape index: {}]   ;;  %s7697_s4 = inlined_call_operand.vmem [shape: f32[8,128], index: 4, kind: input, shape index: {}]   ;;  %s7698_s5 = inlined_call_operand.vmem [shape: f32[128,4], index: 5, kind: input, shape index: {}]   ;;  %s7699_s6 = inlined_call_operand.vmem [shape: f32[128,4], index: 6, kind: input, shape index: {}]   ;;  %s7700_s7 = inlined_call_operand.vmem [shape: f32[1,128], index: 7, kind: input, shape index: {}]   ;;  %s7701_s8 = inlined_call_operand.vmem [shape: f32[128,128], index: 8, kind: input, shape index: {}]   ;;  %s7702_s9 = inlined_call_operand.vmem [shape: f32[128,4], index: 9, kind: input, shape index: {}]   ;;  %s7703_s10 = inlined_call_operand.vmem [shape: f32[128,4], index: 10, kind: input, shape index: {}]   ;;  %s7704_s11 = inlined_call_operand.vmem [shape: f32[1,128], index: 11, kind: input, shape index: {}]   ;;  %s7705_s12 = inlined_call_operand.vmem [shape: f32[256,64], index: 12, kind: input, shape index: {}]   ;;  %s7706_s13 = inlined_call_operand.vmem [shape: f32[1,64], index: 13, kind: input, shape index: {}]   ;;  %s7707_s14 = inlined_call_operand.vmem [shape: f32[32,8], index: 14, kind: input, shape index: {}]   ;;  %s7708_s15 = inlined_call_operand.vmem [shape: f32[1,8], index: 15, kind: input, shape index: {}]   ;;  %s7709_s16 = inlined_call_operand.vmem [shape: f32[2,64,8], index: 16, kind: output, shape index: {}]  }
   0x1   :  { %7721 = sst [smem:[#allocation5_spill]] %s7693_s0 }
   0x2 LB: > { %s4447_s22 = sadd.s32 4294967295, %s5799_s21   ;;  %p4451_p0 = scmp.ge.s32.totalorder %s5799_s21, 1  ;;  %s5799_s21 = sphi %s5891_s21, %s26_s21  }
   0x3   : > { %p462_p1 = scmp.lt.s32.totalorder %s5799_s21, 3 }
   0x5   : > { %p463_p2 = pnand %p4451_p0, %p462_p1 }
   0x7   : > { %466 = sbr.rel (%p463_p2) target bundleno = 3174 (0xc66), region = 84 }
   0xc   : > { %v539_v0 = vld [vmem:[%s7697_s4] sm:$0xff]  ;;  %p512_p3 = scmp.lt.s32.totalorder %s4447_s22, 1  ;;  %v555_v1 = vld [vmem:[%s7698_s5 + $0x78] sm:$0xff]  ;;  %v570_v3 = vld [vmem:[%s7699_s6 + $0x70] sm:$0xff]  ;;  %vm573_vm0 = vcmask 64512   ;;  %s7722_s25 = sld [smem:[#allocation5_spill]]  ;;  %v985_v43 = vlaneseq }
   0xd   : > { %v571_v2 = vld [vmem:[%s7699_s6 + $0x78] sm:$0xff]  ;;  %4901 = vmatprep.subr.mxu1 %v539_v0  ;;  %v569_v4 = vld [vmem:[%s7699_s6 + $0x68] sm:$0xff]  ;;  %v568_v5 = vld [vmem:[%s7699_s6 + $0x60] sm:$0xff]  ;;  %v7716_v41 = vmov 1   ;;  %v7710_v42 = vmov 0   ;;  %vm1029_vm1 = vcmask 523264  }
   0xe   : > { %4959 = vmatprep.subr.mxu0 %v571_v2  ;;  %4902 = vmatpush3.msra.mxu1 %v539_v0  ;;  %s7734_s22 = smov (!%p512_p3, %s4447_s22), 1  ;;  %v554_v9 = vld [vmem:[%s7698_s5 + $0x70] sm:$0xff]  ;;  %v567_v10 = vld [vmem:[%s7699_s6 + $0x58] sm:$0xff]  ;;  %v553_v12 = vld [vmem:[%s7698_s5 + $0x68] sm:$0xff]  ;;  %v986_v46 = vshrl.u32 %v985_v43, 7  ;;  %s5805_s30 = smov 96  }
   0xf   : > { %4960 = vmatpush3.msra.mxu0 %v571_v2  ;;  %4915 = vmatprep.subr.mxu1 %v555_v1  ;;  %s4558_s18 = sshll.u32 %s7734_s22, 6  ;;  %v552_v14 = vld [vmem:[%s7698_s5 + $0x60] sm:$0xff]  ;;  %v566_v15 = vld [vmem:[%s7699_s6 + $0x50] sm:$0xff]  ;;  %v551_v17 = vld [vmem:[%s7698_s5 + $0x58] sm:$0xff] }
  0x10   : > { %4961 = vmatprep.subr.mxu0 %v570_v3  ;;  %v550_v19 = vld [vmem:[%s7698_s5 + $0x50] sm:$0xff]  ;;  %v565_v20 = vld [vmem:[%s7699_s6 + $0x48] sm:$0xff]  ;;  %v564_v23 = vld [vmem:[%s7699_s6 + $0x40] sm:$0xff]  ;;  %5421 = vset.pattern.permute.xlu0 %v7716_v41  ;;  %v6040_v49 = vsub.s32 1, %v986_v46  ;;  %v6042_v50 = vsub.s32 0, %v986_v46  ;;  %s521_s23 = scalar_lea.vmem %s7709_s16, %s4558_s18 }
  0x11   : > { %4962 = vmatpush3.msra.mxu0 %v570_v3  ;;  %v549_v22 = vld [vmem:[%s7698_s5 + $0x48] sm:$0xff]  ;;  %v548_v24 = vld [vmem:[%s7698_s5 + $0x40] sm:$0xff]  ;;  %v563_v25 = vld [vmem:[%s7699_s6 + $0x38] sm:$0xff]  ;;  %5422 = vset.pattern.permute.xlu1 %v7710_v42 }
  0x12   : > { %s5925_s26 = scalar_lea.vmem %s7722_s25, %s4558_s18  ;;  %4963 = vmatprep.subr.mxu0 %v569_v4  ;;  %v547_v26 = vld [vmem:[%s7698_s5 + $0x38] sm:$0xff]  ;;  %v562_v27 = vld [vmem:[%s7699_s6 + $0x30] sm:$0xff]  ;;  %v561_v29 = vld [vmem:[%s7699_s6 + $0x28] sm:$0xff]  ;;  %7723 = vst [vmem:[#allocation2_spill] sm:$0xff] %v6040_v49 }
  0x13   : > { %v522_v6 = vld [vmem:[%s5925_s26] sm:$0xff]  ;;  %v523_v7 = vld [vmem:[%s5925_s26 + $0x8] sm:$0xff]  ;;  %v524_v8 = vld [vmem:[%s5925_s26 + $0x10] sm:$0xff]  ;;  %4964 = vmatpush3.msra.mxu0 %v569_v4  ;;  %v6083_v4 = vsub.s32 2, %v986_v46 }
  0x14   : > { %4903 = vmatprep.mubr.msk.f32.mxu1 %vm573_vm0, %v522_v6  ;;  %4965 = vmatprep.subr.mxu0 %v568_v5  ;;  %v525_v11 = vld [vmem:[%s5925_s26 + $0x18] sm:$0xff]  ;;  %v526_v13 = vld [vmem:[%s5925_s26 + $0x20] sm:$0xff]  ;;  %v527_v16 = vld [vmem:[%s5925_s26 + $0x28] sm:$0xff] }
  0x15   : > { %4904 = vmatmul.mubr.msk.f32.vlgmr.msra.gmra.mxu1 %vm573_vm0, %v523_v7  ;;  %4966 = vmatpush3.msra.mxu0 %v568_v5  ;;  %v528_v18 = vld [vmem:[%s5925_s26 + $0x30] sm:$0xff]  ;;  %v529_v21 = vld [vmem:[%s5925_s26 + $0x38] sm:$0xff]  ;;  %v545_v30 = vld [vmem:[%s7698_s5 + $0x28] sm:$0xff]  ;;  %7724 = vst [vmem:[#allocation3_spill] sm:$0xff] %v6083_v4  ;;  %v6089_v7 = vsub.s32 3, %v986_v46 }
  0x16   : > { %4906 = vmatprep.mubr.msk.f32.mxu1 %vm573_vm0, %v524_v8  ;;  %4916 = vmatpush3.msra.mxu1 %v555_v1  ;;  %v546_v28 = vld [vmem:[%s7698_s5 + $0x30] sm:$0xff]  ;;  %v560_v31 = vld [vmem:[%s7699_s6 + $0x20] sm:$0xff]  ;;  %v559_v33 = vld [vmem:[%s7699_s6 + $0x18] sm:$0xff] }
  0x17   : > { %4917 = vmatprep.subr.mxu1 %v554_v9  ;;  %4967 = vmatprep.subr.mxu0 %v567_v10  ;;  %v544_v32 = vld [vmem:[%s7698_s5 + $0x20] sm:$0xff]  ;;  %v543_v34 = vld [vmem:[%s7698_s5 + $0x18] sm:$0xff]  ;;  %v558_v35 = vld [vmem:[%s7699_s6 + $0x10] sm:$0xff]  ;;  %7725 = vst [vmem:[#allocation4_spill] sm:$0xff] %v6089_v7 }
  0x18   : > { %4918 = vmatpush3.msra.mxu1 %v554_v9  ;;  %4968 = vmatpush3.msra.mxu0 %v567_v10  ;;  %v542_v36 = vld [vmem:[%s7698_s5 + $0x10] sm:$0xff]  ;;  %v541_v37 = vld [vmem:[%s7698_s5 + $0x8] sm:$0xff]  ;;  %v540_v39 = vld [vmem:[%s7698_s5] sm:$0xff] }
  0x19   : > { %4907 = vmatmul.mubr.msk.f32.gmra.mxu1 %vm573_vm0, %v525_v11  ;;  %4919 = vmatprep.subr.mxu1 %v553_v12  ;;  %v557_v38 = vld [vmem:[%s7699_s6 + $0x8] sm:$0xff]  ;;  %v556_v40 = vld [vmem:[%s7699_s6] sm:$0xff] }
  0x1a   : > { %4909 = vmatprep.mubr.msk.f32.mxu1 %vm573_vm0, %v526_v13  ;;  %4920 = vmatpush3.msra.mxu1 %v553_v12  ;;  %v538_v52 = vld [vmem:[%s7696_s3] sm:$0xf] }
  0x1b   : > { %4921 = vmatprep.subr.mxu1 %v552_v14  ;;  %4969 = vmatprep.subr.mxu0 %v566_v15  ;;  %v6054_v54 = vrot.slane %v538_v52, %v6040_v49  ;;  %v6057_v55 = vrot.slane %v538_v52, %v6042_v50  ;;  %v6096_v10 = vrot.slane %v538_v52, %v6083_v4 }
  0x1c   : > { %4922 = vmatpush3.msra.mxu1 %v552_v14  ;;  %4970 = vmatpush3.msra.mxu0 %v566_v15  ;;  %v6103_v13 = vrot.slane %v538_v52, %v6089_v7 }
  0x1d   : > { %4910 = vmatmul.mubr.msk.f32.gmra.mxu1 %vm573_vm0, %v527_v16  ;;  %4923 = vmatprep.subr.mxu1 %v551_v17 }
  0x1e   : > { %4912 = vmatprep.mubr.msk.f32.mxu1 %vm573_vm0, %v528_v18  ;;  %4924 = vmatpush3.msra.mxu1 %v551_v17  ;;  %v7712_v17 = vmov 3   ;;  %v7714_v18 = vmov 2  }
  0x1f   : > { %4925 = vmatprep.subr.mxu1 %v550_v19  ;;  %4971 = vmatprep.subr.mxu0 %v565_v20 }
  0x20   : > { %4926 = vmatpush3.msra.mxu1 %v550_v19  ;;  %4972 = vmatpush3.msra.mxu0 %v565_v20 }
  0x21   : > { %4913 = vmatmul.mubr.msk.f32.gmra.mxu1 %vm573_vm0, %v529_v21  ;;  %4927 = vmatprep.subr.mxu1 %v549_v22 }
  0x22   : > { %4928 = vmatpush3.msra.mxu1 %v549_v22  ;;  %4973 = vmatprep.subr.mxu0 %v564_v23 }
  0x23   : > { %4929 = vmatprep.subr.mxu1 %v548_v24  ;;  %4974 = vmatpush3.msra.mxu0 %v564_v23 }
  0x24   : > { %4930 = vmatpush3.msra.mxu1 %v548_v24  ;;  %4975 = vmatprep.subr.mxu0 %v563_v25 }
  0x25   : > { %4931 = vmatprep.subr.mxu1 %v547_v26  ;;  %4976 = vmatpush3.msra.mxu0 %v563_v25 }
  0x26   : > { %4932 = vmatpush3.msra.mxu1 %v547_v26  ;;  %4977 = vmatprep.subr.mxu0 %v562_v27 }
  0x27   : > { %4933 = vmatprep.subr.mxu1 %v546_v28  ;;  %4978 = vmatpush3.msra.mxu0 %v562_v27 }
  0x28   : > { %4934 = vmatpush3.msra.mxu1 %v546_v28  ;;  %4979 = vmatprep.subr.mxu0 %v561_v29 }
  0x29   : > { %4935 = vmatprep.subr.mxu1 %v545_v30  ;;  %4980 = vmatpush3.msra.mxu0 %v561_v29 }
  0x2a   : > { %4936 = vmatpush3.msra.mxu1 %v545_v30  ;;  %4981 = vmatprep.subr.mxu0 %v560_v31 }
  0x2b   : > { %4937 = vmatprep.subr.mxu1 %v544_v32  ;;  %4982 = vmatpush3.msra.mxu0 %v560_v31 }
  0x2c   : > { %4938 = vmatpush3.msra.mxu1 %v544_v32  ;;  %4983 = vmatprep.subr.mxu0 %v559_v33 }
  0x2d   : > { %4939 = vmatprep.subr.mxu1 %v543_v34  ;;  %4984 = vmatpush3.msra.mxu0 %v559_v33 }
  0x2e   : > { %4940 = vmatpush3.msra.mxu1 %v543_v34  ;;  %4985 = vmatprep.subr.mxu0 %v558_v35 }
  0x2f   : > { %4941 = vmatprep.subr.mxu1 %v542_v36  ;;  %4986 = vmatpush3.msra.mxu0 %v558_v35 }
  0x30   : > { %4942 = vmatpush3.msra.mxu1 %v542_v36  ;;  %4987 = vmatprep.subr.mxu0 %v557_v38 }
  0x31   : > { %4943 = vmatprep.subr.mxu1 %v541_v37  ;;  %4988 = vmatpush3.msra.mxu0 %v557_v38 }
  0x32   : > { %4944 = vmatpush3.msra.mxu1 %v541_v37  ;;  %4989 = vmatprep.subr.mxu0 %v556_v40 }
  0x33   : > { %4945 = vmatprep.subr.mxu1 %v540_v39  ;;  %4990 = vmatpush3.msra.mxu0 %v556_v40 }
  0x34   : > { %4946 = vmatpush3.msra.mxu1 %v540_v39 }
  0xd5   : > { %v6026_v44 = vpop.f32.mrf.mxu1 }
  0xd6   : > { %v1299_v8 = vmul.f32 %v6026_v44, %v6054_v54  ;;  %v1123_v9 = vmul.f32 %v6026_v44, %v6057_v55 }
  0xd7   : > { %v6028_v45 = vpop.f32.mrf.mxu1 }
  0xd8   : > { %4947 = vmatprep.mubr.f32.mxu1 %v6028_v45  ;;  %4991 = vmatprep.mubr.f32.mxu0 %v6028_v45  ;;  %v1298_v11 = vmul.f32 %v6054_v54, %v6028_v45  ;;  %v1122_v12 = vmul.f32 %v6057_v55, %v6028_v45 }
  0xd9   : > { %v6032_v47 = vpop.f32.mrf.mxu1  ;;  %4948 = vmatmul.mubr.f32.vlgmr.msra.gmra.mxu1 %v6026_v44  ;;  %4992 = vmatmul.mubr.f32.vlgmr.msra.gmra.mxu0 %v6026_v44 }
  0xda   : > { %v1301_v2 = vmul.f32 %v6032_v47, %v6054_v54  ;;  %v1125_v3 = vmul.f32 %v6032_v47, %v6057_v55 }
  0xdb   : > { %v6036_v48 = vpop.f32.mrf.mxu1 }
  0xdc   : > { %4950 = vmatprep.mubr.f32.mxu1 %v6036_v48  ;;  %4994 = vmatprep.mubr.f32.mxu0 %v6036_v48  ;;  %v1300_v5 = vmul.f32 %v6054_v54, %v6036_v48  ;;  %v1124_v6 = vmul.f32 %v6057_v55, %v6036_v48 }
  0xdd   : > { %v6044_v51 = vpop.f32.mrf.mxu1  ;;  %4951 = vmatmul.mubr.f32.gmra.mxu1 %v6032_v47  ;;  %4995 = vmatmul.mubr.f32.gmra.mxu0 %v6032_v47 }
  0xde   : > { %v1303_v60 = vmul.f32 %v6044_v51, %v6054_v54  ;;  %v1127_v63 = vmul.f32 %v6044_v51, %v6057_v55 }
  0xdf   : > { %v6051_v53 = vpop.f32.mrf.mxu1 }
  0xe0   : > { %4953 = vmatprep.mubr.f32.mxu1 %v6051_v53  ;;  %4997 = vmatprep.mubr.f32.mxu0 %v6051_v53  ;;  %v1302_v0 = vmul.f32 %v6054_v54, %v6051_v53  ;;  %v1126_v1 = vmul.f32 %v6057_v55, %v6051_v53 }
  0xe1   : > { %v4914_v56 = vpop.f32.mrf.mxu1  ;;  %4954 = vmatmul.mubr.f32.gmra.mxu1 %v6044_v51  ;;  %4998 = vmatmul.mubr.f32.gmra.mxu0 %v6044_v51 }
  0xe2   : > { %v1305_v57 = vmul.f32 %v4914_v56, %v6054_v54  ;;  %v1129_v58 = vmul.f32 %v4914_v56, %v6057_v55  ;;  %v6106_v14 = vmul.f32 %v4914_v56, %v6096_v10  ;;  %v6109_v15 = vmul.f32 %v4914_v56, %v6103_v13 }
  0xe3   : > { %v6065_v59 = vpop.f32.mrf.mxu1 }
  0xe4   : > { %5003 = vmatprep.subr.mxu1 %v1305_v57  ;;  %5031 = vmatprep.subr.mxu0 %v1129_v58  ;;  %v1304_v61 = vmul.f32 %v6054_v54, %v6065_v59  ;;  %v1128_v62 = vmul.f32 %v6057_v55, %v6065_v59 }
  0xe5   : > { %5004 = vmatpush3.msra.mxu1 %v1305_v57  ;;  %5032 = vmatpush3.msra.mxu0 %v1129_v58 }
  0xe6   : > { %5005 = vmatprep.subr.mxu1 %v1304_v61  ;;  %5033 = vmatprep.subr.mxu0 %v1128_v62 }
  0xe7   : > { %5006 = vmatpush3.msra.mxu1 %v1304_v61  ;;  %5034 = vmatpush3.msra.mxu0 %v1128_v62 }
  0xe8   : > { %5007 = vmatprep.subr.mxu1 %v1303_v60  ;;  %5035 = vmatprep.subr.mxu0 %v1127_v63 }
  0xe9   : > { %5008 = vmatpush3.msra.mxu1 %v1303_v60  ;;  %5036 = vmatpush3.msra.mxu0 %v1127_v63 }
  0xea   : > { %5009 = vmatprep.subr.mxu1 %v1302_v0  ;;  %5037 = vmatprep.subr.mxu0 %v1126_v1 }
  0xeb   : > { %5010 = vmatpush3.msra.mxu1 %v1302_v0  ;;  %5038 = vmatpush3.msra.mxu0 %v1126_v1 }
  0xec   : > { %5011 = vmatprep.subr.mxu1 %v1301_v2  ;;  %5039 = vmatprep.subr.mxu0 %v1125_v3 }
  0xed   : > { %5012 = vmatpush3.msra.mxu1 %v1301_v2  ;;  %5040 = vmatpush3.msra.mxu0 %v1125_v3 }
  0xee   : > { %5013 = vmatprep.subr.mxu1 %v1300_v5  ;;  %5041 = vmatprep.subr.mxu0 %v1124_v6 }
  0xef   : > { %5014 = vmatpush3.msra.mxu1 %v1300_v5  ;;  %5042 = vmatpush3.msra.mxu0 %v1124_v6 }
  0xf0   : > { %5015 = vmatprep.subr.mxu1 %v1299_v8  ;;  %5043 = vmatprep.subr.mxu0 %v1123_v9 }
  0xf1   : > { %5016 = vmatpush3.msra.mxu1 %v1299_v8  ;;  %5044 = vmatpush3.msra.mxu0 %v1123_v9 }
  0xf2   : > { %5017 = vmatprep.subr.mxu1 %v1298_v11  ;;  %5045 = vmatprep.subr.mxu0 %v1122_v12 }
  0xf3   : > { %5018 = vmatpush3.msra.mxu1 %v1298_v11  ;;  %5046 = vmatpush3.msra.mxu0 %v1122_v12 }
  0xf4   : > { %4956 = vmatprep.mubr.f32.mxu1 %v6065_v59  ;;  %5000 = vmatprep.mubr.f32.mxu0 %v6065_v59 }
  0xf5   : > { %4957 = vmatmul.mubr.f32.gmra.mxu1 %v4914_v56  ;;  %5001 = vmatmul.mubr.f32.gmra.mxu0 %v4914_v56 }
  0xf6   : > { %5059 = vmatprep.subr.mxu1 %v6106_v14  ;;  %5087 = vmatprep.subr.mxu0 %v6109_v15 }
 0x199   : > { %v4993_v16 = vpop.f32.mrf.mxu0  ;;  %v4949_v26 = vpop.f32.mrf.mxu1 }
 0x19a   : > { %952 = vperm.xlu1 %5422, %v4993_v16   ;;  %1135 = vperm.xlu0 %5421, %v4993_v16  }
 0x19b   : > { %v874_v19 = vpop.f32.mrf.mxu0  ;;  %v769_v27 = vpop.f32.mrf.mxu1 }
 0x19d   : > { %v4996_v20 = vpop.f32.mrf.mxu0  ;;  %v4952_v28 = vpop.f32.mrf.mxu1 }
 0x19e   : > { %5424 = vset.pattern.permute.xlu1 %v7712_v17  ;;  %5423 = vset.pattern.permute.xlu0 %v7714_v18 }
 0x19f   : > { %1882 = vperm.xlu1 %5424, %v4993_v16   ;;  %1569 = vperm.xlu0 %5423, %v4993_v16   ;;  %v884_v21 = vpop.f32.mrf.mxu0  ;;  %v779_v29 = vpop.f32.mrf.mxu1 }
 0x1a1   : > { %v4999_v22 = vpop.f32.mrf.mxu0  ;;  %v4955_v30 = vpop.f32.mrf.mxu1 }
 0x1a3   : > { %5426 = vset.pattern.permute.xlu1 %v7710_v42  ;;  %5425 = vset.pattern.permute.xlu0 %v7716_v41  ;;  %v894_v23 = vpop.f32.mrf.mxu0  ;;  %v789_v31 = vpop.f32.mrf.mxu1 }
 0x1a4   : > { %947 = vperm.xlu1 %5426, %v874_v19   ;;  %1131 = vperm.xlu0 %5425, %v874_v19  }
 0x1a8   : > { %5427 = vset.pattern.permute.xlu1 %v7714_v18  ;;  %1139 = vperm.xlu0 %5425, %v884_v21  }
 0x1a9   : > { %1565 = vperm.xlu1 %5427, %v874_v19  }
 0x1ac   : > { %5433 = vset.pattern.permute.xlu0 %v7710_v42 }
 0x1ad   : > { %5428 = vset.pattern.permute.xlu1 %v7712_v17  ;;  %957 = vperm.xlu0 %5433, %v884_v21  }
 0x1ae   : > { %1878 = vperm.xlu1 %5428, %v874_v19  }
 0x1b1   : > { %5434 = vset.pattern.permute.xlu0 %v7714_v18 }
 0x1b2   : > { %5429 = vset.pattern.permute.xlu1 %v7716_v41  ;;  %1573 = vperm.xlu0 %5434, %v884_v21  }
 0x1b3   : > { %1143 = vperm.xlu1 %5429, %v4996_v20  }
 0x1b5   : > { %v5002_v24 = vpop.f32.mrf.mxu0  ;;  %v4958_v32 = vpop.f32.mrf.mxu1 }
 0x1b6   : > { %5435 = vset.pattern.permute.xlu0 %v7712_v17 }
 0x1b7   : > { %5430 = vset.pattern.permute.xlu1 %v7710_v42  ;;  %1886 = vperm.xlu0 %5435, %v884_v21   ;;  %v904_v25 = vpop.f32.mrf.mxu0  ;;  %v799_v33 = vpop.f32.mrf.mxu1 }
 0x1b8   : > { %962 = vperm.xlu1 %5430, %v4996_v20  }
 0x1bb   : > { %5436 = vset.pattern.permute.xlu0 %v7716_v41 }
 0x1bc   : > { %5431 = vset.pattern.permute.xlu1 %v7714_v18  ;;  %1151 = vperm.xlu0 %5436, %v4999_v22  }
 0x1bd   : > { %1577 = vperm.xlu1 %5431, %v4996_v20  }
 0x1c0   : > { %5438 = vset.pattern.permute.xlu0 %v7714_v18 }
 0x1c1   : > { %5432 = vset.pattern.permute.xlu1 %v7712_v17  ;;  %1585 = vperm.xlu0 %5438, %v4999_v22  }
 0x1c2   : > { %1890 = vperm.xlu1 %5432, %v4996_v20  }
 0x1c5   : > { %5448 = vset.pattern.permute.xlu0 %v7716_v41 }
 0x1c6   : > { %5437 = vset.pattern.permute.xlu1 %v7710_v42  ;;  %1155 = vperm.xlu0 %5448, %v904_v25  }
 0x1c7   : > { %972 = vperm.xlu1 %5437, %v4999_v22  }
 0x1ca   : > { %5449 = vset.pattern.permute.xlu0 %v7710_v42 }
 0x1cb   : > { %5439 = vset.pattern.permute.xlu1 %v7712_v17  ;;  %977 = vperm.xlu0 %5449, %v904_v25  }
 0x1cc   : > { %1898 = vperm.xlu1 %5439, %v4999_v22  }
 0x1d0   : > { %5440 = vset.pattern.permute.xlu1 %v7716_v41 }
 0x1d1   : > { %1147 = vperm.xlu1 %5440, %v894_v23  }
 0x1d5   : > { %5441 = vset.pattern.permute.xlu1 %v7710_v42 }
 0x1d6   : > { %967 = vperm.xlu1 %5441, %v894_v23  }
 0x1da   : > { %5442 = vset.pattern.permute.xlu1 %v7714_v18 }
 0x1db   : > { %1581 = vperm.xlu1 %5442, %v894_v23  }
 0x1df   : > { %5443 = vset.pattern.permute.xlu1 %v7712_v17 }
 0x1e0   : > { %1894 = vperm.xlu1 %5443, %v894_v23  }
 0x1e4   : > { %5444 = vset.pattern.permute.xlu1 %v7716_v41 }
 0x1e5   : > { %1159 = vperm.xlu1 %5444, %v5002_v24  }
 0x1e9   : > { %5445 = vset.pattern.permute.xlu1 %v7710_v42  ;;  %913 = vxpose.xlu0.b32.start [1/8] (short) (narrow) %v769_v27, 8 }
 0x1ea   : > { %982 = vperm.xlu1 %5445, %v5002_v24  }
 0x1ed   : > { %914 = vxpose.xlu0.b32.cont [2/8] (short) (narrow) %v4949_v26, 8  ;;  %v531_v26 = vld [vmem:[%s7694_s1 + $0x8] sm:$0xff] }
 0x1ee   : > { %5446 = vset.pattern.permute.xlu1 %v7714_v18 }
 0x1ef   : > { %1593 = vperm.xlu1 %5446, %v5002_v24  }
 0x1f1   : > { %915 = vxpose.xlu0.b32.cont [3/8] (short) (narrow) %v779_v29, 8 }
 0x1f3   : > { %5447 = vset.pattern.permute.xlu1 %v7712_v17 }
 0x1f4   : > { %1906 = vperm.xlu1 %5447, %v5002_v24  }
 0x1f5   : > { %916 = vxpose.xlu0.b32.cont [4/8] (short) (narrow) %v4952_v28, 8 }
 0x1f8   : > { %5450 = vset.pattern.permute.xlu1 %v7714_v18 }
 0x1f9   : > { %1589 = vperm.xlu1 %5450, %v904_v25   ;;  %917 = vxpose.xlu0.b32.cont [5/8] (short) (narrow) %v789_v31, 8  ;;  %v6206_v31 = vld [vmem:[%s7694_s1] sm:$0xff] }
 0x1fd   : > { %5451 = vset.pattern.permute.xlu1 %v7712_v17  ;;  %918 = vxpose.xlu0.b32.cont [6/8] (short) (narrow) %v4955_v30, 8 }
 0x1fe   : > { %1902 = vperm.xlu1 %5451, %v904_v25  }
 0x201   : > { %919 = vxpose.xlu0.b32.cont [7/8] (short) (narrow) %v799_v33, 8 }
 0x202   : > { %5453 = vset.pattern.permute.xlu1 %v7710_v42 }
 0x205   : > { %920 = vxpose.xlu0.b32.end [8/8] (short) (narrow) %v4958_v32, 8 }
 0x215   : > { %v953_v34 = vpop.permute.xlu1 %952  ;;  %v1136_v37 = vpop.permute.xlu0 %1135 }
 0x21a   : > { %v1883_v35 = vpop.permute.xlu1 %1882  ;;  %v1570_v39 = vpop.permute.xlu0 %1569 }
 0x21f   : > { %v948_v36 = vpop.permute.xlu1 %947  ;;  %v1132_v43 = vpop.permute.xlu0 %1131 }
 0x223   : > { %v6150_v52 = vpop.permute.xlu0 %1139 }
 0x224   : > { %v1566_v38 = vpop.permute.xlu1 %1565 }
 0x228   : > { %v6154_v57 = vpop.permute.xlu0 %957 }
 0x229   : > { %v6145_v40 = vpop.permute.xlu1 %1878 }
 0x22d   : > { %v6156_v60 = vpop.permute.xlu0 %1573 }
 0x22e   : > { %5452 = vset.pattern.permute.xlu0 %v7716_v41  ;;  %v6148_v46 = vpop.permute.xlu1 %1143 }
 0x232   : > { %v6160_v62 = vpop.permute.xlu0 %1886 }
 0x233   : > { %v6152_v56 = vpop.permute.xlu1 %962 }
 0x237   : > { %v6164_v0 = vpop.permute.xlu0 %1151 }
 0x238   : > { %v1578_v58 = vpop.permute.xlu1 %1577 }
 0x23c   : > { %v6168_v2 = vpop.permute.xlu0 %1585 }
 0x23d   : > { %v6158_v61 = vpop.permute.xlu1 %1890 }
 0x241   : > { %v6172_v5 = vpop.permute.xlu0 %1155 }
 0x242   : > { %v6162_v63 = vpop.permute.xlu1 %972 }
 0x246   : > { %v6176_v8 = vpop.permute.xlu0 %977 }
 0x247   : > { %v6166_v1 = vpop.permute.xlu1 %1898 }
 0x24c   : > { %v6170_v3 = vpop.permute.xlu1 %1147 }
 0x251   : > { %v6174_v6 = vpop.permute.xlu1 %967 }
 0x256   : > { %v6178_v9 = vpop.permute.xlu1 %1581 }
 0x25b   : > { %v6192_v21 = vpop.permute.xlu1 %1894 }
 0x265   : > { %v929_v11 = vpop.trf.xlu0 }
 0x266   : > { %v6181_v12 = vrot.slane %v929_v11, %v6042_v50  ;;  %v6184_v16 = vrot.slane %v929_v11, %v6040_v49  ;;  %v6187_v19 = vrot.slane %v929_v11, %v6083_v4  ;;  %v6190_v20 = vrot.slane %v929_v11, %v6089_v7 }
 0x268   : > { %v1167_v22 = vadd.f32 %v6184_v16, %v1136_v37  ;;  %v990_v23 = vadd.f32 %v6181_v12, %v953_v34  ;;  %v1166_v24 = vadd.f32 %v6184_v16, %v1132_v43  ;;  %v1601_v25 = vadd.f32 %v6187_v19, %v1570_v39 }
 0x269   : > { %v1914_v27 = vadd.f32 %v6190_v20, %v1883_v35  ;;  %v989_v28 = vadd.f32 %v6181_v12, %v948_v36  ;;  %v1603_v33 = vadd.f32 %v6187_v19, %v1578_v58  ;;  %v1600_v35 = vadd.f32 %v6187_v19, %v1566_v38  ;;  %v6210_v36 = vpop.permute.xlu1 %1159 }
 0x26a   : > { %vm1175_vm2 = vcmp.gt.f32.partialorder %v1167_v22, 0.0  ;;  %v1183_v29 = vmul.f32 0.2, %v1167_v22  ;;  %vm998_vm3 = vcmp.gt.f32.partialorder %v990_v23, 0.0  ;;  %v1006_v30 = vmul.f32 0.2, %v990_v23 }
 0x26b   : > { %vm1174_vm4 = vcmp.gt.f32.partialorder %v1166_v24, 0.0  ;;  %v1182_v32 = vmul.f32 0.2, %v1166_v24  ;;  %vm1609_vm5 = vcmp.gt.f32.partialorder %v1601_v25, 0.0  ;;  %v1617_v39 = vmul.f32 0.2, %v1601_v25 }
 0x26c   : > { %v1191_v34 = vsel %vm1175_vm2, %v1167_v22, %v1183_v29  ;;  %v1014_v37 = vsel %vm998_vm3, %v990_v23, %v1006_v30  ;;  %vm1922_vm6 = vcmp.gt.f32.partialorder %v1914_v27, 0.0  ;;  %v1930_v41 = vmul.f32 0.2, %v1914_v27 }
 0x26d   : > { %v6212_v43 = vadd.f32 %v1191_v34, %v531_v26  ;;  %v6214_v11 = vadd.f32 %v1014_v37, %v531_v26  ;;  %v1190_v42 = vsel %vm1174_vm4, %v1166_v24, %v1182_v32  ;;  %v1625_v18 = vsel %vm1609_vm5, %v1601_v25, %v1617_v39  ;;  %v983_v37 = vpop.permute.xlu1 %982 }
 0x26e   : > { %v6217_v17 = vadd.f32 %v1190_v42, %v6206_v31  ;;  %vm997_vm7 = vcmp.gt.f32.partialorder %v989_v28, 0.0  ;;  %v6223_v22 = vadd.f32 %v1625_v18, %v531_v26  ;;  %v1005_v23 = vmul.f32 0.2, %v989_v28 }
 0x26f   : > { %v1209_v58 = vsel %vm1029_vm1, %v6212_v43, -inf  ;;  %v1033_v38 = vsel %vm1029_vm1, %v6214_v11, -inf  ;;  %v1938_v29 = vsel %vm1922_vm6, %v1914_v27, %v1930_v41  ;;  %vm1611_vm8 = vcmp.gt.f32.partialorder %v1603_v33, 0.0  ;;  %v6237_v41 = vld [vmem:[%s7694_s1 + $0x18] sm:$0xff] }
 0x270   : > { %1210 = vmax.xlane.f32.xlu1 %v1209_v58  ;;  %1034 = vmax.xlane.f32.xlu0 %v1033_v38  ;;  %v1206_v42 = vsel %vm1029_vm1, %v6217_v17, -inf  ;;  %v1013_v24 = vsel %vm997_vm7, %v989_v28, %v1005_v23  ;;  %v1619_v25 = vmul.f32 0.2, %v1603_v33  ;;  %v1643_v30 = vsel %vm1029_vm1, %v6223_v22, -inf }
 0x271   : > { %v6229_v32 = vadd.f32 %v1938_v29, %v531_v26  ;;  %vm1608_vm9 = vcmp.gt.f32.partialorder %v1600_v35, 0.0  ;;  %v1616_v34 = vmul.f32 0.2, %v1600_v35  ;;  %v6232_v18 = vadd.f32 %v1013_v24, %v6206_v31 }
 0x272   : > { %v1627_v27 = vsel %vm1611_vm8, %v1603_v33, %v1619_v25  ;;  %v1916_v28 = vadd.f32 %v6190_v20, %v6158_v61  ;;  %v1913_v39 = vadd.f32 %v6190_v20, %v6145_v40  ;;  %v996_v58 = vadd.f32 %v6181_v12, %v983_v37 }
 0x273   : > { %v1624_v26 = vsel %vm1608_vm9, %v1600_v35, %v1616_v34  ;;  %v6245_v23 = vadd.f32 %v1627_v27, %v6237_v41  ;;  %v1956_v33 = vsel %vm1029_vm1, %v6229_v32, -inf  ;;  %v1030_v61 = vsel %vm1029_vm1, %v6232_v18, -inf }
 0x274   : > { %1207 = vmax.xlane.f32.xlu1 %v1206_v42  ;;  %1644 = vmax.xlane.f32.xlu0 %v1643_v30  ;;  %vm1924_vm10 = vcmp.gt.f32.partialorder %v1916_v28, 0.0  ;;  %v1932_v38 = vmul.f32 0.2, %v1916_v28  ;;  %vm1921_vm11 = vcmp.gt.f32.partialorder %v1913_v39, 0.0  ;;  %v1929_v29 = vmul.f32 0.2, %v1913_v39  ;;  %v1594_v30 = vpop.permute.xlu1 %1593 }
 0x275   : > { %v6252_v40 = vadd.f32 %v1624_v26, %v6206_v31  ;;  %v1012_v24 = vmul.f32 0.2, %v996_v58  ;;  %v1169_v25 = vadd.f32 %v6184_v16, %v6148_v46  ;;  %vm1004_vm12 = vcmp.gt.f32.partialorder %v996_v58, 0.0 }
 0x276   : > { %v1940_v35 = vsel %vm1924_vm10, %v1916_v28, %v1932_v38  ;;  %v1937_v42 = vsel %vm1921_vm11, %v1913_v39, %v1929_v29  ;;  %v1605_v34 = vadd.f32 %v6187_v19, %v6168_v2  ;;  %v992_v37 = vadd.f32 %v6181_v12, %v6152_v56  ;;  %v6273_v56 = vld [vmem:[%s7694_s1 + $0x38] sm:$0xff] }
 0x277   : > { %v1649_v27 = vsel %vm1029_vm1, %v6245_v23, -inf  ;;  %vm1177_vm13 = vcmp.gt.f32.partialorder %v1169_v25, 0.0  ;;  %v1640_v28 = vsel %vm1029_vm1, %v6252_v40, -inf  ;;  %v6265_v39 = vadd.f32 %v1940_v35, %v6237_v41 }
 0x278   : > { %1957 = vmax.xlane.f32.xlu0 %v1956_v33  ;;  %1031 = vmax.xlane.f32.xlu1 %v1030_v61  ;;  %v6268_v46 = vadd.f32 %v1937_v42, %v6206_v31  ;;  %v1185_v26 = vmul.f32 0.2, %v1169_v25  ;;  %v1020_v2 = vsel %vm1004_vm12, %v996_v58, %v1012_v24  ;;  %vm1613_vm14 = vcmp.gt.f32.partialorder %v1605_v34, 0.0  ;;  %v1907_v42 = vpop.permute.xlu1 %1906 }
 0x279   : > { %v1621_v38 = vmul.f32 0.2, %v1605_v34  ;;  %v1008_v29 = vmul.f32 0.2, %v992_v37  ;;  %vm1000_vm15 = vcmp.gt.f32.partialorder %v992_v37, 0.0  ;;  %v1918_v61 = vadd.f32 %v6190_v20, %v6166_v1 }
 0x27a   : > { %v1193_v33 = vsel %vm1177_vm13, %v1169_v25, %v1185_v26  ;;  %v1168_v31 = vadd.f32 %v6184_v16, %v6150_v52  ;;  %v1607_v35 = vadd.f32 %v6187_v19, %v1594_v30  ;;  %v1953_v58 = vsel %vm1029_vm1, %v6268_v46, -inf  ;;  %v6293_v52 = vld [vmem:[%s7694_s1 + $0x28] sm:$0xff] }
 0x27b   : > { %v6285_v24 = vadd.f32 %v1020_v2, %v6273_v56  ;;  %v6288_v25 = vadd.f32 %v1193_v33, %v6237_v41  ;;  %v1629_v1 = vsel %vm1613_vm14, %v1605_v34, %v1621_v38  ;;  %v1016_v30 = vsel %vm1000_vm15, %v992_v37, %v1008_v29 }
 0x27c   : > { %1650 = vmax.xlane.f32.xlu0 %v1649_v27  ;;  %1641 = vmax.xlane.f32.xlu1 %v1640_v28  ;;  %v1962_v27 = vsel %vm1029_vm1, %v6265_v39, -inf  ;;  %v1934_v28 = vmul.f32 0.2, %v1918_v61  ;;  %v1184_v26 = vmul.f32 0.2, %v1168_v31  ;;  %vm1926_vm2 = vcmp.gt.f32.partialorder %v1918_v61, 0.0 }
 0x27d   : > { %vm1176_vm3 = vcmp.gt.f32.partialorder %v1168_v31, 0.0  ;;  %v991_v2 = vadd.f32 %v6181_v12, %v6154_v57  ;;  %v1623_v7 = vmul.f32 0.2, %v1607_v35  ;;  %v1920_v33 = vadd.f32 %v6190_v20, %v1907_v42  ;;  %v532_v57 = vld [vmem:[%s7694_s1 + $0x10] sm:$0xff] }
 0x27e   : > { %v6304_v4 = vadd.f32 %v1629_v1, %v6293_v52  ;;  %v6307_v34 = vadd.f32 %v1016_v30, %v6237_v41  ;;  %v1942_v37 = vsel %vm1926_vm2, %v1918_v61, %v1934_v28  ;;  %v1192_v38 = vsel %vm1176_vm3, %v1168_v31, %v1184_v26 }
 0x27f   : > { %v1007_v29 = vmul.f32 0.2, %v991_v2  ;;  %v1602_v42 = vadd.f32 %v6187_v19, %v6156_v60  ;;  %vm1615_vm4 = vcmp.gt.f32.partialorder %v1607_v35, 0.0  ;;  %vm999_vm5 = vcmp.gt.f32.partialorder %v991_v2, 0.0 }
 0x280   : > { %1963 = vmax.xlane.f32.xlu0 %v1962_v27  ;;  %1954 = vmax.xlane.f32.xlu1 %v1953_v58  ;;  %v1051_v27 = vsel %vm1029_vm1, %v6285_v24, -inf  ;;  %v1215_v58 = vsel %vm1029_vm1, %v6288_v25, -inf  ;;  %v1936_v49 = vmul.f32 0.2, %v1920_v33  ;;  %v1655_v1 = vsel %vm1029_vm1, %v6304_v4, -inf }
 0x281   : > { %v1039_v41 = vsel %vm1029_vm1, %v6307_v34, -inf  ;;  %v6319_v61 = vadd.f32 %v1942_v37, %v6293_v52  ;;  %v6321_v30 = vadd.f32 %v1192_v38, %v532_v57  ;;  %v1631_v31 = vsel %vm1615_vm4, %v1607_v35, %v1623_v7 }
 0x282   : > { %v1015_v28 = vsel %vm999_vm5, %v991_v2, %v1007_v29  ;;  %v1618_v26 = vmul.f32 0.2, %v1602_v42  ;;  %v1915_v60 = vadd.f32 %v6190_v20, %v6160_v62  ;;  %vm1928_vm6 = vcmp.gt.f32.partialorder %v1920_v33, 0.0 }
 0x283   : > { %vm1610_vm7 = vcmp.gt.f32.partialorder %v1602_v42, 0.0  ;;  %v6330_v37 = vadd.f32 %v1631_v31, %v6273_v56  ;;  %v6332_v38 = vadd.f32 %v1015_v28, %v532_v57  ;;  %v1944_v7 = vsel %vm1928_vm6, %v1920_v33, %v1936_v49 }
 0x284   : > { %1052 = vmax.xlane.f32.xlu0 %v1051_v27  ;;  %1216 = vmax.xlane.f32.xlu1 %v1215_v58  ;;  %v1968_v27 = vsel %vm1029_vm1, %v6319_v61, -inf  ;;  %v1212_v58 = vsel %vm1029_vm1, %v6321_v30, -inf  ;;  %v1626_v35 = vsel %vm1610_vm7, %v1602_v42, %v1618_v26  ;;  %v1931_v2 = vmul.f32 0.2, %v1915_v60 }
 0x285   : > { %v1171_v62 = vadd.f32 %v6184_v16, %v6164_v0  ;;  %vm1923_vm8 = vcmp.gt.f32.partialorder %v1915_v60, 0.0  ;;  %v1661_v29 = vsel %vm1029_vm1, %v6330_v37, -inf  ;;  %v6343_v31 = vadd.f32 %v1626_v35, %v532_v57 }
 0x286   : > { %v1939_v49 = vsel %vm1923_vm8, %v1915_v60, %v1931_v2  ;;  %v994_v42 = vadd.f32 %v6181_v12, %v6162_v63  ;;  %v1170_v60 = vadd.f32 %v6184_v16, %v6170_v3  ;;  %v534_v3 = vld [vmem:[%s7694_s1 + $0x20] sm:$0xff] }
 0x287   : > { %v1187_v33 = vmul.f32 0.2, %v1171_v62  ;;  %vm1179_vm9 = vcmp.gt.f32.partialorder %v1171_v62, 0.0  ;;  %v1646_v28 = vsel %vm1029_vm1, %v6343_v31, -inf  ;;  %v6351_v26 = vadd.f32 %v1939_v49, %v532_v57 }
 0x288   : > { %1656 = vmax.xlane.f32.xlu0 %v1655_v1  ;;  %1040 = vmax.xlane.f32.xlu1 %v1039_v41  ;;  %v1036_v1 = vsel %vm1029_vm1, %v6332_v38, -inf  ;;  %v6341_v41 = vadd.f32 %v1944_v7, %v6273_v56  ;;  %vm1002_vm10 = vcmp.gt.f32.partialorder %v994_v42, 0.0  ;;  %v1186_v2 = vmul.f32 0.2, %v1170_v60 }
 0x289   : > { %v1959_v63 = vsel %vm1029_vm1, %v6351_v26, -inf  ;;  %v993_v57 = vadd.f32 %v6181_v12, %v6174_v6  ;;  %vm1178_vm11 = vcmp.gt.f32.partialorder %v1170_v60, 0.0 }
 0x28a   : > { %v1974_v0 = vsel %vm1029_vm1, %v6341_v41, -inf }
 0x28b   : > { %v1009_v49 = vmul.f32 0.2, %v993_v57  ;;  %vm1001_vm12 = vcmp.gt.f32.partialorder %v993_v57, 0.0 }
 0x28c   : > { %1969 = vmax.xlane.f32.xlu0 %v1968_v27  ;;  %1213 = vmax.xlane.f32.xlu1 %v1212_v58  ;;  %v1195_v27 = vsel %vm1179_vm9, %v1171_v62, %v1187_v33  ;;  %v1010_v58 = vmul.f32 0.2, %v994_v42  ;;  %v1173_v33 = vadd.f32 %v6184_v16, %v6210_v36 }
 0x28d   : > { %v6358_v7 = vadd.f32 %v1195_v27, %v6293_v52 }
 0x28e   : > { %v1018_v35 = vsel %vm1002_vm10, %v994_v42, %v1010_v58  ;;  %vm1181_vm13 = vcmp.gt.f32.partialorder %v1173_v33, 0.0 }
 0x28f   : > { %v1221_v62 = vsel %vm1029_vm1, %v6358_v7, -inf }
 0x290   : > { %1662 = vmax.xlane.f32.xlu0 %v1661_v29  ;;  %1037 = vmax.xlane.f32.xlu1 %v1036_v1  ;;  %v6365_v29 = vadd.f32 %v1018_v35, %v6293_v52  ;;  %v1194_v1 = vsel %vm1178_vm11, %v1170_v60, %v1186_v2  ;;  %v1189_v52 = vmul.f32 0.2, %v1173_v33 }
 0x291   : > { %v6374_v42 = vadd.f32 %v1194_v1, %v534_v3  ;;  %v1590_v1 = vpop.permute.xlu1 %1589 }
 0x292   : > { %v1045_v6 = vsel %vm1029_vm1, %v6365_v29, -inf  ;;  %v1197_v36 = vsel %vm1181_vm13, %v1173_v33, %v1189_v52  ;;  %v1917_v33 = vadd.f32 %v6190_v20, %v6192_v21 }
 0x293   : > { %v1218_v27 = vsel %vm1029_vm1, %v6374_v42, -inf  ;;  %v6387_v2 = vadd.f32 %v1197_v36, %v6273_v56 }
 0x294   : > { %1975 = vmax.xlane.f32.xlu0 %v1974_v0  ;;  %1647 = vmax.xlane.f32.xlu1 %v1646_v28  ;;  %v1017_v0 = vsel %vm1001_vm12, %v993_v57, %v1009_v49  ;;  %v1172_v28 = vadd.f32 %v6184_v16, %v6172_v5  ;;  %v536_v5 = vld [vmem:[%s7694_s1 + $0x30] sm:$0xff]  ;;  %vm1925_vm3 = vcmp.gt.f32.partialorder %v1917_v33, 0.0 }
 0x295   : > { %v6380_v58 = vadd.f32 %v1017_v0, %v534_v3 }
 0x296   : > { %v1188_v60 = vmul.f32 0.2, %v1172_v28  ;;  %vm1180_vm14 = vcmp.gt.f32.partialorder %v1172_v28, 0.0 }
 0x297   : > { %v1042_v35 = vsel %vm1029_vm1, %v6380_v58, -inf }
 0x298   : > { %1960 = vmax.xlane.f32.xlu1 %v1959_v63  ;;  %v995_v63 = vadd.f32 %v6181_v12, %v6176_v8  ;;  %v1196_v16 = vsel %vm1180_vm14, %v1172_v28, %v1188_v60  ;;  %v1227_v8 = vsel %vm1029_vm1, %v6387_v2, -inf  ;;  %v1933_v28 = vmul.f32 0.2, %v1917_v33 }
 0x299   : > { %v6396_v12 = vadd.f32 %v1196_v16, %v536_v5 }
 0x29a   : > { %v1011_v57 = vmul.f32 0.2, %v995_v63  ;;  %vm1003_vm15 = vcmp.gt.f32.partialorder %v995_v63, 0.0 }
 0x29c   : > { %1222 = vmax.xlane.f32.xlu1 %v1221_v62  ;;  %v1604_v62 = vadd.f32 %v6187_v19, %v6178_v9  ;;  %v1019_v56 = vsel %vm1003_vm15, %v995_v63, %v1011_v57  ;;  %v1606_v9 = vadd.f32 %v6187_v19, %v1590_v1 }
 0x29d   : > { %v6402_v0 = vadd.f32 %v1019_v56, %v536_v5 }
 0x29e   : > { %v1620_v49 = vmul.f32 0.2, %v1604_v62  ;;  %vm1612_vm2 = vcmp.gt.f32.partialorder %v1604_v62, 0.0  ;;  %v1622_v63 = vmul.f32 0.2, %v1606_v9  ;;  %vm1614_vm4 = vcmp.gt.f32.partialorder %v1606_v9, 0.0 }
 0x29f   : > { %v1048_v36 = vsel %vm1029_vm1, %v6402_v0, -inf }
 0x2a0   : > { %1046 = vmax.xlane.f32.xlu1 %v1045_v6  ;;  %v1224_v6 = vsel %vm1029_vm1, %v6396_v12, -inf  ;;  %v1628_v52 = vsel %vm1612_vm2, %v1604_v62, %v1620_v49  ;;  %v1630_v62 = vsel %vm1614_vm4, %v1606_v9, %v1622_v63 }
 0x2a1   : > { %v6407_v60 = vadd.f32 %v1628_v52, %v534_v3 }
 0x2a3   : > { %v1652_v16 = vsel %vm1029_vm1, %v6407_v60, -inf }
 0x2a4   : > { %1219 = vmax.xlane.f32.xlu1 %v1218_v27  ;;  %v1903_v27 = vpop.permute.xlu1 %1902 }
 0x2a5   : > { %v1919_v21 = vadd.f32 %v6190_v20, %v1903_v27 }
 0x2a7   : > { %v1935_v57 = vmul.f32 0.2, %v1919_v21  ;;  %vm1927_vm5 = vcmp.gt.f32.partialorder %v1919_v21, 0.0 }
 0x2a8   : > { %1043 = vmax.xlane.f32.xlu1 %v1042_v35  ;;  %v1941_v35 = vsel %vm1925_vm3, %v1917_v33, %v1933_v28 }
 0x2a9   : > { %v6412_v19 = vadd.f32 %v1941_v35, %v534_v3  ;;  %v1943_v56 = vsel %vm1927_vm5, %v1919_v21, %v1935_v57 }
 0x2aa   : > { %v6420_v49 = vadd.f32 %v1943_v56, %v536_v5 }
 0x2ab   : > { %v1965_v1 = vsel %vm1029_vm1, %v6412_v19, -inf }
 0x2ac   : > { %1228 = vmax.xlane.f32.xlu1 %v1227_v8  ;;  %v6416_v8 = vadd.f32 %v1630_v62, %v536_v5  ;;  %v1971_v3 = vsel %vm1029_vm1, %v6420_v49, -inf }
 0x2ae   : > { %v1658_v20 = vsel %vm1029_vm1, %v6416_v8, -inf }
 0x2b0   : > { %1225 = vmax.xlane.f32.xlu1 %v1224_v6 }
 0x2b4   : > { %1049 = vmax.xlane.f32.xlu1 %v1048_v36 }
 0x2b8   : > { %1653 = vmax.xlane.f32.xlu1 %v1652_v16 }
 0x2bc   : > { %1966 = vmax.xlane.f32.xlu1 %v1965_v1 }
 0x2c0   : > { %1659 = vmax.xlane.f32.xlu1 %v1658_v20 }
 0x2c4   : > { %1972 = vmax.xlane.f32.xlu1 %v1971_v3 }
 0x2f9   : > { %v1211_v33 = vpop.xlane.xlu1 %1210  ;;  %v1035_v6 = vpop.xlane.xlu0 %1034 }
 0x2fa   : > { %v1231_v9 = vsub.f32 %v6212_v43, %v1211_v33  ;;  %v1055_v52 = vsub.f32 %v6214_v11, %v1035_v6 }
 0x2fc   : > { %v1240_v28 = vmul.f32 1.442695, %v1231_v9  ;;  %v1064_v27 = vmul.f32 1.442695, %v1055_v52 }
 0x2fd   : > { %v1208_v36 = vpop.xlane.xlu1 %1207  ;;  %v1645_v63 = vpop.xlane.xlu0 %1644 }
 0x2fe   : > { %5481 = vpow2.f32 %v1240_v28  ;;  %v1230_v21 = vsub.f32 %v6217_v17, %v1208_v36  ;;  %v1665_v5 = vsub.f32 %v6223_v22, %v1645_v63 }
 0x2ff   : > { %5483 = vpow2.f32 %v1064_v27 }
 0x300   : > { %v1238_v35 = vmul.f32 1.442695, %v1230_v21  ;;  %v1674_v16 = vmul.f32 1.442695, %v1665_v5 }
 0x301   : > { %v1958_v57 = vpop.xlane.xlu0 %1957  ;;  %v1032_v62 = vpop.xlane.xlu1 %1031 }
 0x302   : > { %5485 = vpow2.f32 %v1238_v35  ;;  %v1978_v1 = vsub.f32 %v6229_v32, %v1958_v57  ;;  %v1054_v43 = vsub.f32 %v6232_v18, %v1032_v62 }
 0x303   : > { %5487 = vpow2.f32 %v1674_v16 }
 0x304   : > { %v1987_v11 = vmul.f32 1.442695, %v1978_v1  ;;  %v1062_v56 = vmul.f32 1.442695, %v1054_v43 }
 0x305   : > { %v1642_v20 = vpop.xlane.xlu1 %1641  ;;  %v1651_v9 = vpop.xlane.xlu0 %1650 }
 0x306   : > { %v1664_v3 = vsub.f32 %v6252_v40, %v1642_v20  ;;  %5489 = vpow2.f32 %v1062_v56  ;;  %v1667_v5 = vsub.f32 %v6245_v23, %v1651_v9 }
 0x307   : > { %5491 = vpow2.f32 %v1987_v11 }
 0x308   : > { %v1672_v17 = vmul.f32 1.442695, %v1664_v3  ;;  %v1678_v11 = vmul.f32 1.442695, %v1667_v5 }
 0x309   : > { %v1955_v22 = vpop.xlane.xlu1 %1954  ;;  %v1964_v16 = vpop.xlane.xlu0 %1963 }
 0x30a   : > { %v1977_v33 = vsub.f32 %v6268_v46, %v1955_v22  ;;  %5493 = vpow2.f32 %v1672_v17  ;;  %v1980_v56 = vsub.f32 %v6265_v39, %v1964_v16 }
 0x30b   : > { %v6432_v6 = vpop.eup %5481 }
 0x30c   : > { %v1985_v52 = vmul.f32 1.442695, %v1977_v33  ;;  %v1257_v32 = vsel %vm1029_vm1, %v6432_v6, 0.0  ;;  %v6436_v18 = vpop.eup %5483  ;;  %v1991_v33 = vmul.f32 1.442695, %v1980_v56 }
 0x30d   : > { %1258 = vadd.xlane.f32.xlu0 %v1257_v32  ;;  %v1217_v28 = vpop.xlane.xlu1 %1216  ;;  %v1081_v46 = vsel %vm1029_vm1, %v6436_v18, 0.0 }
 0x30e   : > { %v1233_v40 = vsub.f32 %v6288_v25, %v1217_v28  ;;  %5495 = vpow2.f32 %v1985_v52 }
 0x30f   : > { %v6439_v27 = vpop.eup %5485 }
 0x310   : > { %v1244_v36 = vmul.f32 1.442695, %v1233_v40  ;;  %v1254_v63 = vsel %vm1029_vm1, %v6439_v27, 0.0  ;;  %v6445_v21 = vpop.eup %5487 }
 0x311   : > { %1082 = vadd.xlane.f32.xlu0 %v1081_v46  ;;  %1255 = vadd.xlane.f32.xlu1 %v1254_v63  ;;  %v1041_v35 = vpop.xlane.xlu1 %1040  ;;  %v1691_v1 = vsel %vm1029_vm1, %v6445_v21, 0.0 }
 0x312   : > { %v1057_v25 = vsub.f32 %v6307_v34, %v1041_v35  ;;  %5497 = vpow2.f32 %v1244_v36 }
 0x313   : > { %v6449_v57 = vpop.eup %5489 }
 0x314   : > { %v1068_v62 = vmul.f32 1.442695, %v1057_v25  ;;  %v6453_v43 = vpop.eup %5491  ;;  %v1078_v23 = vsel %vm1029_vm1, %v6449_v57, 0.0 }
 0x315   : > { %1692 = vadd.xlane.f32.xlu0 %v1691_v1  ;;  %v1214_v20 = vpop.xlane.xlu1 %1213  ;;  %1079 = vadd.xlane.f32.xlu1 %v1078_v23  ;;  %v2004_v22 = vsel %vm1029_vm1, %v6453_v43, 0.0 }
 0x316   : > { %v1232_v34 = vsub.f32 %v6321_v30, %v1214_v20  ;;  %5499 = vpow2.f32 %v1068_v62  ;;  %v1053_v20 = vpop.xlane.xlu0 %1052 }
 0x317   : > { %v6459_v3 = vpop.eup %5493  ;;  %5501 = vpow2.f32 %v1678_v11 }
 0x318   : > { %v1242_v17 = vmul.f32 1.442695, %v1232_v34  ;;  %v1688_v39 = vsel %vm1029_vm1, %v6459_v3, 0.0 }
 0x319   : > { %2005 = vadd.xlane.f32.xlu0 %v2004_v22  ;;  %v1038_v9 = vpop.xlane.xlu1 %1037  ;;  %1689 = vadd.xlane.f32.xlu1 %v1688_v39 }
 0x31a   : > { %v1056_v52 = vsub.f32 %v6332_v38, %v1038_v9  ;;  %5503 = vpow2.f32 %v1242_v17 }
 0x31b   : > { %v6466_v32 = vpop.eup %5495  ;;  %5505 = vpow2.f32 %v1991_v33 }
 0x31c   : > { %v1066_v30 = vmul.f32 1.442695, %v1056_v52  ;;  %v2001_v28 = vsel %vm1029_vm1, %v6466_v32, 0.0 }
 0x31d   : > { %v1648_v40 = vpop.xlane.xlu1 %1647  ;;  %2002 = vadd.xlane.f32.xlu1 %v2001_v28 }
 0x31e   : > { %v1666_v36 = vsub.f32 %v6343_v31, %v1648_v40  ;;  %5507 = vpow2.f32 %v1066_v30  ;;  %v1657_v40 = vpop.xlane.xlu0 %1656 }
 0x31f   : > { %v6471_v46 = vpop.eup %5497 }
 0x320   : > { %v1676_v63 = vmul.f32 1.442695, %v1666_v36  ;;  %v1263_v5 = vsel %vm1029_vm1, %v6471_v46, 0.0 }
 0x321   : > { %v1961_v38 = vpop.xlane.xlu1 %1960  ;;  %1264 = vadd.xlane.f32.xlu0 %v1263_v5 }
 0x322   : > { %v1979_v35 = vsub.f32 %v6351_v26, %v1961_v38  ;;  %5509 = vpow2.f32 %v1676_v63 }
 0x323   : > { %v6476_v16 = vpop.eup %5499 }
 0x324   : > { %v1989_v25 = vmul.f32 1.442695, %v1979_v35  ;;  %v1087_v62 = vsel %vm1029_vm1, %v6476_v16, 0.0  ;;  %v6480_v31 = vpop.eup %5501 }
 0x325   : > { %v1223_v1 = vpop.xlane.xlu1 %1222  ;;  %1088 = vadd.xlane.f32.xlu0 %v1087_v62  ;;  %v1697_v26 = vsel %vm1029_vm1, %v6480_v31, 0.0 }
 0x326   : > { %5511 = vpow2.f32 %v1989_v25  ;;  %v1235_v11 = vsub.f32 %v6358_v7, %v1223_v1  ;;  %v1061_v25 = vsub.f32 %v6285_v24, %v1053_v20  ;;  %v1970_v1 = vpop.xlane.xlu0 %1969 }
 0x327   : > { %v6483_v56 = vpop.eup %5503 }
 0x328   : > { %v1248_v23 = vmul.f32 1.442695, %v1235_v11  ;;  %v1260_v34 = vsel %vm1029_vm1, %v6483_v56, 0.0  ;;  %v6489_v22 = vpop.eup %5505 }
 0x329   : > { %v1047_v17 = vpop.xlane.xlu1 %1046  ;;  %1698 = vadd.xlane.f32.xlu0 %v1697_v26  ;;  %1261 = vadd.xlane.f32.xlu1 %v1260_v34  ;;  %v2010_v9 = vsel %vm1029_vm1, %v6489_v22, 0.0  ;;  %v1076_v34 = vmul.f32 1.442695, %v1061_v25 }
 0x32a   : > { %5513 = vpow2.f32 %v1248_v23  ;;  %v1059_v33 = vsub.f32 %v6365_v29, %v1047_v17  ;;  %v1669_v17 = vsub.f32 %v6304_v4, %v1657_v40 }
 0x32b   : > { %v6492_v39 = vpop.eup %5507 }
 0x32c   : > { %v1072_v7 = vmul.f32 1.442695, %v1059_v33  ;;  %v1084_v52 = vsel %vm1029_vm1, %v6492_v39, 0.0 }
 0x32d   : > { %v1220_v30 = vpop.xlane.xlu1 %1219  ;;  %2011 = vadd.xlane.f32.xlu0 %v2010_v9  ;;  %1085 = vadd.xlane.f32.xlu1 %v1084_v52  ;;  %v1982_v9 = vsub.f32 %v6319_v61, %v1970_v1  ;;  %v1663_v52 = vpop.xlane.xlu0 %1662 }
 0x32e   : > { %5515 = vpow2.f32 %v1072_v7  ;;  %v1234_v28 = vsub.f32 %v6374_v42, %v1220_v30 }
 0x32f   : > { %v6499_v36 = vpop.eup %5509 }
 0x330   : > { %v1246_v63 = vmul.f32 1.442695, %v1234_v28  ;;  %v1694_v29 = vsel %vm1029_vm1, %v6499_v36, 0.0 }
 0x331   : > { %v1044_v5 = vpop.xlane.xlu1 %1043  ;;  %1695 = vadd.xlane.f32.xlu1 %v1694_v29  ;;  %v1995_v29 = vmul.f32 1.442695, %v1982_v9 }
 0x332   : > { %5517 = vpow2.f32 %v1246_v63  ;;  %v1058_v38 = vsub.f32 %v6380_v58, %v1044_v5 }
 0x333   : > { %v6504_v35 = vpop.eup %5511 }
 0x334   : > { %v1070_v62 = vmul.f32 1.442695, %v1058_v38  ;;  %v2007_v42 = vsel %vm1029_vm1, %v6504_v35, 0.0  ;;  %v1976_v38 = vpop.xlane.xlu0 %1975 }
 0x335   : > { %v1229_v11 = vpop.xlane.xlu1 %1228  ;;  %2008 = vadd.xlane.f32.xlu1 %v2007_v42  ;;  %v1984_v1 = vsub.f32 %v6341_v41, %v1976_v38 }
 0x336   : > { %5519 = vpow2.f32 %v1070_v62  ;;  %v1237_v23 = vsub.f32 %v6387_v2, %v1229_v11  ;;  %v1682_v2 = vmul.f32 1.442695, %v1669_v17 }
 0x337   : > { %v6510_v26 = vpop.eup %5513 }
 0x338   : > { %v1252_v58 = vmul.f32 1.442695, %v1237_v23  ;;  %v1269_v33 = vsel %vm1029_vm1, %v6510_v26, 0.0 }
 0x339   : > { %1270 = vadd.xlane.f32.xlu0 %v1269_v33  ;;  %v1226_v24 = vpop.xlane.xlu1 %1225 }
 0x33a   : > { %5521 = vpow2.f32 %v1252_v58  ;;  %v1236_v20 = vsub.f32 %v6396_v12, %v1226_v24  ;;  %v1671_v12 = vsub.f32 %v6330_v37, %v1663_v52  ;;  %v1999_v58 = vmul.f32 1.442695, %v1984_v1 }
 0x33b   : > { %v6516_v7 = vpop.eup %5515  ;;  %5523 = vpow2.f32 %v1076_v34 }
 0x33c   : > { %v1250_v30 = vmul.f32 1.442695, %v1236_v20  ;;  %v1093_v4 = vsel %vm1029_vm1, %v6516_v7, 0.0 }
 0x33d   : > { %1094 = vadd.xlane.f32.xlu0 %v1093_v4  ;;  %v1050_v28 = vpop.xlane.xlu1 %1049 }
 0x33e   : > { %5525 = vpow2.f32 %v1250_v30  ;;  %v1060_v40 = vsub.f32 %v6402_v0, %v1050_v28  ;;  %v1686_v0 = vmul.f32 1.442695, %v1671_v12 }
 0x33f   : > { %v6522_v63 = vpop.eup %5517  ;;  %5527 = vpow2.f32 %v1682_v2 }
 0x340   : > { %v1074_v5 = vmul.f32 1.442695, %v1060_v40  ;;  %v1266_v61 = vsel %vm1029_vm1, %v6522_v63, 0.0 }
 0x341   : > { %1267 = vadd.xlane.f32.xlu1 %v1266_v61  ;;  %v1654_v25 = vpop.xlane.xlu1 %1653 }
 0x342   : > { %5529 = vpow2.f32 %v1074_v5  ;;  %v1668_v62 = vsub.f32 %v6407_v60, %v1654_v25 }
 0x343   : > { %v6528_v42 = vpop.eup %5519  ;;  %5531 = vpow2.f32 %v1995_v29 }
 0x344   : > { %v1680_v11 = vmul.f32 1.442695, %v1668_v62  ;;  %v1090_v37 = vsel %vm1029_vm1, %v6528_v42, 0.0 }
 0x345   : > { %1091 = vadd.xlane.f32.xlu1 %v1090_v37  ;;  %v1967_v23 = vpop.xlane.xlu1 %1966 }
 0x346   : > { %5533 = vpow2.f32 %v1680_v11  ;;  %v1981_v34 = vsub.f32 %v6412_v19, %v1967_v23 }
 0x347   : > { %v6534_v17 = vpop.eup %5521  ;;  %5535 = vpow2.f32 %v1686_v0 }
 0x348   : > { %v1993_v60 = vmul.f32 1.442695, %v1981_v34  ;;  %v1275_v33 = vsel %vm1029_vm1, %v6534_v17, 0.0  ;;  %v6538_v24 = vpop.eup %5523 }
 0x349   : > { %1276 = vadd.xlane.f32.xlu0 %v1275_v33  ;;  %v1660_v41 = vpop.xlane.xlu1 %1659  ;;  %v1099_v19 = vsel %vm1029_vm1, %v6538_v24, 0.0 }
 0x34a   : > { %5537 = vpow2.f32 %v1993_v60  ;;  %v1670_v20 = vsub.f32 %v6416_v8, %v1660_v41 }
 0x34b   : > { %v6541_v9 = vpop.eup %5525  ;;  %5539 = vpow2.f32 %v1999_v58 }
 0x34c   : > { %v1684_v52 = vmul.f32 1.442695, %v1670_v20  ;;  %v1272_v2 = vsel %vm1029_vm1, %v6541_v9, 0.0  ;;  %v6547_v30 = vpop.eup %5527 }
 0x34d   : > { %1100 = vadd.xlane.f32.xlu0 %v1099_v19  ;;  %1273 = vadd.xlane.f32.xlu1 %v1272_v2  ;;  %v1973_v4 = vpop.xlane.xlu1 %1972  ;;  %v1703_v12 = vsel %vm1029_vm1, %v6547_v30, 0.0 }
 0x34e   : > { %5541 = vpow2.f32 %v1684_v52  ;;  %v1983_v28 = vsub.f32 %v6420_v49, %v1973_v4 }
 0x34f   : > { %v6550_v40 = vpop.eup %5529 }
 0x350   : > { %v6552_v8 = vpop.eup %5531  ;;  %v1997_v29 = vmul.f32 1.442695, %v1983_v28  ;;  %v1096_v5 = vsel %vm1029_vm1, %v6550_v40, 0.0 }
 0x351   : > { %1704 = vadd.xlane.f32.xlu0 %v1703_v12  ;;  %1097 = vadd.xlane.f32.xlu1 %v1096_v5  ;;  %v2016_v38 = vsel %vm1029_vm1, %v6552_v8, 0.0 }
 0x352   : > { %5543 = vpow2.f32 %v1997_v29 }
 0x353   : > { %v6558_v61 = vpop.eup %5533 }
 0x354   : > { %v1700_v49 = vsel %vm1029_vm1, %v6558_v61, 0.0  ;;  %v6564_v25 = vpop.eup %5535 }
 0x355   : > { %2017 = vadd.xlane.f32.xlu0 %v2016_v38  ;;  %1701 = vadd.xlane.f32.xlu1 %v1700_v49  ;;  %v1709_v0 = vsel %vm1029_vm1, %v6564_v25, 0.0 }
 0x357   : > { %v6566_v62 = vpop.eup %5537 }
 0x358   : > { %v2013_v1 = vsel %vm1029_vm1, %v6566_v62, 0.0  ;;  %v6572_v11 = vpop.eup %5539 }
 0x359   : > { %1710 = vadd.xlane.f32.xlu0 %v1709_v0  ;;  %2014 = vadd.xlane.f32.xlu1 %v2013_v1  ;;  %v2022_v23 = vsel %vm1029_vm1, %v6572_v11, 0.0  ;;  %v1738_v0 = vmul.f32 %v6096_v10, %v6065_v59 }
 0x35b   : > { %v6574_v37 = vpop.eup %5541 }
 0x35c   : > { %v1706_v34 = vsel %vm1029_vm1, %v6574_v37, 0.0 }
 0x35d   : > { %2023 = vadd.xlane.f32.xlu0 %v2022_v23  ;;  %1707 = vadd.xlane.f32.xlu1 %v1706_v34  ;;  %v1737_v34 = vmul.f32 %v6044_v51, %v6096_v10 }
 0x35f   : > { %v6580_v58 = vpop.eup %5543 }
 0x360   : > { %v2019_v60 = vsel %vm1029_vm1, %v6580_v58, 0.0 }
 0x361   : > { %2020 = vadd.xlane.f32.xlu1 %v2019_v60  ;;  %v1735_v60 = vmul.f32 %v6032_v47, %v6096_v10 }
 0x396   : > { %v1259_v33 = vpop.xlane.xlu0 %1258 }
 0x397   : > { %5545 = vrcp.f32 %v1259_v33  ;;  %v2050_v33 = vmul.f32 %v6044_v51, %v6103_v13  ;;  %v1733_v51 = vmul.f32 %v6026_v44, %v6096_v10 }
 0x39a   : > { %v1256_v41 = vpop.xlane.xlu1 %1255  ;;  %v1083_v20 = vpop.xlane.xlu0 %1082 }
 0x39b   : > { %5547 = vrcp.f32 %v1256_v41 }
 0x39c   : > { %5549 = vrcp.f32 %v1083_v20 }
 0x39e   : > { %v1080_v52 = vpop.xlane.xlu1 %1079  ;;  %v6584_v19 = vpop.xlane.xlu0 %1692 }
 0x39f   : > { %5551 = vrcp.f32 %v1080_v52  ;;  %v2048_v52 = vmul.f32 %v6032_v47, %v6103_v13  ;;  %v2046_v47 = vmul.f32 %v6026_v44, %v6103_v13 }
 0x3a2   : > { %v6586_v28 = vpop.xlane.xlu1 %1689  ;;  %v6590_v5 = vpop.xlane.xlu0 %2005 }
 0x3a4   : > { %v5546_v2 = vpop.eup %5545 }
 0x3a5   : > { %v1287_v12 = vmul.f32 %v5546_v2, %v6432_v6  ;;  %v2047_v2 = vmul.f32 %v6103_v13, %v6036_v48 }
 0x3a8   : > { %v5548_v4 = vpop.eup %5547 }
 0x3a9   : > { %v1286_v29 = vmul.f32 %v5548_v4, %v6439_v27  ;;  %v5550_v38 = vpop.eup %5549  ;;  %v6599_v27 = vpop.xlane.xlu1 %2002 }
 0x3aa   : > { %v1111_v23 = vmul.f32 %v5550_v38, %v6436_v18  ;;  %v1265_v6 = vpop.xlane.xlu0 %1264 }
 0x3ab   : > { %5019 = vmatprep.mubr.msk.f32.mxu1 %vm1029_vm1, %v1286_v29  ;;  %5553 = vrcp.f32 %v1265_v6  ;;  %v2045_v29 = vmul.f32 %v6103_v13, %v6028_v45 }
 0x3ac   : > { %v5552_v49 = vpop.eup %5551  ;;  %5020 = vmatmul.mubr.msk.f32.vlgmr.msra.gmra.mxu1 %vm1029_vm1, %v1287_v12 }
 0x3ad   : > { %5060 = vmatpush3.msra.mxu1 %v6106_v14  ;;  %v1110_v1 = vmul.f32 %v5552_v49, %v6449_v57  ;;  %v1736_v14 = vmul.f32 %v6096_v10, %v6051_v53  ;;  %v2051_v57 = vmul.f32 %v6103_v13, %v6065_v59  ;;  %v1734_v59 = vmul.f32 %v6096_v10, %v6036_v48 }
 0x3ae   : > { %5061 = vmatprep.subr.mxu1 %v1738_v0  ;;  %v1089_v41 = vpop.xlane.xlu0 %1088 }
 0x3af   : > { %5062 = vmatpush3.msra.mxu1 %v1738_v0  ;;  %5047 = vmatprep.mubr.msk.f32.mxu0 %vm1029_vm1, %v1110_v1 }
 0x3b0   : > { %5063 = vmatprep.subr.mxu1 %v1737_v34  ;;  %5048 = vmatmul.mubr.msk.f32.vlgmr.msra.gmra.mxu0 %vm1029_vm1, %v1111_v23 }
 0x3b1   : > { %5064 = vmatpush3.msra.mxu1 %v1737_v34  ;;  %5088 = vmatpush3.msra.mxu0 %v6109_v15  ;;  %v2049_v15 = vmul.f32 %v6103_v13, %v6051_v53  ;;  %v1732_v53 = vmul.f32 %v6096_v10, %v6028_v45 }
 0x3b2   : > { %5065 = vmatprep.subr.mxu1 %v1736_v14  ;;  %5089 = vmatprep.subr.mxu0 %v2051_v57  ;;  %v1262_v18 = vpop.xlane.xlu1 %1261  ;;  %v1699_v4 = vpop.xlane.xlu0 %1698 }
 0x3b3   : > { %5066 = vmatpush3.msra.mxu1 %v1736_v14  ;;  %5090 = vmatpush3.msra.mxu0 %v2051_v57  ;;  %5555 = vrcp.f32 %v1262_v18 }
 0x3b4   : > { %5067 = vmatprep.subr.mxu1 %v1735_v60  ;;  %5091 = vmatprep.subr.mxu0 %v2050_v33  ;;  %5557 = vrcp.f32 %v1089_v41 }
 0x3b5   : > { %5068 = vmatpush3.msra.mxu1 %v1735_v60  ;;  %5092 = vmatpush3.msra.mxu0 %v2050_v33 }
 0x3b6   : > { %5069 = vmatprep.subr.mxu1 %v1734_v59  ;;  %5093 = vmatprep.subr.mxu0 %v2049_v15  ;;  %v1086_v20 = vpop.xlane.xlu1 %1085  ;;  %v2012_v48 = vpop.xlane.xlu0 %2011 }
 0x3b7   : > { %5070 = vmatpush3.msra.mxu1 %v1734_v59  ;;  %5094 = vmatpush3.msra.mxu0 %v2049_v15  ;;  %5559 = vrcp.f32 %v1086_v20 }
 0x3b8   : > { %5071 = vmatprep.subr.mxu1 %v1733_v51  ;;  %5095 = vmatprep.subr.mxu0 %v2048_v52  ;;  %v5554_v38 = vpop.eup %5553 }
 0x3b9   : > { %5072 = vmatpush3.msra.mxu1 %v1733_v51  ;;  %5096 = vmatpush3.msra.mxu0 %v2048_v52  ;;  %v1289_v1 = vmul.f32 %v5554_v38, %v6471_v46 }
 0x3ba   : > { %5073 = vmatprep.subr.mxu1 %v1732_v53  ;;  %5097 = vmatprep.subr.mxu0 %v2047_v2  ;;  %v1696_v12 = vpop.xlane.xlu1 %1695 }
 0x3bb   : > { %5074 = vmatpush3.msra.mxu1 %v1732_v53  ;;  %5098 = vmatpush3.msra.mxu0 %v2047_v2 }
 0x3bc   : > { %5099 = vmatprep.subr.mxu0 %v2046_v47 }
 0x3bd   : > { %5100 = vmatpush3.msra.mxu0 %v2046_v47 }
 0x3be   : > { %5101 = vmatprep.subr.mxu0 %v2045_v29  ;;  %v2009_v34 = vpop.xlane.xlu1 %2008 }
 0x3bf   : > { %5102 = vmatpush3.msra.mxu0 %v2045_v29 }
 0x3c0   : > { %v5556_v49 = vpop.eup %5555 }
 0x3c1   : > { %v1288_v0 = vmul.f32 %v5556_v49, %v6483_v56  ;;  %v5558_v23 = vpop.eup %5557 }
 0x3c2   : > { %v1271_v6 = vpop.xlane.xlu0 %1270  ;;  %v1113_v14 = vmul.f32 %v5558_v23, %v6476_v16 }
 0x3c3   : > { %5022 = vmatprep.mubr.msk.f32.mxu1 %vm1029_vm1, %v1288_v0  ;;  %5561 = vrcp.f32 %v1271_v6 }
 0x3c4   : > { %v5560_v44 = vpop.eup %5559  ;;  %5023 = vmatmul.mubr.msk.f32.gmra.mxu1 %vm1029_vm1, %v1289_v1 }
 0x3c5   : > { %v1112_v45 = vmul.f32 %v5560_v44, %v6492_v39 }
 0x3c6   : > { %v1095_v57 = vpop.xlane.xlu0 %1094 }
 0x3c7   : > { %5050 = vmatprep.mubr.msk.f32.mxu0 %vm1029_vm1, %v1112_v45 }
 0x3c8   : > { %5051 = vmatmul.mubr.msk.f32.gmra.mxu0 %vm1029_vm1, %v1113_v14 }
 0x3ca   : > { %v1268_v56 = vpop.xlane.xlu1 %1267 }
 0x3cb   : > { %5563 = vrcp.f32 %v1268_v56 }
 0x3cc   : > { %5565 = vrcp.f32 %v1095_v57 }
 0x3ce   : > { %v1092_v46 = vpop.xlane.xlu1 %1091 }
 0x3cf   : > { %5567 = vrcp.f32 %v1092_v46 }
 0x3d0   : > { %5569 = vrcp.f32 %v6584_v19  ;;  %v5562_v33 = vpop.eup %5561 }
 0x3d1   : > { %5571 = vrcp.f32 %v6586_v28  ;;  %v1291_v20 = vmul.f32 %v5562_v33, %v6510_v26 }
 0x3d2   : > { %v1277_v18 = vpop.xlane.xlu0 %1276 }
 0x3d3   : > { %5573 = vrcp.f32 %v1277_v18 }
 0x3d6   : > { %v1101_v60 = vpop.xlane.xlu0 %1100  ;;  %v1274_v39 = vpop.xlane.xlu1 %1273 }
 0x3d7   : > { %5575 = vrcp.f32 %v1274_v39 }
 0x3d8   : > { %v5564_v16 = vpop.eup %5563  ;;  %5577 = vrcp.f32 %v6599_v27 }
 0x3d9   : > { %v1290_v41 = vmul.f32 %v5564_v16, %v6522_v63  ;;  %5579 = vrcp.f32 %v1696_v12  ;;  %v5566_v51 = vpop.eup %5565 }
 0x3da   : > { %v1705_v59 = vpop.xlane.xlu0 %1704  ;;  %v1098_v15 = vpop.xlane.xlu1 %1097  ;;  %5581 = vrcp.f32 %v1101_v60  ;;  %v1115_v52 = vmul.f32 %v5566_v51, %v6516_v7  ;;  %v2219_v51 = vld [vmem:[%s7701_s8 + $0x38] sm:$0xff] }
 0x3db   : > { %5025 = vmatprep.mubr.msk.f32.mxu1 %vm1029_vm1, %v1290_v41  ;;  %5583 = vrcp.f32 %v1098_v15  ;;  %v2221_v15 = vld [vmem:[%s7701_s8 + $0x48] sm:$0xff] }
 0x3dc   : > { %v5568_v19 = vpop.eup %5567  ;;  %5026 = vmatmul.mubr.msk.f32.gmra.mxu1 %vm1029_vm1, %v1291_v20  ;;  %5585 = vrcp.f32 %v6590_v5  ;;  %v2220_v20 = vld [vmem:[%s7701_s8 + $0x40] sm:$0xff] }
 0x3dd   : > { %v1114_v28 = vmul.f32 %v5568_v19, %v6528_v42  ;;  %5587 = vrcp.f32 %v1699_v4  ;;  %v5570_v26 = vpop.eup %5569  ;;  %v2218_v19 = vld [vmem:[%s7701_s8 + $0x30] sm:$0xff] }
 0x3de   : > { %v2018_v27 = vpop.xlane.xlu0 %2017  ;;  %v1702_v63 = vpop.xlane.xlu1 %1701  ;;  %5589 = vrcp.f32 %v2009_v34  ;;  %v1721_v34 = vmul.f32 %v5570_v26, %v6445_v21  ;;  %v2213_v26 = vld [vmem:[%s7701_s8 + $0x8] sm:$0xff] }
 0x3df   : > { %5053 = vmatprep.mubr.msk.f32.mxu0 %vm1029_vm1, %v1114_v28  ;;  %5591 = vrcp.f32 %v1702_v63  ;;  %v5572_v47 = vpop.eup %5571  ;;  %v2217_v28 = vld [vmem:[%s7701_s8 + $0x28] sm:$0xff]  ;;  %v2215_v63 = vld [vmem:[%s7701_s8 + $0x18] sm:$0xff] }
 0x3e0   : > { %5054 = vmatmul.mubr.msk.f32.gmra.mxu0 %vm1029_vm1, %v1115_v52  ;;  %5593 = vrcp.f32 %v2012_v48  ;;  %v5574_v5 = vpop.eup %5573  ;;  %v1720_v48 = vmul.f32 %v5572_v47, %v6459_v3  ;;  %v2214_v52 = vld [vmem:[%s7701_s8 + $0x10] sm:$0xff]  ;;  %v6744_v47 = vld [vmem:[%s7703_s10 + $0x78] sm:$0xff] }
 0x3e1   : > { %5595 = vrcp.f32 %v1705_v59  ;;  %v1293_v49 = vmul.f32 %v5574_v5, %v6534_v17  ;;  %v2222_v59 = vld [vmem:[%s7701_s8 + $0x50] sm:$0xff] }
 0x3e2   : > { %v1711_v53 = vpop.xlane.xlu0 %1710  ;;  %v2015_v2 = vpop.xlane.xlu1 %2014  ;;  %v2242_v5 = vld [vmem:[%s7702_s9 + $0x70] sm:$0xff] }
 0x3e3   : > { %5597 = vrcp.f32 %v2015_v2  ;;  %v2243_v2 = vld [vmem:[%s7702_s9 + $0x78] sm:$0xff] }
 0x3e4   : > { %v5576_v42 = vpop.eup %5575  ;;  %5599 = vrcp.f32 %v2018_v27  ;;  %v2216_v27 = vld [vmem:[%s7701_s8 + $0x20] sm:$0xff]  ;;  %5159 = vmatprep.subr.mxu0 %v2243_v2 }
 0x3e5   : > { %v5578_v4 = vpop.eup %5577  ;;  %v1292_v7 = vmul.f32 %v5576_v42, %v6541_v9  ;;  %5601 = vrcp.f32 %v1711_v53  ;;  %v2212_v53 = vld [vmem:[%s7701_s8] sm:$0xff]  ;;  %v2241_v42 = vld [vmem:[%s7702_s9 + $0x68] sm:$0xff] }
 0x3e6   : > { %v1708_v29 = vpop.xlane.xlu1 %1707  ;;  %v5580_v12 = vpop.eup %5579  ;;  %v2033_v14 = vmul.f32 %v5578_v4, %v6466_v32  ;;  %v2240_v4 = vld [vmem:[%s7702_s9 + $0x60] sm:$0xff] }
 0x3e7   : > { %v2024_v38 = vpop.xlane.xlu0 %2023  ;;  %v5582_v0 = vpop.eup %5581  ;;  %5603 = vrcp.f32 %v1708_v29  ;;  %5028 = vmatprep.mubr.msk.f32.mxu1 %vm1029_vm1, %v1292_v7  ;;  %v1722_v3 = vmul.f32 %v5580_v12, %v6499_v36  ;;  %v2239_v29 = vld [vmem:[%s7702_s9 + $0x58] sm:$0xff]  ;;  %v2238_v7 = vld [vmem:[%s7702_s9 + $0x50] sm:$0xff]  ;;  %v2237_v12 = vld [vmem:[%s7702_s9 + $0x48] sm:$0xff] }
 0x3e8   : > { %v5584_v1 = vpop.eup %5583  ;;  %5029 = vmatmul.mubr.msk.f32.gmra.mxu1 %vm1029_vm1, %v1293_v49  ;;  %5605 = vrcp.f32 %v2024_v38  ;;  %v1117_v17 = vmul.f32 %v5582_v0, %v6538_v24  ;;  %v2236_v38 = vld [vmem:[%s7702_s9 + $0x40] sm:$0xff]  ;;  %v2235_v49 = vld [vmem:[%s7702_s9 + $0x38] sm:$0xff]  ;;  %v2234_v0 = vld [vmem:[%s7702_s9 + $0x30] sm:$0xff] }
 0x3e9   : > { %v5586_v23 = vpop.eup %5585  ;;  %5075 = vmatprep.mubr.msk.f32.mxu1 %vm1029_vm1, %v1720_v48  ;;  %v1116_v9 = vmul.f32 %v5584_v1, %v6550_v40  ;;  %v2233_v48 = vld [vmem:[%s7702_s9 + $0x28] sm:$0xff]  ;;  %v2232_v1 = vld [vmem:[%s7702_s9 + $0x20] sm:$0xff] }
 0x3ea   : > { %v2021_v6 = vpop.xlane.xlu1 %2020  ;;  %v5588_v44 = vpop.eup %5587  ;;  %v2034_v40 = vmul.f32 %v5586_v23, %v6453_v43  ;;  %v2231_v23 = vld [vmem:[%s7702_s9 + $0x18] sm:$0xff] }
 0x3eb   : > { %5607 = vrcp.f32 %v2021_v6  ;;  %v5590_v45 = vpop.eup %5589  ;;  %5056 = vmatprep.mubr.msk.f32.mxu0 %vm1029_vm1, %v1116_v9  ;;  %v1723_v24 = vmul.f32 %v5588_v44, %v6480_v31  ;;  %v2230_v6 = vld [vmem:[%s7702_s9 + $0x10] sm:$0xff] }
 0x3ec   : > { %v5592_v56 = vpop.eup %5591  ;;  %5057 = vmatmul.mubr.msk.f32.gmra.mxu0 %vm1029_vm1, %v1117_v17  ;;  %5076 = vmatmul.mubr.msk.f32.vlgmr.msra.gmra.mxu1 %vm1029_vm1, %v1721_v34  ;;  %v2035_v36 = vmul.f32 %v5590_v45, %v6504_v35 }
 0x3ed   : > { %5078 = vmatprep.mubr.msk.f32.mxu1 %vm1029_vm1, %v1722_v3  ;;  %5103 = vmatprep.mubr.msk.f32.mxu0 %vm1029_vm1, %v2033_v14  ;;  %v5594_v21 = vpop.eup %5593  ;;  %v1724_v46 = vmul.f32 %v5592_v56, %v6558_v61 }
 0x3ee   : > { %v5596_v57 = vpop.eup %5595  ;;  %v2036_v43 = vmul.f32 %v5594_v21, %v6489_v22 }
 0x3ef   : > { %v1725_v60 = vmul.f32 %v5596_v57, %v6547_v30 }
 0x3f0   : > { %v5598_v32 = vpop.eup %5597  ;;  %5079 = vmatmul.mubr.msk.f32.gmra.mxu1 %vm1029_vm1, %v1723_v24  ;;  %5104 = vmatmul.mubr.msk.f32.vlgmr.msra.gmra.mxu0 %vm1029_vm1, %v2034_v40 }
 0x3f1   : > { %5081 = vmatprep.mubr.msk.f32.mxu1 %vm1029_vm1, %v1724_v46  ;;  %5106 = vmatprep.mubr.msk.f32.mxu0 %vm1029_vm1, %v2035_v36  ;;  %v5600_v18 = vpop.eup %5599  ;;  %v2037_v39 = vmul.f32 %v5598_v32, %v6566_v62 }
 0x3f2   : > { %v5602_v31 = vpop.eup %5601  ;;  %v2038_v41 = vmul.f32 %v5600_v18, %v6552_v8  ;;  %v2226_v8 = vld [vmem:[%s7701_s8 + $0x70] sm:$0xff]  ;;  %5160 = vmatpush3.msra.mxu0 %v2243_v2 }
 0x3f3   : > { %v1727_v16 = vmul.f32 %v5602_v31, %v6564_v25  ;;  %v2227_v25 = vld [vmem:[%s7701_s8 + $0x78] sm:$0xff]  ;;  %5161 = vmatprep.subr.mxu0 %v2242_v5 }
 0x3f4   : > { %v5604_v61 = vpop.eup %5603  ;;  %5082 = vmatmul.mubr.msk.f32.gmra.mxu1 %vm1029_vm1, %v1725_v60  ;;  %5107 = vmatmul.mubr.msk.f32.gmra.mxu0 %vm1029_vm1, %v2036_v43 }
 0x3f5   : > { %5109 = vmatprep.mubr.msk.f32.mxu0 %vm1029_vm1, %v2037_v39  ;;  %v1726_v35 = vmul.f32 %v5604_v61, %v6574_v37  ;;  %v5606_v33 = vpop.eup %5605  ;;  %5115 = vmatprep.subr.mxu1 %v2227_v25  ;;  %v2225_v37 = vld [vmem:[%s7701_s8 + $0x68] sm:$0xff] }
 0x3f6   : > { %v2040_v62 = vmul.f32 %v5606_v33, %v6572_v11  ;;  %5116 = vmatpush3.msra.mxu1 %v2227_v25  ;;  %v2224_v11 = vld [vmem:[%s7701_s8 + $0x60] sm:$0xff]  ;;  %5162 = vmatpush3.msra.mxu0 %v2242_v5 }
 0x3f7   : > { %5084 = vmatprep.mubr.msk.f32.mxu1 %vm1029_vm1, %v1726_v35  ;;  %5117 = vmatprep.subr.mxu1 %v2226_v8 }
 0x3f8   : > { %v5608_v30 = vpop.eup %5607  ;;  %5085 = vmatmul.mubr.msk.f32.gmra.mxu1 %vm1029_vm1, %v1727_v16  ;;  %5110 = vmatmul.mubr.msk.f32.gmra.mxu0 %vm1029_vm1, %v2038_v41 }
 0x3f9   : > { %v2039_v22 = vmul.f32 %v5608_v30, %v6580_v58  ;;  %5118 = vmatpush3.msra.mxu1 %v2226_v8  ;;  %v2223_v58 = vld [vmem:[%s7701_s8 + $0x58] sm:$0xff]  ;;  %5163 = vmatprep.subr.mxu0 %v2241_v42  ;;  %v4496_v30 = vld [vmem:[%s7700_s7] ss:$0 sm:$0xff] }
 0x3fa   : > { %5119 = vmatprep.subr.mxu1 %v2225_v37  ;;  %5164 = vmatpush3.msra.mxu0 %v2241_v42 }
 0x3fb   : > { %5112 = vmatprep.mubr.msk.f32.mxu0 %vm1029_vm1, %v2039_v22  ;;  %5120 = vmatpush3.msra.mxu1 %v2225_v37 }
 0x3fc   : > { %5113 = vmatmul.mubr.msk.f32.gmra.mxu0 %vm1029_vm1, %v2040_v62  ;;  %5121 = vmatprep.subr.mxu1 %v2224_v11 }
 0x3fd   : > { %5122 = vmatpush3.msra.mxu1 %v2224_v11  ;;  %5165 = vmatprep.subr.mxu0 %v2240_v4 }
 0x3fe   : > { %5123 = vmatprep.subr.mxu1 %v2223_v58  ;;  %5166 = vmatpush3.msra.mxu0 %v2240_v4 }
 0x3ff   : > { %5124 = vmatpush3.msra.mxu1 %v2223_v58  ;;  %5167 = vmatprep.subr.mxu0 %v2239_v29 }
 0x400   : > { %5125 = vmatprep.subr.mxu1 %v2222_v59  ;;  %5168 = vmatpush3.msra.mxu0 %v2239_v29 }
 0x401   : > { %5126 = vmatpush3.msra.mxu1 %v2222_v59  ;;  %5169 = vmatprep.subr.mxu0 %v2238_v7 }
 0x402   : > { %5127 = vmatprep.subr.mxu1 %v2221_v15  ;;  %5170 = vmatpush3.msra.mxu0 %v2238_v7 }
 0x403   : > { %5128 = vmatpush3.msra.mxu1 %v2221_v15  ;;  %5171 = vmatprep.subr.mxu0 %v2237_v12 }
 0x404   : > { %5129 = vmatprep.subr.mxu1 %v2220_v20  ;;  %5172 = vmatpush3.msra.mxu0 %v2237_v12 }
 0x405   : > { %5130 = vmatpush3.msra.mxu1 %v2220_v20  ;;  %5173 = vmatprep.subr.mxu0 %v2236_v38 }
 0x406   : > { %5131 = vmatprep.subr.mxu1 %v2219_v51  ;;  %5174 = vmatpush3.msra.mxu0 %v2236_v38 }
 0x407   : > { %5132 = vmatpush3.msra.mxu1 %v2219_v51  ;;  %5175 = vmatprep.subr.mxu0 %v2235_v49 }
 0x408   : > { %5133 = vmatprep.subr.mxu1 %v2218_v19  ;;  %5176 = vmatpush3.msra.mxu0 %v2235_v49 }
 0x409   : > { %5134 = vmatpush3.msra.mxu1 %v2218_v19  ;;  %5177 = vmatprep.subr.mxu0 %v2234_v0 }
 0x40a   : > { %5135 = vmatprep.subr.mxu1 %v2217_v28  ;;  %5178 = vmatpush3.msra.mxu0 %v2234_v0  ;;  %v2258_v0 = vld [vmem:[%s7703_s10 + $0x70] sm:$0xff] }
 0x40b   : > { %5136 = vmatpush3.msra.mxu1 %v2217_v28  ;;  %5179 = vmatprep.subr.mxu0 %v2233_v48 }
 0x40c   : > { %5137 = vmatprep.subr.mxu1 %v2216_v27  ;;  %5180 = vmatpush3.msra.mxu0 %v2233_v48 }
 0x40d   : > { %5138 = vmatpush3.msra.mxu1 %v2216_v27  ;;  %5181 = vmatprep.subr.mxu0 %v2232_v1 }
 0x40e   : > { %5139 = vmatprep.subr.mxu1 %v2215_v63  ;;  %5182 = vmatpush3.msra.mxu0 %v2232_v1 }
 0x40f   : > { %5140 = vmatpush3.msra.mxu1 %v2215_v63  ;;  %5183 = vmatprep.subr.mxu0 %v2231_v23 }
 0x410   : > { %5141 = vmatprep.subr.mxu1 %v2214_v52  ;;  %5184 = vmatpush3.msra.mxu0 %v2231_v23 }
 0x411   : > { %5142 = vmatpush3.msra.mxu1 %v2214_v52  ;;  %5185 = vmatprep.subr.mxu0 %v2230_v6 }
 0x412   : > { %5143 = vmatprep.subr.mxu1 %v2213_v26  ;;  %5186 = vmatpush3.msra.mxu0 %v2230_v6 }
 0x413   : > { %5144 = vmatpush3.msra.mxu1 %v2213_v26 }
 0x414   : > { %5145 = vmatprep.subr.mxu1 %v2212_v53 }
 0x415   : > { %5146 = vmatpush3.msra.mxu1 %v2212_v53 }
 0x416   : > { %5203 = vmatprep.subr.mxu1 %v6744_v47 }
 0x46c   : > { %v5021_v9 = vpop.f32.mrf.mxu1 }
 0x46e   : > { %v1396_v44 = vpop.f32.mrf.mxu1 }
 0x470   : > { %v5049_v34 = vpop.f32.mrf.mxu0 }
 0x471   : > { %v1531_v60 = vadd.f32 %v5049_v34, %v5021_v9  ;;  %v2257_v34 = vld [vmem:[%s7703_s10 + $0x68] sm:$0xff] }
 0x472   : > { %v1525_v45 = vpop.f32.mrf.mxu0 }
 0x473   : > { %v1526_v39 = vadd.f32 %v1525_v45, %v1396_v44 }
 0x484   : > { %v5024_v17 = vpop.f32.mrf.mxu1 }
 0x486   : > { %v1406_v3 = vpop.f32.mrf.mxu1 }
 0x488   : > { %v5052_v14 = vpop.f32.mrf.mxu0 }
 0x489   : > { %v1541_v16 = vadd.f32 %v5052_v14, %v5024_v17 }
 0x48a   : > { %v1535_v21 = vpop.f32.mrf.mxu0 }
 0x48b   : > { %v1536_v8 = vadd.f32 %v1535_v21, %v1406_v3 }
 0x49c   : > { %v5027_v56 = vpop.f32.mrf.mxu1 }
 0x49e   : > { %v1416_v40 = vpop.f32.mrf.mxu1 }
 0x4a0   : > { %v5055_v24 = vpop.f32.mrf.mxu0 }
 0x4a1   : > { %v1551_v20 = vadd.f32 %v5055_v24, %v5027_v56 }
 0x4a2   : > { %v1545_v46 = vpop.f32.mrf.mxu0 }
 0x4a3   : > { %v1546_v52 = vadd.f32 %v1545_v46, %v1416_v40  ;;  %v2256_v40 = vld [vmem:[%s7703_s10 + $0x60] sm:$0xff]  ;;  %v2255_v46 = vld [vmem:[%s7703_s10 + $0x58] sm:$0xff] }
 0x4a8   : > { %v5030_v57 = vpop.f32.mrf.mxu1 }
 0x4aa   : > { %v1426_v36 = vpop.f32.mrf.mxu1 }
 0x4ac   : > { %v5058_v32 = vpop.f32.mrf.mxu0  ;;  %v5077_v18 = vpop.f32.mrf.mxu1 }
 0x4ad   : > { %v1870_v61 = vadd.f32 %v5077_v18, %v1531_v60  ;;  %v1561_v7 = vadd.f32 %v5058_v32, %v5030_v57  ;;  %v2254_v60 = vld [vmem:[%s7703_s10 + $0x50] sm:$0xff] }
 0x4ae   : > { %v1555_v43 = vpop.f32.mrf.mxu0  ;;  %v1830_v31 = vpop.f32.mrf.mxu1 }
 0x4af   : > { %v1869_v41 = vadd.f32 %v1830_v31, %v1526_v39  ;;  %v1556_v23 = vadd.f32 %v1555_v43, %v1426_v36  ;;  %v2253_v31 = vld [vmem:[%s7703_s10 + $0x48] sm:$0xff] }
 0x4b0   : > { %v5080_v35 = vpop.f32.mrf.mxu1  ;;  %v5105_v33 = vpop.f32.mrf.mxu0 }
 0x4b1   : > { %v2183_v22 = vadd.f32 %v5105_v33, %v1870_v61  ;;  %v1872_v37 = vadd.f32 %v5080_v35, %v1541_v16  ;;  %v2252_v61 = vld [vmem:[%s7703_s10 + $0x40] sm:$0xff]  ;;  %v2251_v35 = vld [vmem:[%s7703_s10 + $0x38] sm:$0xff]  ;;  %v2250_v33 = vld [vmem:[%s7703_s10 + $0x30] sm:$0xff] }
 0x4b2   : > { %v1840_v62 = vpop.f32.mrf.mxu1  ;;  %v2143_v25 = vpop.f32.mrf.mxu0  ;;  %v2249_v16 = vld [vmem:[%s7703_s10 + $0x28] sm:$0xff] }
 0x4b3   : > { %v2182_v11 = vadd.f32 %v2143_v25, %v1869_v41  ;;  %v2197_v58 = vadd.f32 %v4496_v30, %v2183_v22  ;;  %v1871_v51 = vadd.f32 %v1840_v62, %v1536_v8  ;;  %v2248_v41 = vld [vmem:[%s7703_s10 + $0x20] sm:$0xff]  ;;  %v2246_v22 = vld [vmem:[%s7703_s10 + $0x10] sm:$0xff]  ;;  %v2229_v62 = vld [vmem:[%s7702_s9 + $0x8] sm:$0xff] }
 0x4b4   : > { %v5083_v59 = vpop.f32.mrf.mxu1  ;;  %v5108_v15 = vpop.f32.mrf.mxu0  ;;  %v2245_v25 = vld [vmem:[%s7703_s10 + $0x8] sm:$0xff]  ;;  %5187 = vmatprep.subr.mxu0 %v2229_v62  ;;  %v2228_v8 = vld [vmem:[%s7702_s9] sm:$0xff] }
 0x4b5   : > { %v2196_v19 = vadd.f32 %v4496_v30, %v2182_v11  ;;  %v2185_v28 = vadd.f32 %v5108_v15, %v1872_v37  ;;  %v1874_v53 = vadd.f32 %v5083_v59, %v1551_v20  ;;  %v2205_v5 = vmax.f32 %v2197_v58, 0.0  ;;  %5188 = vmatpush3.msra.mxu0 %v2229_v62  ;;  %v2244_v37 = vld [vmem:[%s7703_s10] sm:$0xff] }
 0x4b6   : > { %v1850_v27 = vpop.f32.mrf.mxu1  ;;  %v2153_v63 = vpop.f32.mrf.mxu0  ;;  %5189 = vmatprep.subr.mxu0 %v2228_v8 }
 0x4b7   : > { %v2204_v26 = vmax.f32 %v2196_v19, 0.0  ;;  %v2184_v2 = vadd.f32 %v2153_v63, %v1871_v51  ;;  %v2199_v42 = vadd.f32 %v4496_v30, %v2185_v28  ;;  %v1873_v12 = vadd.f32 %v1850_v27, %v1546_v52  ;;  %5190 = vmatpush3.msra.mxu0 %v2228_v8 }
 0x4b8   : > { %v5086_v4 = vpop.f32.mrf.mxu1  ;;  %v5111_v29 = vpop.f32.mrf.mxu0 }
 0x4b9   : > { %v2198_v38 = vadd.f32 %v4496_v30, %v2184_v2  ;;  %v2187_v49 = vadd.f32 %v5111_v29, %v1874_v53  ;;  %5147 = vmatprep.mubr.f32.mxu1 %v2204_v26  ;;  %v1876_v9 = vadd.f32 %v5086_v4, %v1561_v7  ;;  %v2207_v17 = vmax.f32 %v2199_v42, 0.0 }
 0x4ba   : > { %v1860_v48 = vpop.f32.mrf.mxu1  ;;  %v2163_v1 = vpop.f32.mrf.mxu0  ;;  %5148 = vmatmul.mubr.f32.vlgmr.msra.gmra.mxu1 %v2205_v5 }
 0x4bb   : > { %v2206_v6 = vmax.f32 %v2198_v38, 0.0  ;;  %v2186_v44 = vadd.f32 %v2163_v1, %v1873_v12  ;;  %5204 = vmatpush3.msra.mxu1 %v6744_v47  ;;  %v2201_v45 = vadd.f32 %v4496_v30, %v2187_v49  ;;  %v1875_v14 = vadd.f32 %v1860_v48, %v1556_v23 }
 0x4bc   : > { %v5114_v3 = vpop.f32.mrf.mxu0  ;;  %5205 = vmatprep.subr.mxu1 %v2258_v0 }
 0x4bd   : > { %v2200_v56 = vadd.f32 %v4496_v30, %v2186_v44  ;;  %v2189_v21 = vadd.f32 %v5114_v3, %v1876_v9  ;;  %5150 = vmatprep.mubr.f32.mxu1 %v2206_v6  ;;  %5206 = vmatpush3.msra.mxu1 %v2258_v0  ;;  %v2209_v36 = vmax.f32 %v2201_v45, 0.0  ;;  %v7727_v9 = vmov 2  }
 0x4be   : > { %v2173_v24 = vpop.f32.mrf.mxu0  ;;  %5151 = vmatmul.mubr.f32.gmra.mxu1 %v2207_v17  ;;  %5207 = vmatprep.subr.mxu1 %v2257_v34  ;;  %v7729_v44 = vmov 0  }
 0x4bf   : > { %v2208_v47 = vmax.f32 %v2200_v56, 0.0  ;;  %v2188_v57 = vadd.f32 %v2173_v24, %v1875_v14  ;;  %5208 = vmatpush3.msra.mxu1 %v2257_v34  ;;  %v2203_v32 = vadd.f32 %v4496_v30, %v2189_v21 }
 0x4c0   : > { %5209 = vmatprep.subr.mxu1 %v2256_v40 }
 0x4c1   : > { %v2202_v18 = vadd.f32 %v4496_v30, %v2188_v57  ;;  %5153 = vmatprep.mubr.f32.mxu1 %v2208_v47  ;;  %5210 = vmatpush3.msra.mxu1 %v2256_v40  ;;  %v2211_v39 = vmax.f32 %v2203_v32, 0.0  ;;  %v2247_v30 = vld [vmem:[%s7703_s10 + $0x18] sm:$0xff] }
 0x4c2   : > { %5154 = vmatmul.mubr.f32.gmra.mxu1 %v2209_v36  ;;  %5211 = vmatprep.subr.mxu1 %v2255_v46 }
 0x4c3   : > { %v2210_v43 = vmax.f32 %v2202_v18, 0.0  ;;  %5212 = vmatpush3.msra.mxu1 %v2255_v46 }
 0x4c4   : > { %5213 = vmatprep.subr.mxu1 %v2254_v60 }
 0x4c5   : > { %5156 = vmatprep.mubr.f32.mxu1 %v2210_v43  ;;  %5214 = vmatpush3.msra.mxu1 %v2254_v60 }
 0x4c6   : > { %5157 = vmatmul.mubr.f32.gmra.mxu1 %v2211_v39  ;;  %5215 = vmatprep.subr.mxu1 %v2253_v31 }
 0x4c7   : > { %5216 = vmatpush3.msra.mxu1 %v2253_v31 }
 0x4c8   : > { %5217 = vmatprep.subr.mxu1 %v2252_v61 }
 0x4c9   : > { %5218 = vmatpush3.msra.mxu1 %v2252_v61 }
 0x4ca   : > { %5219 = vmatprep.subr.mxu1 %v2251_v35 }
 0x4cb   : > { %5220 = vmatpush3.msra.mxu1 %v2251_v35 }
 0x4cc   : > { %5221 = vmatprep.subr.mxu1 %v2250_v33 }
 0x4cd   : > { %5222 = vmatpush3.msra.mxu1 %v2250_v33 }
 0x4ce   : > { %5223 = vmatprep.subr.mxu1 %v2249_v16 }
 0x4cf   : > { %5224 = vmatpush3.msra.mxu1 %v2249_v16 }
 0x4d0   : > { %5225 = vmatprep.subr.mxu1 %v2248_v41 }
 0x4d1   : > { %5226 = vmatpush3.msra.mxu1 %v2248_v41 }
 0x4d2   : > { %5227 = vmatprep.subr.mxu1 %v2247_v30 }
 0x4d3   : > { %5228 = vmatpush3.msra.mxu1 %v2247_v30 }
 0x4d4   : > { %5229 = vmatprep.subr.mxu1 %v2246_v22 }
 0x4d5   : > { %5230 = vmatpush3.msra.mxu1 %v2246_v22 }
 0x4d6   : > { %5231 = vmatprep.subr.mxu1 %v2245_v25 }
 0x4d7   : > { %5232 = vmatpush3.msra.mxu1 %v2245_v25 }
 0x4d8   : > { %5233 = vmatprep.subr.mxu1 %v2244_v37 }
 0x4d9   : > { %5234 = vmatpush3.msra.mxu1 %v2244_v37 }
 0x57a   : > { %v6841_v11 = vpop.f32.mrf.mxu1 }
 0x57b   : > { %v2953_v38 = vmul.f32 %v6841_v11, %v6054_v54  ;;  %v3383_v49 = vmul.f32 %v6841_v11, %v6096_v10 }
 0x57c   : > { %v6843_v58 = vpop.f32.mrf.mxu1 }
 0x57d   : > { %5191 = vmatprep.mubr.f32.mxu0 %v6843_v58  ;;  %5235 = vmatprep.mubr.f32.mxu1 %v6843_v58  ;;  %v2952_v0 = vmul.f32 %v6843_v58, %v6054_v54  ;;  %v3382_v48 = vmul.f32 %v6843_v58, %v6096_v10 }
 0x57e   : > { %v6847_v59 = vpop.f32.mrf.mxu1  ;;  %5192 = vmatmul.mubr.f32.vlgmr.msra.gmra.mxu0 %v6841_v11  ;;  %5236 = vmatmul.mubr.f32.vlgmr.msra.gmra.mxu1 %v6841_v11 }
 0x57f   : > { %v2955_v4 = vmul.f32 %v6847_v59, %v6054_v54  ;;  %v3385_v29 = vmul.f32 %v6847_v59, %v6096_v10 }
 0x580   : > { %v6851_v15 = vpop.f32.mrf.mxu1 }
 0x581   : > { %5194 = vmatprep.mubr.f32.mxu0 %v6851_v15  ;;  %5238 = vmatprep.mubr.f32.mxu1 %v6851_v15  ;;  %v2954_v7 = vmul.f32 %v6851_v15, %v6054_v54  ;;  %v3384_v12 = vmul.f32 %v6851_v15, %v6096_v10 }
 0x582   : > { %v6855_v20 = vpop.f32.mrf.mxu1  ;;  %5195 = vmatmul.mubr.f32.gmra.mxu0 %v6847_v59  ;;  %5239 = vmatmul.mubr.f32.gmra.mxu1 %v6847_v59 }
 0x583   : > { %v2957_v53 = vmul.f32 %v6855_v20, %v6054_v54  ;;  %v3387_v2 = vmul.f32 %v6855_v20, %v6096_v10 }
 0x584   : > { %v6859_v51 = vpop.f32.mrf.mxu1 }
 0x585   : > { %5197 = vmatprep.mubr.f32.mxu0 %v6859_v51  ;;  %5241 = vmatprep.mubr.f32.mxu1 %v6859_v51  ;;  %v2956_v5 = vmul.f32 %v6859_v51, %v6054_v54  ;;  %v3386_v42 = vmul.f32 %v6859_v51, %v6096_v10 }
 0x586   : > { %v6863_v19 = vpop.f32.mrf.mxu1  ;;  %5198 = vmatmul.mubr.f32.gmra.mxu0 %v6855_v20  ;;  %5242 = vmatmul.mubr.f32.gmra.mxu1 %v6855_v20 }
 0x587   : > { %v2959_v28 = vmul.f32 %v6863_v19, %v6054_v54  ;;  %v3389_v27 = vmul.f32 %v6863_v19, %v6096_v10  ;;  %v6907_v1 = vmul.f32 %v6863_v19, %v6057_v55 }
 0x588   : > { %v6871_v63 = vpop.f32.mrf.mxu1 }
 0x589   : > { %5200 = vmatprep.mubr.f32.mxu0 %v6871_v63  ;;  %5244 = vmatprep.mubr.f32.mxu1 %v6871_v63  ;;  %v2958_v52 = vmul.f32 %v6871_v63, %v6054_v54  ;;  %v3388_v26 = vmul.f32 %v6871_v63, %v6096_v10  ;;  %v7726_v54 = vmov 1   ;;  %v7728_v10 = vmov 3  }
 0x58a   : > { %5247 = vmatprep.subr.mxu0 %v2959_v28  ;;  %5303 = vmatprep.subr.mxu1 %v3389_v27 }
 0x58b   : > { %5201 = vmatmul.mubr.f32.gmra.mxu0 %v6863_v19  ;;  %5245 = vmatmul.mubr.f32.gmra.mxu1 %v6863_v19 }
 0x58c   : > { %5248 = vmatpush3.msra.mxu0 %v2959_v28  ;;  %5304 = vmatpush3.msra.mxu1 %v3389_v27 }
 0x58d   : > { %5249 = vmatprep.subr.mxu0 %v2958_v52  ;;  %5305 = vmatprep.subr.mxu1 %v3388_v26 }
 0x58e   : > { %5250 = vmatpush3.msra.mxu0 %v2958_v52  ;;  %5306 = vmatpush3.msra.mxu1 %v3388_v26 }
 0x58f   : > { %5251 = vmatprep.subr.mxu0 %v2957_v53  ;;  %5307 = vmatprep.subr.mxu1 %v3387_v2 }
 0x590   : > { %5252 = vmatpush3.msra.mxu0 %v2957_v53  ;;  %5308 = vmatpush3.msra.mxu1 %v3387_v2 }
 0x591   : > { %5253 = vmatprep.subr.mxu0 %v2956_v5  ;;  %5309 = vmatprep.subr.mxu1 %v3386_v42 }
 0x592   : > { %5254 = vmatpush3.msra.mxu0 %v2956_v5  ;;  %5310 = vmatpush3.msra.mxu1 %v3386_v42 }
 0x593   : > { %5255 = vmatprep.subr.mxu0 %v2955_v4  ;;  %5311 = vmatprep.subr.mxu1 %v3385_v29 }
 0x594   : > { %5256 = vmatpush3.msra.mxu0 %v2955_v4  ;;  %5312 = vmatpush3.msra.mxu1 %v3385_v29  ;;  %v7730_v29 = vld [vmem:[#allocation2_spill] sm:$0xff] }
 0x595   : > { %5257 = vmatprep.subr.mxu0 %v2954_v7  ;;  %5313 = vmatprep.subr.mxu1 %v3384_v12 }
 0x596   : > { %5258 = vmatpush3.msra.mxu0 %v2954_v7  ;;  %5314 = vmatpush3.msra.mxu1 %v3384_v12  ;;  %v7731_v12 = vld [vmem:[#allocation3_spill] sm:$0xff] }
 0x597   : > { %5259 = vmatprep.subr.mxu0 %v2953_v38  ;;  %5315 = vmatprep.subr.mxu1 %v3383_v49 }
 0x598   : > { %5260 = vmatpush3.msra.mxu0 %v2953_v38  ;;  %5316 = vmatpush3.msra.mxu1 %v3383_v49 }
 0x599   : > { %5261 = vmatprep.subr.mxu0 %v2952_v0  ;;  %5317 = vmatprep.subr.mxu1 %v3382_v48 }
 0x59a   : > { %5262 = vmatpush3.msra.mxu0 %v2952_v0  ;;  %5318 = vmatpush3.msra.mxu1 %v3382_v48 }
 0x59b   : > { %5275 = vmatprep.subr.mxu0 %v6907_v1 }
 0x63e   : > { %v5237_v23 = vpop.f32.mrf.mxu1  ;;  %v5193_v21 = vpop.f32.mrf.mxu0 }
 0x63f   : > { %2615 = vperm.xlu1 %5453, %v5237_v23   ;;  %2793 = vperm.xlu0 %5452, %v5237_v23  }
 0x640   : > { %v2537_v6 = vpop.f32.mrf.mxu1  ;;  %v2432_v40 = vpop.f32.mrf.mxu0 }
 0x642   : > { %v5240_v34 = vpop.f32.mrf.mxu1  ;;  %v5196_v24 = vpop.f32.mrf.mxu0 }
 0x643   : > { %5456 = vset.pattern.permute.xlu1 %v7726_v54  ;;  %5454 = vset.pattern.permute.xlu0 %v7727_v9 }
 0x644   : > { %3223 = vperm.xlu0 %5454, %v5237_v23   ;;  %2789 = vperm.xlu1 %5456, %v2537_v6   ;;  %v2547_v17 = vpop.f32.mrf.mxu1  ;;  %v2442_v47 = vpop.f32.mrf.mxu0 }
 0x646   : > { %v5243_v45 = vpop.f32.mrf.mxu1  ;;  %v5199_v57 = vpop.f32.mrf.mxu0 }
 0x648   : > { %5455 = vset.pattern.permute.xlu0 %v7728_v10  ;;  %5457 = vset.pattern.permute.xlu1 %v7729_v44  ;;  %v2557_v3 = vpop.f32.mrf.mxu1  ;;  %v2452_v46 = vpop.f32.mrf.mxu0 }
 0x649   : > { %3532 = vperm.xlu0 %5455, %v5237_v23   ;;  %2610 = vperm.xlu1 %5457, %v2537_v6  }
 0x64b   : > { %v5246_v14 = vpop.f32.mrf.mxu1  ;;  %v5202_v36 = vpop.f32.mrf.mxu0 }
 0x64d   : > { %5458 = vset.pattern.permute.xlu0 %v7727_v9  ;;  %5460 = vset.pattern.permute.xlu1 %v7726_v54  ;;  %v2567_v56 = vpop.f32.mrf.mxu1  ;;  %v2462_v32 = vpop.f32.mrf.mxu0 }
 0x64e   : > { %3219 = vperm.xlu0 %5458, %v2537_v6   ;;  %2801 = vperm.xlu1 %5460, %v5240_v34  }
 0x652   : > { %5459 = vset.pattern.permute.xlu0 %v7728_v10  ;;  %5461 = vset.pattern.permute.xlu1 %v7729_v44 }
 0x653   : > { %3528 = vperm.xlu0 %5459, %v2537_v6   ;;  %2625 = vperm.xlu1 %5461, %v5240_v34  }
 0x657   : > { %5462 = vset.pattern.permute.xlu0 %v7727_v9  ;;  %5464 = vset.pattern.permute.xlu1 %v7726_v54 }
 0x658   : > { %3231 = vperm.xlu0 %5462, %v5240_v34   ;;  %2797 = vperm.xlu1 %5464, %v2547_v17  }
 0x65c   : > { %5463 = vset.pattern.permute.xlu0 %v7728_v10  ;;  %2809 = vperm.xlu1 %5464, %v5243_v45  }
 0x65d   : > { %3540 = vperm.xlu0 %5463, %v5240_v34  }
 0x660   : > { %2805 = vperm.xlu1 %5464, %v2557_v3  }
 0x661   : > { %5465 = vset.pattern.permute.xlu0 %v7729_v44 }
 0x662   : > { %2620 = vperm.xlu0 %5465, %v2547_v17  }
 0x664   : > { %5471 = vset.pattern.permute.xlu1 %v7729_v44 }
 0x665   : > { %2630 = vperm.xlu1 %5471, %v2557_v3  }
 0x666   : > { %5466 = vset.pattern.permute.xlu0 %v7727_v9 }
 0x667   : > { %3227 = vperm.xlu0 %5466, %v2547_v17  }
 0x669   : > { %5473 = vset.pattern.permute.xlu1 %v7728_v10 }
 0x66a   : > { %3544 = vperm.xlu1 %5473, %v2557_v3  }
 0x66b   : > { %5467 = vset.pattern.permute.xlu0 %v7728_v10 }
 0x66c   : > { %3536 = vperm.xlu0 %5467, %v2547_v17  }
 0x66e   : > { %5474 = vset.pattern.permute.xlu1 %v7726_v54 }
 0x66f   : > { %2817 = vperm.xlu1 %5474, %v5246_v14  }
 0x670   : > { %5468 = vset.pattern.permute.xlu0 %v7729_v44 }
 0x671   : > { %2635 = vperm.xlu0 %5468, %v5243_v45  }
 0x673   : > { %2813 = vperm.xlu1 %5474, %v2567_v56  }
 0x675   : > { %5469 = vset.pattern.permute.xlu0 %v7727_v9 }
 0x676   : > { %3239 = vperm.xlu0 %5469, %v5243_v45  }
 0x67a   : > { %5470 = vset.pattern.permute.xlu0 %v7728_v10 }
 0x67b   : > { %3548 = vperm.xlu0 %5470, %v5243_v45  }
 0x67f   : > { %5472 = vset.pattern.permute.xlu0 %v7727_v9 }
 0x680   : > { %3235 = vperm.xlu0 %5472, %v2557_v3  }
 0x684   : > { %5475 = vset.pattern.permute.xlu0 %v7729_v44 }
 0x685   : > { %2645 = vperm.xlu0 %5475, %v5246_v14  }
 0x689   : > { %5476 = vset.pattern.permute.xlu0 %v7727_v9 }
 0x68a   : > { %3247 = vperm.xlu0 %5476, %v5246_v14  }
 0x68e   : > { %5477 = vset.pattern.permute.xlu0 %v7728_v10 }
 0x68f   : > { %3556 = vperm.xlu0 %5477, %v5246_v14   ;;  %v6991_v14 = vld [vmem:[%s7694_s1 + $0x8] sm:$0xff] }
 0x693   : > { %5478 = vset.pattern.permute.xlu0 %v7729_v44 }
 0x694   : > { %2640 = vperm.xlu0 %5478, %v2567_v56  }
 0x698   : > { %5479 = vset.pattern.permute.xlu0 %v7727_v9 }
 0x699   : > { %3243 = vperm.xlu0 %5479, %v2567_v56  }
 0x69c   : > { %2576 = vxpose.xlu1.b32.start [1/8] (short) (narrow) %v2432_v40, 8 }
 0x69d   : > { %5480 = vset.pattern.permute.xlu0 %v7728_v10 }
 0x69e   : > { %3552 = vperm.xlu0 %5480, %v2567_v56  }
 0x6a0   : > { %2577 = vxpose.xlu1.b32.cont [2/8] (short) (narrow) %v5193_v21, 8 }
 0x6a4   : > { %2578 = vxpose.xlu1.b32.cont [3/8] (short) (narrow) %v2442_v47, 8 }
 0x6a8   : > { %2579 = vxpose.xlu1.b32.cont [4/8] (short) (narrow) %v5196_v24, 8 }
 0x6ac   : > { %2580 = vxpose.xlu1.b32.cont [5/8] (short) (narrow) %v2452_v46, 8 }
 0x6b0   : > { %2581 = vxpose.xlu1.b32.cont [6/8] (short) (narrow) %v5199_v57, 8 }
 0x6b4   : > { %2582 = vxpose.xlu1.b32.cont [7/8] (short) (narrow) %v2462_v32, 8 }
 0x6b8   : > { %2583 = vxpose.xlu1.b32.end [8/8] (short) (narrow) %v5202_v36, 8  ;;  %v7004_v36 = vld [vmem:[%s7694_s1] sm:$0xff] }
 0x6ba   : > { %v2616_v18 = vpop.permute.xlu1 %2615  ;;  %v2794_v60 = vpop.permute.xlu0 %2793 }
 0x6bf   : > { %v2790_v43 = vpop.permute.xlu1 %2789  ;;  %v3224_v31 = vpop.permute.xlu0 %3223 }
 0x6c4   : > { %v2611_v39 = vpop.permute.xlu1 %2610  ;;  %v6937_v61 = vpop.permute.xlu0 %3532 }
 0x6c9   : > { %v2802_v35 = vpop.permute.xlu1 %2801  ;;  %v3220_v33 = vpop.permute.xlu0 %3219 }
 0x6ce   : > { %v2626_v16 = vpop.permute.xlu1 %2625  ;;  %v6939_v41 = vpop.permute.xlu0 %3528 }
 0x6d3   : > { %v2798_v30 = vpop.permute.xlu1 %2797  ;;  %v6941_v22 = vpop.permute.xlu0 %3231 }
 0x6d7   : > { %v6943_v62 = vpop.permute.xlu1 %2809 }
 0x6d8   : > { %v6945_v25 = vpop.permute.xlu0 %3540 }
 0x6db   : > { %v6947_v8 = vpop.permute.xlu1 %2805 }
 0x6dd   : > { %v2621_v37 = vpop.permute.xlu0 %2620 }
 0x6e0   : > { %v6949_v28 = vpop.permute.xlu1 %2630 }
 0x6e2   : > { %v6951_v27 = vpop.permute.xlu0 %3227 }
 0x6e5   : > { %v6953_v52 = vpop.permute.xlu1 %3544 }
 0x6e7   : > { %v6955_v26 = vpop.permute.xlu0 %3536 }
 0x6ea   : > { %v6957_v53 = vpop.permute.xlu1 %2817 }
 0x6ec   : > { %v6959_v2 = vpop.permute.xlu0 %2635 }
 0x6ee   : > { %v6961_v5 = vpop.permute.xlu1 %2813 }
 0x6f1   : > { %v6977_v49 = vpop.permute.xlu0 %3239 }
 0x6f6   : > { %v6986_v3 = vpop.permute.xlu0 %3548 }
 0x718   : > { %v6963_v42 = vpop.trf.xlu1 }
 0x719   : > { %v6967_v4 = vrot.slane %v6963_v42, %v6042_v50  ;;  %v6971_v7 = vrot.slane %v6963_v42, %v7730_v29  ;;  %v6975_v38 = vrot.slane %v6963_v42, %v7731_v12 }
 0x71b   : > { %v2825_v0 = vadd.f32 %v6971_v7, %v2794_v60  ;;  %v2653_v48 = vadd.f32 %v6967_v4, %v2616_v18  ;;  %v3255_v23 = vadd.f32 %v6975_v38, %v3224_v31  ;;  %v2652_v6 = vadd.f32 %v6967_v4, %v2611_v39 }
 0x71c   : > { %v2824_v50 = vadd.f32 %v6971_v7, %v2790_v43  ;;  %v3254_v9 = vadd.f32 %v6975_v38, %v3220_v33  ;;  %v2827_v45 = vadd.f32 %v6971_v7, %v2802_v35  ;;  %v2826_v33 = vadd.f32 %v6971_v7, %v2798_v30 }
 0x71d   : > { %vm2833_vm6 = vcmp.gt.f32.partialorder %v2825_v0, 0.0  ;;  %v2841_v54 = vmul.f32 0.2, %v2825_v0  ;;  %vm2661_vm7 = vcmp.gt.f32.partialorder %v2653_v48, 0.0  ;;  %v2669_v10 = vmul.f32 0.2, %v2653_v48 }
 0x71e   : > { %vm3263_vm8 = vcmp.gt.f32.partialorder %v3255_v23, 0.0  ;;  %v3271_v44 = vmul.f32 0.2, %v3255_v23  ;;  %vm2660_vm9 = vcmp.gt.f32.partialorder %v2652_v6, 0.0  ;;  %v2668_v17 = vmul.f32 0.2, %v2652_v6 }
 0x71f   : > { %v2849_v34 = vsel %vm2833_vm6, %v2825_v0, %v2841_v54  ;;  %v2677_v21 = vsel %vm2661_vm7, %v2653_v48, %v2669_v10  ;;  %v2840_v24 = vmul.f32 0.2, %v2824_v50  ;;  %vm2832_vm10 = vcmp.gt.f32.partialorder %v2824_v50, 0.0 }
 0x720   : > { %v6994_v56 = vadd.f32 %v6991_v14, %v2849_v34  ;;  %v3279_v40 = vsel %vm3263_vm8, %v3255_v23, %v3271_v44  ;;  %v6997_v47 = vadd.f32 %v6991_v14, %v2677_v21  ;;  %v2676_v57 = vsel %vm2660_vm9, %v2652_v6, %v2668_v17  ;;  %v7022_v23 = vpop.permute.xlu0 %3235  ;;  %v7036_v34 = vld [vmem:[%s7694_s1 + $0x18] sm:$0xff]  ;;  %v7044_v17 = vld [vmem:[%s7694_s1 + $0x10] sm:$0xff] }
 0x721   : > { %vm3262_vm11 = vcmp.gt.f32.partialorder %v3254_v9, 0.0  ;;  %v7007_v32 = vadd.f32 %v7004_v36, %v2676_v57  ;;  %v3270_v18 = vmul.f32 0.2, %v3254_v9  ;;  %v7012_v43 = vadd.f32 %v6991_v14, %v3279_v40 }
 0x722   : > { %v2867_v46 = vsel %vm1029_vm1, %v6994_v56, -inf  ;;  %v2695_v60 = vsel %vm1029_vm1, %v6997_v47, -inf  ;;  %vm2835_vm12 = vcmp.gt.f32.partialorder %v2827_v45, 0.0  ;;  %v2848_v31 = vsel %vm2832_vm10, %v2824_v50, %v2840_v24 }
 0x723   : > { %2868 = vmax.xlane.f32.xlu0 %v2867_v46  ;;  %2696 = vmax.xlane.f32.xlu1 %v2695_v60  ;;  %v3278_v39 = vsel %vm3262_vm11, %v3254_v9, %v3270_v18  ;;  %v2843_v35 = vmul.f32 0.2, %v2827_v45  ;;  %v2692_v29 = vsel %vm1029_vm1, %v7007_v32, -inf  ;;  %v2655_v0 = vadd.f32 %v6967_v4, %v2626_v16 }
 0x724   : > { %v7018_v12 = vadd.f32 %v7004_v36, %v3278_v39  ;;  %v2654_v48 = vadd.f32 %v6967_v4, %v2621_v37  ;;  %vm2834_vm13 = vcmp.gt.f32.partialorder %v2826_v33, 0.0  ;;  %v2842_v54 = vmul.f32 0.2, %v2826_v33  ;;  %v2646_v60 = vpop.permute.xlu0 %2645 }
 0x725   : > { %v2851_v6 = vsel %vm2835_vm12, %v2827_v45, %v2843_v35  ;;  %v2829_v50 = vadd.f32 %v6971_v7, %v6943_v62  ;;  %v3297_v30 = vsel %vm1029_vm1, %v7012_v43, -inf  ;;  %v7029_v9 = vadd.f32 %v7004_v36, %v2848_v31  ;;  %v7732_v31 = vld [vmem:[#allocation4_spill] sm:$0xff] }
 0x726   : > { %v3294_v16 = vsel %vm1029_vm1, %v7018_v12, -inf  ;;  %v2850_v37 = vsel %vm2834_vm13, %v2826_v33, %v2842_v54  ;;  %v2671_v10 = vmul.f32 0.2, %v2655_v0  ;;  %vm2662_vm14 = vcmp.gt.f32.partialorder %v2654_v48, 0.0 }
 0x727   : > { %2693 = vmax.xlane.f32.xlu0 %v2692_v29  ;;  %3298 = vmax.xlane.f32.xlu1 %v3297_v30  ;;  %v2670_v44 = vmul.f32 0.2, %v2654_v48  ;;  %v7039_v62 = vadd.f32 %v7036_v34, %v2851_v6  ;;  %v7047_v45 = vadd.f32 %v7044_v17, %v2850_v37  ;;  %vm2663_vm15 = vcmp.gt.f32.partialorder %v2655_v0, 0.0  ;;  %v7088_v37 = vld [vmem:[%s7694_s1 + $0x20] sm:$0xff] }
 0x728   : > { %v2845_v21 = vmul.f32 0.2, %v2829_v50  ;;  %vm2837_vm2 = vcmp.gt.f32.partialorder %v2829_v50, 0.0  ;;  %v2828_v24 = vadd.f32 %v6971_v7, %v6947_v8  ;;  %v2657_v57 = vadd.f32 %v6967_v4, %v6959_v2 }
 0x729   : > { %v2678_v40 = vsel %vm2662_vm14, %v2654_v48, %v2670_v44  ;;  %v2864_v46 = vsel %vm1029_vm1, %v7029_v9, -inf  ;;  %v2656_v18 = vadd.f32 %v6967_v4, %v6949_v28  ;;  %v7059_v39 = vrot.slane %v6963_v42, %v7732_v31 }
 0x72a   : > { %v2679_v35 = vsel %vm2663_vm15, %v2655_v0, %v2671_v10  ;;  %vm2836_vm3 = vcmp.gt.f32.partialorder %v2828_v24, 0.0  ;;  %v2844_v33 = vmul.f32 0.2, %v2828_v24  ;;  %v2873_v8 = vsel %vm1029_vm1, %v7039_v62, -inf }
 0x72b   : > { %3295 = vmax.xlane.f32.xlu0 %v3294_v16  ;;  %2865 = vmax.xlane.f32.xlu1 %v2864_v46  ;;  %v2870_v2 = vsel %vm1029_vm1, %v7047_v45, -inf  ;;  %v7066_v29 = vadd.f32 %v7044_v17, %v2678_v40  ;;  %v2853_v48 = vsel %vm2837_vm2, %v2829_v50, %v2845_v21  ;;  %v2673_v6 = vmul.f32 0.2, %v2657_v57  ;;  %v7080_v50 = vld [vmem:[%s7694_s1 + $0x28] sm:$0xff] }
 0x72c   : > { %v2852_v28 = vsel %vm2836_vm3, %v2828_v24, %v2844_v33  ;;  %v2672_v54 = vmul.f32 0.2, %v2656_v18  ;;  %v2831_v42 = vadd.f32 %v6971_v7, %v6957_v53  ;;  %v7071_v0 = vadd.f32 %v7036_v34, %v2679_v35 }
 0x72d   : > { %vm2665_vm4 = vcmp.gt.f32.partialorder %v2657_v57, 0.0  ;;  %vm2664_vm5 = vcmp.gt.f32.partialorder %v2656_v18, 0.0  ;;  %v2830_v30 = vadd.f32 %v6971_v7, %v6961_v5  ;;  %v2698_v16 = vsel %vm1029_vm1, %v7066_v29, -inf  ;;  %v7093_v5 = vpop.permute.xlu0 %3247 }
 0x72e   : > { %v7083_v53 = vadd.f32 %v7080_v50, %v2853_v48  ;;  %v7091_v10 = vadd.f32 %v7088_v37, %v2852_v28  ;;  %v2681_v7 = vsel %vm2665_vm4, %v2657_v57, %v2673_v6  ;;  %v2680_v44 = vsel %vm2664_vm5, %v2656_v18, %v2672_v54 }
 0x72f   : > { %2871 = vmax.xlane.f32.xlu0 %v2870_v2  ;;  %2874 = vmax.xlane.f32.xlu1 %v2873_v8  ;;  %v2847_v21 = vmul.f32 0.2, %v2831_v42  ;;  %v2659_v40 = vadd.f32 %v6967_v4, %v2646_v60  ;;  %v2701_v24 = vsel %vm1029_vm1, %v7071_v0, -inf  ;;  %vm2839_vm6 = vcmp.gt.f32.partialorder %v2831_v42, 0.0 }
 0x730   : > { %v2846_v46 = vmul.f32 0.2, %v2830_v30  ;;  %v3563_v31 = vadd.f32 %v7059_v39, %v6939_v41  ;;  %vm2838_vm7 = vcmp.gt.f32.partialorder %v2830_v30, 0.0  ;;  %v2879_v35 = vsel %vm1029_vm1, %v7083_v53, -inf }
 0x731   : > { %v7103_v57 = vadd.f32 %v7080_v50, %v2681_v7  ;;  %v7106_v18 = vadd.f32 %v7088_v37, %v2680_v44  ;;  %v2876_v60 = vsel %vm1029_vm1, %v7091_v10, -inf  ;;  %v2855_v33 = vsel %vm2839_vm6, %v2831_v42, %v2847_v21  ;;  %v7114_v6 = vpop.permute.xlu0 %3556 }
 0x732   : > { %v2675_v8 = vmul.f32 0.2, %v2659_v40  ;;  %v3564_v2 = vadd.f32 %v7059_v39, %v6937_v61  ;;  %v2854_v41 = vsel %vm2838_vm7, %v2830_v30, %v2846_v46  ;;  %vm2667_vm8 = vcmp.gt.f32.partialorder %v2659_v40, 0.0  ;;  %v7123_v61 = vld [vmem:[%s7694_s1 + $0x38] sm:$0xff] }
 0x733   : > { %2699 = vmax.xlane.f32.xlu0 %v2698_v16  ;;  %2702 = vmax.xlane.f32.xlu1 %v2701_v24  ;;  %v3579_v48 = vmul.f32 0.2, %v3563_v31  ;;  %v3256_v28 = vadd.f32 %v6975_v38, %v6951_v27  ;;  %vm3571_vm9 = vcmp.gt.f32.partialorder %v3563_v31, 0.0  ;;  %v2707_v54 = vsel %vm1029_vm1, %v7103_v57, -inf  ;;  %v7131_v27 = vld [vmem:[%s7694_s1 + $0x30] sm:$0xff] }
 0x734   : > { %v2704_v42 = vsel %vm1029_vm1, %v7106_v18, -inf  ;;  %v7126_v30 = vadd.f32 %v7123_v61, %v2855_v33  ;;  %v7134_v16 = vadd.f32 %v7131_v27, %v2854_v41  ;;  %v2683_v7 = vsel %vm2667_vm8, %v2659_v40, %v2675_v8 }
 0x735   : > { %vm3572_vm10 = vcmp.gt.f32.partialorder %v3564_v2, 0.0  ;;  %v3580_v44 = vmul.f32 0.2, %v3564_v2  ;;  %v3587_v21 = vsel %vm3571_vm9, %v3563_v31, %v3579_v48  ;;  %v3272_v24 = vmul.f32 0.2, %v3256_v28  ;;  %v2641_v33 = vpop.permute.xlu0 %2640 }
 0x736   : > { %v3257_v46 = vadd.f32 %v6975_v38, %v6941_v22  ;;  %vm3264_vm11 = vcmp.gt.f32.partialorder %v3256_v28, 0.0  ;;  %v2882_v40 = vsel %vm1029_vm1, %v7134_v16, -inf  ;;  %v7145_v8 = vadd.f32 %v7123_v61, %v2683_v7 }
 0x737   : > { %2877 = vmax.xlane.f32.xlu0 %v2876_v60  ;;  %2880 = vmax.xlane.f32.xlu1 %v2879_v35  ;;  %v3565_v35 = vadd.f32 %v7059_v39, %v6955_v26  ;;  %v2885_v60 = vsel %vm1029_vm1, %v7126_v30, -inf  ;;  %v7148_v31 = vadd.f32 %v7004_v36, %v3587_v21  ;;  %v3588_v41 = vsel %vm3572_vm10, %v3564_v2, %v3580_v44 }
 0x738   : > { %v3280_v22 = vsel %vm3264_vm11, %v3256_v28, %v3272_v24  ;;  %v3273_v48 = vmul.f32 0.2, %v3257_v46  ;;  %vm3265_vm12 = vcmp.gt.f32.partialorder %v3257_v46, 0.0  ;;  %v2713_v7 = vsel %vm1029_vm1, %v7145_v8, -inf }
 0x739   : > { %v3581_v26 = vmul.f32 0.2, %v3565_v35  ;;  %vm3573_vm13 = vcmp.gt.f32.partialorder %v3565_v35, 0.0  ;;  %v3603_v36 = vsel %vm1029_vm1, %v7148_v31, -inf  ;;  %v7158_v2 = vadd.f32 %v6991_v14, %v3588_v41 }
 0x73a   : > { %v7161_v28 = vadd.f32 %v7044_v17, %v3280_v22  ;;  %v3258_v24 = vadd.f32 %v6975_v38, %v7022_v23 }
 0x73b   : > { %2705 = vmax.xlane.f32.xlu0 %v2704_v42  ;;  %2708 = vmax.xlane.f32.xlu1 %v2707_v54  ;;  %v2658_v54 = vadd.f32 %v6967_v4, %v2641_v33  ;;  %v3566_v42 = vadd.f32 %v7059_v39, %v6945_v25  ;;  %v3281_v4 = vsel %vm3265_vm12, %v3257_v46, %v3273_v48  ;;  %v3244_v33 = vpop.permute.xlu0 %3243  ;;  %v3606_v23 = vsel %vm1029_vm1, %v7158_v2, -inf }
 0x73c   : > { %v3589_v44 = vsel %vm3573_vm13, %v3565_v35, %v3581_v26  ;;  %v3300_v14 = vsel %vm1029_vm1, %v7161_v28, -inf  ;;  %v3274_v41 = vmul.f32 0.2, %v3258_v24  ;;  %vm3266_vm2 = vcmp.gt.f32.partialorder %v3258_v24, 0.0 }
 0x73d   : > { %v2674_v21 = vmul.f32 0.2, %v2658_v54  ;;  %v3582_v25 = vmul.f32 0.2, %v3566_v42  ;;  %vm2666_vm14 = vcmp.gt.f32.partialorder %v2658_v54, 0.0  ;;  %vm3574_vm15 = vcmp.gt.f32.partialorder %v3566_v42, 0.0 }
 0x73e   : > { %v7173_v46 = vadd.f32 %v7044_v17, %v3589_v44  ;;  %v3568_v26 = vadd.f32 %v7059_v39, %v6986_v3  ;;  %v3260_v44 = vadd.f32 %v6975_v38, %v3244_v33 }
 0x73f   : > { %2883 = vmax.xlane.f32.xlu0 %v2882_v40  ;;  %2886 = vmax.xlane.f32.xlu1 %v2885_v60  ;;  %v3259_v60 = vadd.f32 %v6975_v38, %v6977_v49  ;;  %v7170_v40 = vadd.f32 %v7036_v34, %v3281_v4  ;;  %v2682_v35 = vsel %vm2666_vm14, %v2658_v54, %v2674_v21 }
 0x740   : > { %v3567_v49 = vadd.f32 %v7059_v39, %v6953_v52  ;;  %v3590_v22 = vsel %vm3574_vm15, %v3566_v42, %v3582_v25  ;;  %v7186_v54 = vadd.f32 %v7131_v27, %v2682_v35  ;;  %v3282_v42 = vsel %vm3266_vm2, %v3258_v24, %v3274_v41 }
 0x741   : > { %v3275_v48 = vmul.f32 0.2, %v3259_v60  ;;  %vm3267_vm3 = vcmp.gt.f32.partialorder %v3259_v60, 0.0  ;;  %v3303_v17 = vsel %vm1029_vm1, %v7170_v40, -inf  ;;  %v7189_v52 = vadd.f32 %v7036_v34, %v3590_v22 }
 0x742   : > { %v3583_v4 = vmul.f32 0.2, %v3567_v49  ;;  %v3584_v21 = vmul.f32 0.2, %v3568_v26  ;;  %vm3575_vm4 = vcmp.gt.f32.partialorder %v3567_v49, 0.0  ;;  %v3261_v25 = vadd.f32 %v6975_v38, %v7093_v5 }
 0x743   : > { %3604 = vmax.xlane.f32.xlu0 %v3603_v36  ;;  %2714 = vmax.xlane.f32.xlu1 %v2713_v7  ;;  %v3609_v7 = vsel %vm1029_vm1, %v7173_v46, -inf  ;;  %v3553_v36 = vpop.permute.xlu0 %3552  ;;  %v3283_v3 = vsel %vm3267_vm3, %v3259_v60, %v3275_v48  ;;  %vm3576_vm5 = vcmp.gt.f32.partialorder %v3568_v26, 0.0  ;;  %v7198_v34 = vadd.f32 %v7088_v37, %v3282_v42 }
 0x744   : > { %v3612_v24 = vsel %vm1029_vm1, %v7189_v52, -inf  ;;  %v7203_v60 = vadd.f32 %v7080_v50, %v3283_v3  ;;  %v3591_v33 = vsel %vm3575_vm4, %v3567_v49, %v3583_v4  ;;  %v3276_v35 = vmul.f32 0.2, %v3260_v44 }
 0x745   : > { %v3592_v38 = vsel %vm3576_vm5, %v3568_v26, %v3584_v21  ;;  %v3277_v5 = vmul.f32 0.2, %v3261_v25  ;;  %vm3268_vm6 = vcmp.gt.f32.partialorder %v3260_v44, 0.0  ;;  %v3570_v41 = vadd.f32 %v7059_v39, %v7114_v6 }
 0x746   : > { %vm3269_vm7 = vcmp.gt.f32.partialorder %v3261_v25, 0.0  ;;  %v3306_v22 = vsel %vm1029_vm1, %v7198_v34, -inf  ;;  %v7210_v48 = vadd.f32 %v7088_v37, %v3591_v33  ;;  %v7215_v49 = vadd.f32 %v7080_v50, %v3592_v38 }
 0x747   : > { %3301 = vmax.xlane.f32.xlu0 %v3300_v14  ;;  %3607 = vmax.xlane.f32.xlu1 %v3606_v23  ;;  %v3569_v14 = vadd.f32 %v7059_v39, %v3553_v36  ;;  %v2710_v23 = vsel %vm1029_vm1, %v7186_v54, -inf  ;;  %v3284_v26 = vsel %vm3268_vm6, %v3260_v44, %v3276_v35  ;;  %v3285_v36 = vsel %vm3269_vm7, %v3261_v25, %v3277_v5 }
 0x748   : > { %v3586_v39 = vmul.f32 0.2, %v3570_v41  ;;  %vm3578_vm9 = vcmp.gt.f32.partialorder %v3570_v41, 0.0  ;;  %v3615_v6 = vsel %vm1029_vm1, %v7210_v48, -inf  ;;  %v7220_v37 = vadd.f32 %v7131_v27, %v3284_v26 }
 0x749   : > { %vm3577_vm8 = vcmp.gt.f32.partialorder %v3569_v14, 0.0  ;;  %v3618_v42 = vsel %vm1029_vm1, %v7215_v49, -inf  ;;  %v7225_v4 = vadd.f32 %v7123_v61, %v3285_v36 }
 0x74a   : > { %v3594_v44 = vsel %vm3578_vm9, %v3570_v41, %v3586_v39  ;;  %v3312_v3 = vsel %vm1029_vm1, %v7220_v37, -inf }
 0x74b   : > { %3610 = vmax.xlane.f32.xlu0 %v3609_v7  ;;  %3304 = vmax.xlane.f32.xlu1 %v3303_v17  ;;  %v3585_v17 = vmul.f32 0.2, %v3569_v14  ;;  %v3309_v7 = vsel %vm1029_vm1, %v7203_v60, -inf  ;;  %v3315_v25 = vsel %vm1029_vm1, %v7225_v4, -inf }
 0x74d   : > { %v3593_v50 = vsel %vm3577_vm8, %v3569_v14, %v3585_v17 }
 0x74e   : > { %v7230_v21 = vadd.f32 %v7131_v27, %v3593_v50 }
 0x74f   : > { %2711 = vmax.xlane.f32.xlu0 %v2710_v23  ;;  %3613 = vmax.xlane.f32.xlu1 %v3612_v24  ;;  %v7235_v23 = vadd.f32 %v7123_v61, %v3594_v44 }
 0x750   : > { %v3621_v24 = vsel %vm1029_vm1, %v7230_v21, -inf }
 0x751   : > { %v3624_v14 = vsel %vm1029_vm1, %v7235_v23, -inf }
 0x753   : > { %3307 = vmax.xlane.f32.xlu0 %v3306_v22  ;;  %3310 = vmax.xlane.f32.xlu1 %v3309_v7 }
 0x757   : > { %3616 = vmax.xlane.f32.xlu0 %v3615_v6  ;;  %3619 = vmax.xlane.f32.xlu1 %v3618_v42 }
 0x75b   : > { %3313 = vmax.xlane.f32.xlu0 %v3312_v3  ;;  %3316 = vmax.xlane.f32.xlu1 %v3315_v25 }
 0x75f   : > { %3622 = vmax.xlane.f32.xlu0 %v3621_v24  ;;  %3625 = vmax.xlane.f32.xlu1 %v3624_v14 }
 0x7ac   : > { %v2869_v33 = vpop.xlane.xlu0 %2868  ;;  %v2697_v35 = vpop.xlane.xlu1 %2696 }
 0x7ad   : > { %v2889_v27 = vsub.f32 %v6994_v56, %v2869_v33  ;;  %v2717_v38 = vsub.f32 %v6997_v47, %v2697_v35 }
 0x7af   : > { %v2898_v5 = vmul.f32 1.442695, %v2889_v27  ;;  %v2726_v41 = vmul.f32 1.442695, %v2717_v38 }
 0x7b0   : > { %v2694_v22 = vpop.xlane.xlu0 %2693  ;;  %v3299_v61 = vpop.xlane.xlu1 %3298 }
 0x7b1   : > { %5609 = vpow2.f32 %v2898_v5  ;;  %v3319_v17 = vsub.f32 %v7012_v43, %v3299_v61  ;;  %v2716_v26 = vsub.f32 %v7007_v32, %v2694_v22 }
 0x7b2   : > { %5611 = vpow2.f32 %v2726_v41 }
 0x7b3   : > { %v3328_v7 = vmul.f32 1.442695, %v3319_v17  ;;  %v2724_v56 = vmul.f32 1.442695, %v2716_v26 }
 0x7b4   : > { %v3296_v36 = vpop.xlane.xlu0 %3295  ;;  %v2866_v39 = vpop.xlane.xlu1 %2865 }
 0x7b5   : > { %v2888_v6 = vsub.f32 %v7029_v9, %v2866_v39  ;;  %5613 = vpow2.f32 %v3328_v7  ;;  %v3318_v47 = vsub.f32 %v7018_v12, %v3296_v36 }
 0x7b7   : > { %v2896_v42 = vmul.f32 1.442695, %v2888_v6  ;;  %v3326_v43 = vmul.f32 1.442695, %v3318_v47 }
 0x7b8   : > { %v2872_v50 = vpop.xlane.xlu0 %2871  ;;  %v2875_v44 = vpop.xlane.xlu1 %2874 }
 0x7b9   : > { %5615 = vpow2.f32 %v2896_v42  ;;  %v2891_v3 = vsub.f32 %v7039_v62, %v2875_v44  ;;  %v2890_v24 = vsub.f32 %v7047_v45, %v2872_v50 }
 0x7ba   : > { %5617 = vpow2.f32 %v2724_v56 }
 0x7bb   : > { %v2902_v25 = vmul.f32 1.442695, %v2891_v3  ;;  %v2900_v35 = vmul.f32 1.442695, %v2890_v24 }
 0x7bc   : > { %v2700_v32 = vpop.xlane.xlu0 %2699  ;;  %v2703_v14 = vpop.xlane.xlu1 %2702 }
 0x7bd   : > { %5619 = vpow2.f32 %v2902_v25  ;;  %v2719_v9 = vsub.f32 %v7071_v0, %v2703_v14  ;;  %v2718_v38 = vsub.f32 %v7066_v29, %v2700_v32 }
 0x7be   : > { %v7249_v33 = vpop.eup %5609  ;;  %5621 = vpow2.f32 %v3326_v43 }
 0x7bf   : > { %v2915_v12 = vsel %vm1029_vm1, %v7249_v33, 0.0  ;;  %v7254_v27 = vpop.eup %5611  ;;  %v2730_v62 = vmul.f32 1.442695, %v2719_v9  ;;  %v2728_v61 = vmul.f32 1.442695, %v2718_v38 }
 0x7c0   : > { %2916 = vadd.xlane.f32.xlu1 %v2915_v12  ;;  %v2878_v5 = vpop.xlane.xlu0 %2877  ;;  %v2881_v45 = vpop.xlane.xlu1 %2880  ;;  %v2743_v22 = vsel %vm1029_vm1, %v7254_v27, 0.0 }
 0x7c1   : > { %5623 = vpow2.f32 %v2730_v62  ;;  %v2893_v41 = vsub.f32 %v7083_v53, %v2881_v45  ;;  %v2892_v7 = vsub.f32 %v7091_v10, %v2878_v5 }
 0x7c2   : > { %v7260_v0 = vpop.eup %5613  ;;  %5625 = vpow2.f32 %v2900_v35 }
 0x7c3   : > { %v2906_v17 = vmul.f32 1.442695, %v2893_v41  ;;  %v3345_v6 = vsel %vm1029_vm1, %v7260_v0, 0.0  ;;  %v2904_v56 = vmul.f32 1.442695, %v2892_v7 }
 0x7c4   : > { %2744 = vadd.xlane.f32.xlu1 %v2743_v22  ;;  %v2706_v26 = vpop.xlane.xlu0 %2705  ;;  %v2709_v36 = vpop.xlane.xlu1 %2708 }
 0x7c5   : > { %5627 = vpow2.f32 %v2906_v17  ;;  %v2721_v29 = vsub.f32 %v7103_v57, %v2709_v36  ;;  %v2720_v53 = vsub.f32 %v7106_v18, %v2706_v26 }
 0x7c6   : > { %v7264_v39 = vpop.eup %5615  ;;  %5629 = vpow2.f32 %v2728_v61 }
 0x7c7   : > { %v2734_v42 = vmul.f32 1.442695, %v2721_v29  ;;  %v2912_v10 = vsel %vm1029_vm1, %v7264_v39, 0.0  ;;  %v7271_v50 = vpop.eup %5617  ;;  %v2732_v18 = vmul.f32 1.442695, %v2720_v53 }
 0x7c8   : > { %3346 = vadd.xlane.f32.xlu1 %v3345_v6  ;;  %v2884_v47 = vpop.xlane.xlu0 %2883  ;;  %v2887_v44 = vpop.xlane.xlu1 %2886  ;;  %2913 = vadd.xlane.f32.xlu0 %v2912_v10  ;;  %v2740_v32 = vsel %vm1029_vm1, %v7271_v50, 0.0 }
 0x7c9   : > { %5631 = vpow2.f32 %v2734_v42  ;;  %v2895_v57 = vsub.f32 %v7126_v30, %v2887_v44  ;;  %v2894_v43 = vsub.f32 %v7134_v16, %v2884_v47 }
 0x7ca   : > { %v7274_v3 = vpop.eup %5619  ;;  %5633 = vpow2.f32 %v2904_v56 }
 0x7cb   : > { %v2910_v25 = vmul.f32 1.442695, %v2895_v57  ;;  %v2921_v24 = vsel %vm1029_vm1, %v7274_v3, 0.0  ;;  %v7281_v9 = vpop.eup %5621  ;;  %v2908_v16 = vmul.f32 1.442695, %v2894_v43 }
 0x7cc   : > { %v3605_v14 = vpop.xlane.xlu0 %3604  ;;  %2922 = vadd.xlane.f32.xlu1 %v2921_v24  ;;  %v2715_v12 = vpop.xlane.xlu1 %2714  ;;  %2741 = vadd.xlane.f32.xlu0 %v2740_v32  ;;  %v3342_v45 = vsel %vm1029_vm1, %v7281_v9, 0.0 }
 0x7cd   : > { %5635 = vpow2.f32 %v2910_v25  ;;  %v2723_v30 = vsub.f32 %v7145_v8, %v2715_v12  ;;  %v3627_v62 = vsub.f32 %v7148_v31, %v3605_v14 }
 0x7ce   : > { %v7284_v35 = vpop.eup %5623  ;;  %5637 = vpow2.f32 %v2732_v18 }
 0x7cf   : > { %v2738_v38 = vmul.f32 1.442695, %v2723_v30  ;;  %v2749_v5 = vsel %vm1029_vm1, %v7284_v35, 0.0  ;;  %v7291_v22 = vpop.eup %5625  ;;  %v3635_v31 = vmul.f32 1.442695, %v3627_v62 }
 0x7d0   : > { %v3302_v41 = vpop.xlane.xlu0 %3301  ;;  %2750 = vadd.xlane.f32.xlu1 %v2749_v5  ;;  %v3608_v61 = vpop.xlane.xlu1 %3607  ;;  %3343 = vadd.xlane.f32.xlu0 %v3342_v45  ;;  %v2918_v29 = vsel %vm1029_vm1, %v7291_v22, 0.0 }
 0x7d1   : > { %5639 = vpow2.f32 %v2738_v38  ;;  %v3628_v8 = vsub.f32 %v7158_v2, %v3608_v61  ;;  %v3320_v7 = vsub.f32 %v7161_v28, %v3302_v41 }
 0x7d2   : > { %v7294_v17 = vpop.eup %5627  ;;  %5641 = vpow2.f32 %v2908_v16 }
 0x7d3   : > { %v3637_v26 = vmul.f32 1.442695, %v3628_v8  ;;  %v2927_v36 = vsel %vm1029_vm1, %v7294_v17, 0.0  ;;  %v7301_v6 = vpop.eup %5629  ;;  %v3330_v28 = vmul.f32 1.442695, %v3320_v7 }
 0x7d4   : > { %v3611_v53 = vpop.xlane.xlu0 %3610  ;;  %2928 = vadd.xlane.f32.xlu1 %v2927_v36  ;;  %v3305_v56 = vpop.xlane.xlu1 %3304  ;;  %2919 = vadd.xlane.f32.xlu0 %v2918_v29  ;;  %v2746_v57 = vsel %vm1029_vm1, %v7301_v6, 0.0 }
 0x7d5   : > { %5643 = vpow2.f32 %v3637_v26  ;;  %v3321_v2 = vsub.f32 %v7170_v40, %v3305_v56  ;;  %v3629_v10 = vsub.f32 %v7173_v46, %v3611_v53 }
 0x7d6   : > { %v7304_v42 = vpop.eup %5631  ;;  %5645 = vpow2.f32 %v3635_v31 }
 0x7d7   : > { %v3332_v47 = vmul.f32 1.442695, %v3321_v2  ;;  %v2755_v44 = vsel %vm1029_vm1, %v7304_v42, 0.0  ;;  %v7311_v43 = vpop.eup %5633  ;;  %v3639_v46 = vmul.f32 1.442695, %v3629_v10 }
 0x7d8   : > { %v2712_v18 = vpop.xlane.xlu0 %2711  ;;  %2756 = vadd.xlane.f32.xlu1 %v2755_v44  ;;  %v3614_v25 = vpop.xlane.xlu1 %3613  ;;  %2747 = vadd.xlane.f32.xlu0 %v2746_v57  ;;  %v2924_v16 = vsel %vm1029_vm1, %v7311_v43, 0.0 }
 0x7d9   : > { %5647 = vpow2.f32 %v3332_v47  ;;  %v3630_v40 = vsub.f32 %v7189_v52, %v3614_v25  ;;  %v2722_v12 = vsub.f32 %v7186_v54, %v2712_v18 }
 0x7da   : > { %v7314_v24 = vpop.eup %5635  ;;  %5649 = vpow2.f32 %v3330_v28 }
 0x7db   : > { %v7316_v32 = vpop.eup %5637  ;;  %v3641_v14 = vmul.f32 1.442695, %v3630_v40  ;;  %v2933_v30 = vsel %vm1029_vm1, %v7314_v24, 0.0  ;;  %v2736_v41 = vmul.f32 1.442695, %v2722_v12 }
 0x7dc   : > { %v3308_v62 = vpop.xlane.xlu0 %3307  ;;  %2934 = vadd.xlane.f32.xlu1 %v2933_v30  ;;  %v3311_v38 = vpop.xlane.xlu1 %3310  ;;  %2925 = vadd.xlane.f32.xlu0 %v2924_v16  ;;  %v2752_v45 = vsel %vm1029_vm1, %v7316_v32, 0.0 }
 0x7dd   : > { %5651 = vpow2.f32 %v3641_v14  ;;  %v3323_v52 = vsub.f32 %v7203_v60, %v3311_v38  ;;  %v3322_v8 = vsub.f32 %v7198_v34, %v3308_v62 }
 0x7de   : > { %v7324_v5 = vpop.eup %5639  ;;  %5653 = vpow2.f32 %v3639_v46 }
 0x7df   : > { %v7328_v54 = vpop.eup %5641  ;;  %v3336_v61 = vmul.f32 1.442695, %v3323_v52  ;;  %v2761_v31 = vsel %vm1029_vm1, %v7324_v5, 0.0  ;;  %v3334_v34 = vmul.f32 1.442695, %v3322_v8 }
 0x7e0   : > { %v3617_v7 = vpop.xlane.xlu0 %3616  ;;  %2762 = vadd.xlane.f32.xlu1 %v2761_v31  ;;  %v3620_v26 = vpop.xlane.xlu1 %3619  ;;  %2753 = vadd.xlane.f32.xlu0 %v2752_v45  ;;  %v2930_v53 = vsel %vm1029_vm1, %v7328_v54, 0.0 }
 0x7e1   : > { %5655 = vpow2.f32 %v3336_v61  ;;  %v3632_v60 = vsub.f32 %v7215_v49, %v3620_v26  ;;  %v3631_v29 = vsub.f32 %v7210_v48, %v3617_v7 }
 0x7e2   : > { %v7334_v36 = vpop.eup %5643  ;;  %5657 = vpow2.f32 %v2736_v41 }
 0x7e3   : > { %v7339_v56 = vpop.eup %5645  ;;  %v3645_v2 = vmul.f32 1.442695, %v3632_v60  ;;  %v3654_v28 = vsel %vm1029_vm1, %v7334_v36, 0.0  ;;  %v3643_v48 = vmul.f32 1.442695, %v3631_v29 }
 0x7e4   : > { %v3314_v10 = vpop.xlane.xlu0 %3313  ;;  %3655 = vadd.xlane.f32.xlu1 %v3654_v28  ;;  %v3317_v47 = vpop.xlane.xlu1 %3316  ;;  %2931 = vadd.xlane.f32.xlu0 %v2930_v53  ;;  %v3651_v57 = vsel %vm1029_vm1, %v7339_v56, 0.0 }
 0x7e5   : > { %5659 = vpow2.f32 %v3645_v2  ;;  %v3325_v49 = vsub.f32 %v7225_v4, %v3317_v47  ;;  %v3324_v40 = vsub.f32 %v7220_v37, %v3314_v10 }
 0x7e6   : > { %v7344_v44 = vpop.eup %5647  ;;  %5661 = vpow2.f32 %v3334_v34 }
 0x7e7   : > { %v7348_v18 = vpop.eup %5649  ;;  %v3340_v25 = vmul.f32 1.442695, %v3325_v49  ;;  %v3351_v46 = vsel %vm1029_vm1, %v7344_v44, 0.0  ;;  %v3338_v38 = vmul.f32 1.442695, %v3324_v40 }
 0x7e8   : > { %3352 = vadd.xlane.f32.xlu1 %v3351_v46  ;;  %v3626_v14 = vpop.xlane.xlu1 %3625  ;;  %3652 = vadd.xlane.f32.xlu0 %v3651_v57  ;;  %v3623_v12 = vpop.xlane.xlu0 %3622  ;;  %v3348_v16 = vsel %vm1029_vm1, %v7348_v18, 0.0 }
 0x7e9   : > { %5663 = vpow2.f32 %v3340_v25  ;;  %v3634_v4 = vsub.f32 %v7235_v23, %v3626_v14  ;;  %v3633_v52 = vsub.f32 %v7230_v21, %v3623_v12 }
 0x7ea   : > { %v7354_v30 = vpop.eup %5651  ;;  %5665 = vpow2.f32 %v3643_v48 }
 0x7eb   : > { %v7358_v62 = vpop.eup %5653  ;;  %v3649_v37 = vmul.f32 1.442695, %v3634_v4  ;;  %v3660_v45 = vsel %vm1029_vm1, %v7354_v30, 0.0  ;;  %v3647_v23 = vmul.f32 1.442695, %v3633_v52 }
 0x7ec   : > { %3661 = vadd.xlane.f32.xlu1 %v3660_v45  ;;  %3349 = vadd.xlane.f32.xlu0 %v3348_v16  ;;  %v3657_v8 = vsel %vm1029_vm1, %v7358_v62, 0.0 }
 0x7ed   : > { %5667 = vpow2.f32 %v3649_v37 }
 0x7ee   : > { %v7363_v41 = vpop.eup %5655  ;;  %5669 = vpow2.f32 %v3338_v38 }
 0x7ef   : > { %v3357_v61 = vsel %vm1029_vm1, %v7363_v41, 0.0  ;;  %v7369_v31 = vpop.eup %5657  ;;  %5671 = vpow2.f32 %v3647_v23 }
 0x7f0   : > { %3358 = vadd.xlane.f32.xlu1 %v3357_v61  ;;  %3658 = vadd.xlane.f32.xlu0 %v3657_v8  ;;  %v2758_v26 = vsel %vm1029_vm1, %v7369_v31, 0.0 }
 0x7f2   : > { %v7371_v21 = vpop.eup %5659 }
 0x7f3   : > { %v3666_v7 = vsel %vm1029_vm1, %v7371_v21, 0.0  ;;  %v7377_v60 = vpop.eup %5661 }
 0x7f4   : > { %3667 = vadd.xlane.f32.xlu1 %v3666_v7  ;;  %2759 = vadd.xlane.f32.xlu0 %v2758_v26  ;;  %v3354_v2 = vsel %vm1029_vm1, %v7377_v60, 0.0 }
 0x7f6   : > { %v7379_v29 = vpop.eup %5663 }
 0x7f7   : > { %v7381_v53 = vpop.eup %5665  ;;  %v3363_v34 = vsel %vm1029_vm1, %v7379_v29, 0.0 }
 0x7f8   : > { %3364 = vadd.xlane.f32.xlu1 %v3363_v34  ;;  %3355 = vadd.xlane.f32.xlu0 %v3354_v2  ;;  %v3663_v47 = vsel %vm1029_vm1, %v7381_v53, 0.0  ;;  %v2786_v2 = vmul.f32 %v6871_v63, %v6057_v55 }
 0x7fa   : > { %v7387_v28 = vpop.eup %5667 }
 0x7fb   : > { %v3672_v10 = vsel %vm1029_vm1, %v7387_v28, 0.0  ;;  %v7393_v49 = vpop.eup %5669 }
 0x7fc   : > { %3673 = vadd.xlane.f32.xlu1 %v3672_v10  ;;  %3664 = vadd.xlane.f32.xlu0 %v3663_v47  ;;  %v3360_v48 = vsel %vm1029_vm1, %v7393_v49, 0.0  ;;  %v7397_v57 = vpop.eup %5671 }
 0x7fd   : > { %v3669_v25 = vsel %vm1029_vm1, %v7397_v57, 0.0 }
 0x800   : > { %3361 = vadd.xlane.f32.xlu0 %v3360_v48  ;;  %v2784_v48 = vmul.f32 %v6859_v51, %v6057_v55 }
 0x804   : > { %3670 = vadd.xlane.f32.xlu0 %v3669_v25 }
 0x849   : > { %v2917_v40 = vpop.xlane.xlu1 %2916 }
 0x84a   : > { %5673 = vrcp.f32 %v2917_v40 }
 0x84d   : > { %v7401_v46 = vpop.xlane.xlu1 %2744 }
 0x851   : > { %v3347_v14 = vpop.xlane.xlu1 %3346  ;;  %v2914_v12 = vpop.xlane.xlu0 %2913 }
 0x852   : > { %5675 = vrcp.f32 %v2914_v12 }
 0x853   : > { %5677 = vrcp.f32 %v3347_v14 }
 0x855   : > { %v2923_v4 = vpop.xlane.xlu1 %2922  ;;  %v2742_v16 = vpop.xlane.xlu0 %2741 }
 0x857   : > { %v5674_v23 = vpop.eup %5673 }
 0x858   : > { %v2945_v7 = vmul.f32 %v5674_v23, %v7249_v33 }
 0x859   : > { %v7403_v38 = vpop.xlane.xlu1 %2750  ;;  %v3344_v37 = vpop.xlane.xlu0 %3343 }
 0x85a   : > { %5679 = vrcp.f32 %v3344_v37 }
 0x85b   : > { %5681 = vrcp.f32 %v2923_v4 }
 0x85d   : > { %v2929_v52 = vpop.xlane.xlu1 %2928  ;;  %v2920_v45 = vpop.xlane.xlu0 %2919 }
 0x85e   : > { %5683 = vrcp.f32 %v2920_v45 }
 0x85f   : > { %v5676_v61 = vpop.eup %5675  ;;  %5685 = vrcp.f32 %v2929_v52  ;;  %v2782_v52 = vmul.f32 %v6851_v15, %v6057_v55 }
 0x860   : > { %v2944_v8 = vmul.f32 %v5676_v61, %v7264_v39  ;;  %v2785_v39 = vmul.f32 %v6855_v20, %v6057_v55  ;;  %v5678_v33 = vpop.eup %5677 }
 0x861   : > { %v7407_v26 = vpop.xlane.xlu1 %2756  ;;  %v2748_v34 = vpop.xlane.xlu0 %2747  ;;  %v3375_v4 = vmul.f32 %v5678_v33, %v7260_v0  ;;  %v2781_v0 = vmul.f32 %v6841_v11, %v6057_v55 }
 0x862   : > { %5263 = vmatprep.mubr.msk.f32.mxu0 %vm1029_vm1, %v2944_v8 }
 0x863   : > { %5264 = vmatmul.mubr.msk.f32.vlgmr.msra.gmra.mxu0 %vm1029_vm1, %v2945_v7 }
 0x864   : > { %5276 = vmatpush3.msra.mxu0 %v6907_v1  ;;  %v2783_v1 = vmul.f32 %v6847_v59, %v6057_v55 }
 0x865   : > { %5277 = vmatprep.subr.mxu0 %v2786_v2  ;;  %v2935_v10 = vpop.xlane.xlu1 %2934  ;;  %v2926_v47 = vpop.xlane.xlu0 %2925 }
 0x866   : > { %5278 = vmatpush3.msra.mxu0 %v2786_v2  ;;  %5687 = vrcp.f32 %v2926_v47 }
 0x867   : > { %5279 = vmatprep.subr.mxu0 %v2785_v39  ;;  %v5680_v25 = vpop.eup %5679  ;;  %5689 = vrcp.f32 %v2742_v16  ;;  %v2780_v16 = vmul.f32 %v6843_v58, %v6057_v55 }
 0x868   : > { %5280 = vmatpush3.msra.mxu0 %v2785_v39  ;;  %v3374_v12 = vmul.f32 %v5680_v25, %v7281_v9  ;;  %v5682_v37 = vpop.eup %5681  ;;  %5691 = vrcp.f32 %v2935_v10 }
 0x869   : > { %5281 = vmatprep.subr.mxu0 %v2784_v48  ;;  %v2763_v40 = vpop.xlane.xlu1 %2762  ;;  %v2754_v14 = vpop.xlane.xlu0 %2753  ;;  %v2947_v8 = vmul.f32 %v5682_v37, %v7274_v3 }
 0x86a   : > { %5282 = vmatpush3.msra.mxu0 %v2784_v48  ;;  %5319 = vmatprep.mubr.msk.f32.mxu1 %vm1029_vm1, %v3374_v12 }
 0x86b   : > { %5283 = vmatprep.subr.mxu0 %v2783_v1  ;;  %v5684_v45 = vpop.eup %5683  ;;  %5320 = vmatmul.mubr.msk.f32.vlgmr.msra.gmra.mxu1 %vm1029_vm1, %v3375_v4 }
 0x86c   : > { %5284 = vmatpush3.msra.mxu0 %v2783_v1  ;;  %v2946_v9 = vmul.f32 %v5684_v45, %v7291_v22  ;;  %v3698_v22 = vmul.f32 %v6863_v19, %v6103_v13  ;;  %v5686_v10 = vpop.eup %5685 }
 0x86d   : > { %5285 = vmatprep.subr.mxu0 %v2782_v52  ;;  %v3656_v23 = vpop.xlane.xlu1 %3655  ;;  %v2932_v61 = vpop.xlane.xlu0 %2931  ;;  %v2949_v33 = vmul.f32 %v5686_v10, %v7294_v17 }
 0x86e   : > { %5286 = vmatpush3.msra.mxu0 %v2782_v52  ;;  %5693 = vrcp.f32 %v2932_v61  ;;  %5266 = vmatprep.mubr.msk.f32.mxu0 %vm1029_vm1, %v2946_v9 }
 0x86f   : > { %5287 = vmatprep.subr.mxu0 %v2781_v0  ;;  %5267 = vmatmul.mubr.msk.f32.gmra.mxu0 %vm1029_vm1, %v2947_v8  ;;  %5695 = vrcp.f32 %v7401_v46  ;;  %v3695_v8 = vmul.f32 %v6859_v51, %v6103_v13  ;;  %v3693_v51 = vmul.f32 %v6851_v15, %v6103_v13 }
 0x870   : > { %5288 = vmatpush3.msra.mxu0 %v2781_v0  ;;  %5697 = vrcp.f32 %v2748_v34 }
 0x871   : > { %v3353_v7 = vpop.xlane.xlu1 %3352  ;;  %v3653_v2 = vpop.xlane.xlu0 %3652  ;;  %5289 = vmatprep.subr.mxu0 %v2780_v16  ;;  %5699 = vrcp.f32 %v7403_v38 }
 0x872   : > { %5290 = vmatpush3.msra.mxu0 %v2780_v16  ;;  %5701 = vrcp.f32 %v3353_v7 }
 0x873   : > { %v5688_v3 = vpop.eup %5687  ;;  %5331 = vmatprep.subr.mxu0 %v3698_v22 }
 0x874   : > { %v2948_v55 = vmul.f32 %v5688_v3, %v7311_v43  ;;  %v5690_v34 = vpop.eup %5689 }
 0x875   : > { %v3662_v47 = vpop.xlane.xlu1 %3661  ;;  %v3350_v39 = vpop.xlane.xlu0 %3349 }
 0x876   : > { %5703 = vrcp.f32 %v3350_v39  ;;  %5269 = vmatprep.mubr.msk.f32.mxu0 %vm1029_vm1, %v2948_v55  ;;  %v5692_v48 = vpop.eup %5691 }
 0x877   : > { %5705 = vrcp.f32 %v2754_v14  ;;  %5270 = vmatmul.mubr.msk.f32.gmra.mxu0 %vm1029_vm1, %v2949_v33  ;;  %v2951_v17 = vmul.f32 %v5692_v48, %v7314_v24  ;;  %v2772_v14 = vmul.f32 %v5690_v34, %v7271_v50  ;;  %v3697_v50 = vmul.f32 %v6871_v63, %v6103_v13 }
 0x878   : > { %5707 = vrcp.f32 %v7407_v26 }
 0x879   : > { %v3359_v19 = vpop.xlane.xlu1 %3358  ;;  %v3659_v46 = vpop.xlane.xlu0 %3658  ;;  %5709 = vrcp.f32 %v2763_v40 }
 0x87a   : > { %5711 = vrcp.f32 %v3653_v2 }
 0x87b   : > { %v5694_v38 = vpop.eup %5693 }
 0x87c   : > { %v2950_v43 = vmul.f32 %v5694_v38, %v7328_v54  ;;  %v5696_v12 = vpop.eup %5695 }
 0x87d   : > { %v2760_v25 = vpop.xlane.xlu0 %2759  ;;  %v3668_v1 = vpop.xlane.xlu1 %3667  ;;  %v2773_v54 = vmul.f32 %v5696_v12, %v7254_v27  ;;  %v3696_v27 = vmul.f32 %v6855_v20, %v6103_v13  ;;  %v4007_v12 = vld [vmem:[%s7705_s12 + $0x60] sm:$0xff] }
 0x87e   : > { %5713 = vrcp.f32 %v2760_v25  ;;  %5272 = vmatprep.mubr.msk.f32.mxu0 %vm1029_vm1, %v2950_v43  ;;  %v5698_v4 = vpop.eup %5697  ;;  %v4024_v43 = vld [vmem:[%s7705_s12 + $0xe8] sm:$0xff] }
 0x87f   : > { %5715 = vrcp.f32 %v3656_v23  ;;  %5273 = vmatmul.mubr.msk.f32.gmra.mxu0 %vm1029_vm1, %v2951_v17  ;;  %v5700_v40 = vpop.eup %5699  ;;  %v2774_v24 = vmul.f32 %v5698_v4, %v7301_v6  ;;  %v4023_v17 = vld [vmem:[%s7705_s12 + $0xe0] sm:$0xff]  ;;  %v4006_v4 = vld [vmem:[%s7705_s12 + $0x58] sm:$0xff] }
 0x880   : > { %5717 = vrcp.f32 %v3359_v19  ;;  %5291 = vmatprep.mubr.msk.f32.mxu0 %vm1029_vm1, %v2772_v14  ;;  %v5702_v37 = vpop.eup %5701  ;;  %v2775_v6 = vmul.f32 %v5700_v40, %v7284_v35  ;;  %v4022_v14 = vld [vmem:[%s7705_s12 + $0xd8] sm:$0xff]  ;;  %v4005_v40 = vld [vmem:[%s7705_s12 + $0x50] sm:$0xff] }
 0x881   : > { %v3356_v26 = vpop.xlane.xlu0 %3355  ;;  %5719 = vrcp.f32 %v3659_v46  ;;  %v3365_v45 = vpop.xlane.xlu1 %3364  ;;  %v3377_v63 = vmul.f32 %v5702_v37, %v7344_v44  ;;  %v3694_v44 = vmul.f32 %v6847_v59, %v6103_v13  ;;  %v3692_v59 = vmul.f32 %v6841_v11, %v6103_v13  ;;  %v4004_v37 = vld [vmem:[%s7705_s12 + $0x48] sm:$0xff] }
 0x882   : > { %5721 = vrcp.f32 %v3356_v26  ;;  %v4021_v26 = vld [vmem:[%s7705_s12 + $0xd0] sm:$0xff] }
 0x883   : > { %v5704_v52 = vpop.eup %5703  ;;  %5292 = vmatmul.mubr.msk.f32.vlgmr.msra.gmra.mxu0 %vm1029_vm1, %v2773_v54  ;;  %5723 = vrcp.f32 %v3662_v47  ;;  %v4020_v54 = vld [vmem:[%s7705_s12 + $0xc8] sm:$0xff] }
 0x884   : > { %v5706_v23 = vpop.eup %5705  ;;  %5332 = vmatpush3.msra.mxu0 %v3698_v22  ;;  %5294 = vmatprep.mubr.msk.f32.mxu0 %vm1029_vm1, %v2774_v24  ;;  %v3376_v9 = vmul.f32 %v5704_v52, %v7348_v18  ;;  %v4019_v24 = vld [vmem:[%s7705_s12 + $0xc0] sm:$0xff] }
 0x885   : > { %v3665_v61 = vpop.xlane.xlu0 %3664  ;;  %5333 = vmatprep.subr.mxu0 %v3697_v50  ;;  %v5708_v0 = vpop.eup %5707  ;;  %v2776_v18 = vmul.f32 %v5706_v23, %v7316_v32  ;;  %v4003_v52 = vld [vmem:[%s7705_s12 + $0x40] sm:$0xff]  ;;  %v4017_v23 = vld [vmem:[%s7705_s12 + $0xb0] sm:$0xff] }
 0x886   : > { %5334 = vmatpush3.msra.mxu0 %v3697_v50  ;;  %5725 = vrcp.f32 %v3665_v61  ;;  %5322 = vmatprep.mubr.msk.f32.mxu1 %vm1029_vm1, %v3376_v9  ;;  %v5710_v35 = vpop.eup %5709  ;;  %v3674_v16 = vpop.xlane.xlu1 %3673  ;;  %v2777_v7 = vmul.f32 %v5708_v0, %v7304_v42  ;;  %v4002_v50 = vld [vmem:[%s7705_s12 + $0x38] sm:$0xff]  ;;  %v4001_v61 = vld [vmem:[%s7705_s12 + $0x30] sm:$0xff]  ;;  %v4016_v9 = vld [vmem:[%s7705_s12 + $0xa8] sm:$0xff] }
 0x887   : > { %5727 = vrcp.f32 %v3668_v1  ;;  %5335 = vmatprep.subr.mxu0 %v3696_v27  ;;  %5295 = vmatmul.mubr.msk.f32.gmra.mxu0 %vm1029_vm1, %v2775_v6  ;;  %v5712_v32 = vpop.eup %5711  ;;  %v2779_v42 = vmul.f32 %v5710_v35, %v7324_v5  ;;  %v4008_v1 = vld [vmem:[%s7705_s12 + $0x68] sm:$0xff]  ;;  %v4015_v6 = vld [vmem:[%s7705_s12 + $0xa0] sm:$0xff] }
 0x888   : > { %5729 = vrcp.f32 %v3365_v45  ;;  %5323 = vmatmul.mubr.msk.f32.gmra.mxu1 %vm1029_vm1, %v3377_v63  ;;  %5336 = vmatpush3.msra.mxu0 %v3696_v27  ;;  %v3683_v15 = vmul.f32 %v5712_v32, %v7339_v56  ;;  %v4018_v45 = vld [vmem:[%s7705_s12 + $0xb8] sm:$0xff]  ;;  %v4000_v27 = vld [vmem:[%s7705_s12 + $0x28] sm:$0xff]  ;;  %v3999_v0 = vld [vmem:[%s7705_s12 + $0x20] sm:$0xff] }
 0x889   : > { %v3362_v20 = vpop.xlane.xlu0 %3361  ;;  %5297 = vmatprep.mubr.msk.f32.mxu0 %vm1029_vm1, %v2776_v18  ;;  %5337 = vmatprep.subr.mxu0 %v3695_v8  ;;  %v4014_v63 = vld [vmem:[%s7705_s12 + $0x98] sm:$0xff] }
 0x88a   : > { %5731 = vrcp.f32 %v3362_v20  ;;  %5338 = vmatpush3.msra.mxu0 %v3695_v8  ;;  %v3998_v18 = vld [vmem:[%s7705_s12 + $0x18] sm:$0xff]  ;;  %v4013_v8 = vld [vmem:[%s7705_s12 + $0x90] sm:$0xff] }
 0x88b   : > { %v5714_v2 = vpop.eup %5713  ;;  %5339 = vmatprep.subr.mxu0 %v3694_v44  ;;  %5298 = vmatmul.mubr.msk.f32.gmra.mxu0 %vm1029_vm1, %v2777_v7  ;;  %5733 = vrcp.f32 %v3674_v16  ;;  %v3997_v20 = vld [vmem:[%s7705_s12 + $0x10] sm:$0xff] }
 0x88c   : > { %v5716_v22 = vpop.eup %5715  ;;  %5340 = vmatpush3.msra.mxu0 %v3694_v44  ;;  %v2778_v3 = vmul.f32 %v5714_v2, %v7369_v31  ;;  %v3691_v31 = vmul.f32 %v6843_v58, %v6103_v13 }
 0x88d   : > { %v3671_v10 = vpop.xlane.xlu0 %3670  ;;  %v5718_v47 = vpop.eup %5717  ;;  %5341 = vmatprep.subr.mxu0 %v3693_v51  ;;  %v3684_v5 = vmul.f32 %v5716_v22, %v7334_v36 }
 0x88e   : > { %5735 = vrcp.f32 %v3671_v10  ;;  %v5720_v39 = vpop.eup %5719  ;;  %5342 = vmatpush3.msra.mxu0 %v3693_v51  ;;  %5300 = vmatprep.mubr.msk.f32.mxu0 %vm1029_vm1, %v2778_v3  ;;  %v3379_v33 = vmul.f32 %v5718_v47, %v7363_v41 }
 0x88f   : > { %v5722_v55 = vpop.eup %5721  ;;  %5343 = vmatprep.subr.mxu0 %v3692_v59  ;;  %5301 = vmatmul.mubr.msk.f32.gmra.mxu0 %vm1029_vm1, %v2779_v42  ;;  %v3685_v56 = vmul.f32 %v5720_v39, %v7358_v62 }
 0x890   : > { %5344 = vmatpush3.msra.mxu0 %v3692_v59  ;;  %5347 = vmatprep.mubr.msk.f32.mxu0 %vm1029_vm1, %v3683_v15  ;;  %v3378_v11 = vmul.f32 %v5722_v55, %v7377_v60  ;;  %v5724_v19 = vpop.eup %5723 }
 0x891   : > { %5345 = vmatprep.subr.mxu0 %v3691_v31  ;;  %v3686_v36 = vmul.f32 %v5724_v19, %v7354_v30 }
 0x892   : > { %5346 = vmatpush3.msra.mxu0 %v3691_v31  ;;  %5325 = vmatprep.mubr.msk.f32.mxu1 %vm1029_vm1, %v3378_v11 }
 0x893   : > { %v5726_v46 = vpop.eup %5725  ;;  %5326 = vmatmul.mubr.msk.f32.gmra.mxu1 %vm1029_vm1, %v3379_v33  ;;  %5348 = vmatmul.mubr.msk.f32.vlgmr.msra.gmra.mxu0 %vm1029_vm1, %v3684_v5 }
 0x894   : > { %v5728_v13 = vpop.eup %5727  ;;  %5350 = vmatprep.mubr.msk.f32.mxu0 %vm1029_vm1, %v3685_v56  ;;  %v3687_v41 = vmul.f32 %v5726_v46, %v7381_v53 }
 0x895   : > { %v5730_v58 = vpop.eup %5729  ;;  %v3688_v38 = vmul.f32 %v5728_v13, %v7371_v21  ;;  %v4026_v21 = vld [vmem:[%s7705_s12 + $0xf8] sm:$0xff] }
 0x896   : > { %v3381_v62 = vmul.f32 %v5730_v58, %v7379_v29  ;;  %v3858_v29 = vld [vmem:[%s7695_s2] sm:$0xff]  ;;  %4833 = vmatprep.subr.mxu0 %v4026_v21 }
 0x897   : > { %v5732_v60 = vpop.eup %5731  ;;  %5351 = vmatmul.mubr.msk.f32.gmra.mxu0 %vm1029_vm1, %v3686_v36 }
 0x898   : > { %v3380_v34 = vmul.f32 %v5732_v60, %v7393_v49  ;;  %5353 = vmatprep.mubr.msk.f32.mxu0 %vm1029_vm1, %v3687_v41  ;;  %v5734_v48 = vpop.eup %5733  ;;  %v4010_v49 = vld [vmem:[%s7705_s12 + $0x78] sm:$0xff] }
 0x899   : > { %v3690_v53 = vmul.f32 %v5734_v48, %v7387_v28  ;;  %v4025_v28 = vld [vmem:[%s7705_s12 + $0xf0] sm:$0xff]  ;;  %4834 = vmatpush3.msra.mxu0 %v4010_v49 }
 0x89a   : > { %5328 = vmatprep.mubr.msk.f32.mxu1 %vm1029_vm1, %v3380_v34  ;;  %4835 = vmatprep.subr.mxu0 %v4025_v28 }
 0x89b   : > { %v5736_v25 = vpop.eup %5735  ;;  %5329 = vmatmul.mubr.msk.f32.gmra.mxu1 %vm1029_vm1, %v3381_v62  ;;  %5354 = vmatmul.mubr.msk.f32.gmra.mxu0 %vm1029_vm1, %v3688_v38 }
 0x89c   : > { %v3689_v30 = vmul.f32 %v5736_v25, %v7397_v57  ;;  %5375 = vmatprep.mubr.msk.f32.mxu1 %vm1029_vm1, %v3858_v29  ;;  %v4009_v57 = vld [vmem:[%s7705_s12 + $0x70] sm:$0xff] }
 0x89d   : > { %4836 = vmatpush3.msra.mxu0 %v4009_v57 }
 0x89e   : > { %5356 = vmatprep.mubr.msk.f32.mxu0 %vm1029_vm1, %v3689_v30  ;;  %4837 = vmatprep.subr.mxu0 %v4024_v43 }
 0x89f   : > { %5357 = vmatmul.mubr.msk.f32.gmra.mxu0 %vm1029_vm1, %v3690_v53 }
 0x8a0   : > { %4838 = vmatpush3.msra.mxu0 %v4008_v1 }
 0x8a1   : > { %4839 = vmatprep.subr.mxu0 %v4023_v17 }
 0x8a2   : > { %4840 = vmatpush3.msra.mxu0 %v4007_v12 }
 0x8a3   : > { %4841 = vmatprep.subr.mxu0 %v4022_v14  ;;  %v4529_v14 = vld [vmem:[%s7704_s11] ss:$0 sm:$0xff] }
 0x8a4   : > { %4842 = vmatpush3.msra.mxu0 %v4006_v4 }
 0x8a5   : > { %4843 = vmatprep.subr.mxu0 %v4021_v26 }
 0x8a6   : > { %4844 = vmatpush3.msra.mxu0 %v4005_v40 }
 0x8a7   : > { %4845 = vmatprep.subr.mxu0 %v4020_v54 }
 0x8a8   : > { %4846 = vmatpush3.msra.mxu0 %v4004_v37 }
 0x8a9   : > { %4847 = vmatprep.subr.mxu0 %v4019_v24 }
 0x8aa   : > { %4848 = vmatpush3.msra.mxu0 %v4003_v52 }
 0x8ab   : > { %4849 = vmatprep.subr.mxu0 %v4018_v45 }
 0x8ac   : > { %4850 = vmatpush3.msra.mxu0 %v4002_v50 }
 0x8ad   : > { %4851 = vmatprep.subr.mxu0 %v4017_v23 }
 0x8ae   : > { %4852 = vmatpush3.msra.mxu0 %v4001_v61 }
 0x8af   : > { %4853 = vmatprep.subr.mxu0 %v4016_v9 }
 0x8b0   : > { %4854 = vmatpush3.msra.mxu0 %v4000_v27 }
 0x8b1   : > { %4855 = vmatprep.subr.mxu0 %v4015_v6 }
 0x8b2   : > { %4856 = vmatpush3.msra.mxu0 %v3999_v0 }
 0x8b3   : > { %4857 = vmatprep.subr.mxu0 %v4014_v63 }
 0x8b4   : > { %4858 = vmatpush3.msra.mxu0 %v3998_v18 }
 0x8b5   : > { %4859 = vmatprep.subr.mxu0 %v4013_v8 }
 0x8b6   : > { %4860 = vmatpush3.msra.mxu0 %v3997_v20 }
 0x923   : > { %v5265_v35 = vpop.f32.mrf.mxu0 }
 0x925   : > { %v3050_v16 = vpop.f32.mrf.mxu0 }
 0x92b   : > { %v5321_v59 = vpop.f32.mrf.mxu1 }
 0x92d   : > { %v3480_v15 = vpop.f32.mrf.mxu1 }
 0x92f   : > { %v5268_v44 = vpop.f32.mrf.mxu0 }
 0x931   : > { %v3060_v7 = vpop.f32.mrf.mxu0 }
 0x937   : > { %v5271_v32 = vpop.f32.mrf.mxu0 }
 0x939   : > { %v3070_v2 = vpop.f32.mrf.mxu0 }
 0x93f   : > { %v5274_v51 = vpop.f32.mrf.mxu0 }
 0x941   : > { %v3080_v22 = vpop.f32.mrf.mxu0 }
 0x943   : > { %v5293_v10 = vpop.f32.mrf.mxu0 }
 0x944   : > { %v3185_v12 = vadd.f32 %v5293_v10, %v5265_v35 }
 0x945   : > { %v3179_v3 = vpop.f32.mrf.mxu0 }
 0x946   : > { %v3180_v24 = vadd.f32 %v3179_v3, %v3050_v16  ;;  %v3520_v9 = vadd.f32 %v5321_v59, %v3185_v12  ;;  %v3859_v3 = vld [vmem:[%s7695_s2 + $0x8] sm:$0xff]  ;;  %v3861_v59 = vld [vmem:[%s7695_s2 + $0x18] sm:$0xff] }
 0x947   : > { %v5296_v47 = vpop.f32.mrf.mxu0 }
 0x948   : > { %v5324_v31 = vpop.f32.mrf.mxu1  ;;  %v3195_v48 = vadd.f32 %v5296_v47, %v5268_v44  ;;  %v3519_v18 = vadd.f32 %v3480_v15, %v3180_v24  ;;  %v3860_v47 = vld [vmem:[%s7695_s2 + $0x10] sm:$0xff] }
 0x949   : > { %v3189_v42 = vpop.f32.mrf.mxu0  ;;  %v3864_v15 = vld [vmem:[%s7695_s2 + $0x30] sm:$0xff] }
 0x94a   : > { %v3490_v33 = vpop.f32.mrf.mxu1  ;;  %v3190_v49 = vadd.f32 %v3189_v42, %v3060_v7  ;;  %v3522_v26 = vadd.f32 %v5324_v31, %v3195_v48  ;;  %v3862_v42 = vld [vmem:[%s7695_s2 + $0x20] sm:$0xff]  ;;  %v4012_v31 = vld [vmem:[%s7705_s12 + $0x88] sm:$0xff] }
 0x94b   : > { %v5299_v39 = vpop.f32.mrf.mxu0  ;;  %4861 = vmatprep.subr.mxu0 %v4012_v31  ;;  %v4538_v48 = vld [vmem:[%s7706_s13] ss:$0 sm:$0xff] }
 0x94c   : > { %v3205_v34 = vadd.f32 %v5299_v39, %v5271_v32  ;;  %v3521_v52 = vadd.f32 %v3490_v33, %v3190_v49  ;;  %v3863_v39 = vld [vmem:[%s7695_s2 + $0x28] sm:$0xff]  ;;  %v3995_v33 = vld [vmem:[%s7705_s12] sm:$0xff] }
 0x94d   : > { %v3199_v55 = vpop.f32.mrf.mxu0 }
 0x94e   : > { %v3200_v30 = vadd.f32 %v3199_v55, %v3070_v2  ;;  %v3865_v55 = vld [vmem:[%s7695_s2 + $0x38] sm:$0xff] }
 0x94f   : > { %v5302_v11 = vpop.f32.mrf.mxu0 }
 0x950   : > { %v3215_v62 = vadd.f32 %v5302_v11, %v5274_v51  ;;  %v3996_v11 = vld [vmem:[%s7705_s12 + $0x8] sm:$0xff] }
 0x951   : > { %v3209_v5 = vpop.f32.mrf.mxu0  ;;  %4862 = vmatpush3.msra.mxu0 %v3996_v11 }
 0x952   : > { %v3210_v53 = vadd.f32 %v3209_v5, %v3080_v22  ;;  %v4011_v5 = vld [vmem:[%s7705_s12 + $0x80] sm:$0xff] }
 0x953   : > { %v5349_v19 = vpop.f32.mrf.mxu0  ;;  %v5327_v56 = vpop.f32.mrf.mxu1  ;;  %4863 = vmatprep.subr.mxu0 %v4011_v5 }
 0x954   : > { %v3524_v29 = vadd.f32 %v5327_v56, %v3205_v34  ;;  %v3829_v63 = vadd.f32 %v5349_v19, %v3520_v9  ;;  %4864 = vmatpush3.msra.mxu0 %v3995_v33  ;;  %v4246_v34 = vld [vmem:[%s7707_s14 + $0x18] sm:$0xff] }
 0x955   : > { %v3789_v46 = vpop.f32.mrf.mxu0  ;;  %v3500_v58 = vpop.f32.mrf.mxu1 }
 0x956   : > { %v3523_v57 = vadd.f32 %v3500_v58, %v3200_v30  ;;  %v3828_v35 = vadd.f32 %v3789_v46, %v3519_v18  ;;  %v3843_v7 = vadd.f32 %v4529_v14, %v3829_v63 }
 0x957   : > { %v5352_v13 = vpop.f32.mrf.mxu0 }
 0x958   : > { %v3831_v45 = vadd.f32 %v5352_v13, %v3522_v26  ;;  %v3842_v2 = vadd.f32 %v4529_v14, %v3828_v35  ;;  %v3851_v22 = vmax.f32 %v3843_v7, 0.0 }
 0x959   : > { %v3799_v36 = vpop.f32.mrf.mxu0 }
 0x95a   : > { %v3830_v27 = vadd.f32 %v3799_v36, %v3521_v52  ;;  %v3845_v8 = vadd.f32 %v4529_v14, %v3831_v45  ;;  %v3850_v10 = vmax.f32 %v3842_v2, 0.0 }
 0x95b   : > { %v5330_v60 = vpop.f32.mrf.mxu1  ;;  %v5355_v41 = vpop.f32.mrf.mxu0 }
 0x95c   : > { %v3526_v21 = vadd.f32 %v5330_v60, %v3215_v62  ;;  %v3833_v43 = vadd.f32 %v5355_v41, %v3524_v29  ;;  %v3844_v16 = vadd.f32 %v4529_v14, %v3830_v27  ;;  %v3853_v32 = vmax.f32 %v3845_v8, 0.0 }
 0x95d   : > { %v3510_v38 = vpop.f32.mrf.mxu1  ;;  %v3809_v25 = vpop.f32.mrf.mxu0 }
 0x95e   : > { %v3525_v1 = vadd.f32 %v3510_v38, %v3210_v53  ;;  %v3832_v40 = vadd.f32 %v3809_v25, %v3523_v57  ;;  %v3847_v50 = vadd.f32 %v4529_v14, %v3833_v43  ;;  %v3852_v51 = vmax.f32 %v3844_v16, 0.0  ;;  %v4244_v57 = vld [vmem:[%s7707_s14 + $0x8] sm:$0xff] }
 0x95f   : > { %v5358_v28 = vpop.f32.mrf.mxu0 }
 0x960   : > { %v3835_v17 = vadd.f32 %v5358_v28, %v3526_v21  ;;  %v3846_v6 = vadd.f32 %v4529_v14, %v3832_v40  ;;  %v7602_v20 = vmax.f32 %v3847_v50, 0.0  ;;  %v4245_v28 = vld [vmem:[%s7707_s14 + $0x10] sm:$0xff] }
 0x961   : > { %v3819_v4 = vpop.f32.mrf.mxu0 }
 0x962   : > { %v3849_v54 = vadd.f32 %v4529_v14, %v3835_v17  ;;  %v3834_v37 = vadd.f32 %v3819_v4, %v3525_v1  ;;  %v3854_v44 = vmax.f32 %v3846_v6, 0.0 }
 0x964   : > { %v7596_v23 = vmax.f32 %v3849_v54, 0.0  ;;  %v3848_v61 = vadd.f32 %v4529_v14, %v3834_v37  ;;  %v4243_v14 = vld [vmem:[%s7707_s14] sm:$0xff] }
 0x966   : > { %v7598_v0 = vmax.f32 %v3848_v61, 0.0  ;;  %5359 = vmatprep.subr.mxu1 %v7596_v23 }
 0x967   : > { %5360 = vmatpush3.msra.mxu1 %v7596_v23 }
 0x968   : > { %5361 = vmatprep.subr.mxu1 %v7598_v0 }
 0x969   : > { %5362 = vmatpush3.msra.mxu1 %v7598_v0 }
 0x96a   : > { %5363 = vmatprep.subr.mxu1 %v7602_v20 }
 0x96b   : > { %5364 = vmatpush3.msra.mxu1 %v7602_v20 }
 0x96c   : > { %5365 = vmatprep.subr.mxu1 %v3854_v44 }
 0x96d   : > { %5366 = vmatpush3.msra.mxu1 %v3854_v44 }
 0x96e   : > { %5367 = vmatprep.subr.mxu1 %v3853_v32 }
 0x96f   : > { %5368 = vmatpush3.msra.mxu1 %v3853_v32 }
 0x970   : > { %5369 = vmatprep.subr.mxu1 %v3852_v51 }
 0x971   : > { %5370 = vmatpush3.msra.mxu1 %v3852_v51 }
 0x972   : > { %5371 = vmatprep.subr.mxu1 %v3851_v22 }
 0x973   : > { %5372 = vmatpush3.msra.mxu1 %v3851_v22 }
 0x974   : > { %5373 = vmatprep.subr.mxu1 %v3850_v10 }
 0x975   : > { %5374 = vmatpush3.msra.mxu1 %v3850_v10 }
 0x976   : > { %5376 = vmatmul.mubr.msk.f32.vlgmr.msra.gmra.mxu1 %vm1029_vm1, %v3859_v3  ;;  %5387 = vmatprep.subr.mxu1 %v4246_v34 }
 0x977   : > { %5378 = vmatprep.mubr.msk.f32.mxu1 %vm1029_vm1, %v3860_v47  ;;  %5388 = vmatpush3.msra.mxu1 %v4246_v34 }
 0x978   : > { %5389 = vmatprep.subr.mxu1 %v4245_v28 }
 0x979   : > { %5390 = vmatpush3.msra.mxu1 %v4245_v28 }
 0x97a   : > { %5379 = vmatmul.mubr.msk.f32.gmra.mxu1 %vm1029_vm1, %v3861_v59  ;;  %5391 = vmatprep.subr.mxu1 %v4244_v57 }
 0x97b   : > { %5381 = vmatprep.mubr.msk.f32.mxu1 %vm1029_vm1, %v3862_v42  ;;  %5392 = vmatpush3.msra.mxu1 %v4244_v57 }
 0x97c   : > { %5393 = vmatprep.subr.mxu1 %v4243_v14 }
 0x97d   : > { %5394 = vmatpush3.msra.mxu1 %v4243_v14 }
 0x97e   : > { %5382 = vmatmul.mubr.msk.f32.gmra.mxu1 %vm1029_vm1, %v3863_v39 }
 0x97f   : > { %5384 = vmatprep.mubr.msk.f32.mxu1 %vm1029_vm1, %v3864_v15 }
 0x982   : > { %5385 = vmatmul.mubr.msk.f32.gmra.mxu1 %vm1029_vm1, %v3865_v55  ;;  %vm4254_vm1 = vcmask 261120  }
 0xa36   : > { %v5377_v19 = vpop.f32.mrf.mxu1 }
 0xa38   : > { %v3956_v56 = vpop.f32.mrf.mxu1 }
 0xa39   : > { %4098 = vmatprep.mubr.f32.mxu0 %v3956_v56 }
 0xa3a   : > { %4099 = vmatmul.mubr.f32.vlgmr.msra.gmra.mxu0 %v3850_v10  ;;  %v5380_v46 = vpop.f32.mrf.mxu1 }
 0xa3b   : > { %4103 = vmatprep.mubr.f32.mxu0 %v5377_v19 }
 0xa3c   : > { %v3966_v13 = vpop.f32.mrf.mxu1 }
 0xa3e   : > { %4104 = vmatmul.mubr.f32.gmra.mxu0 %v3851_v22  ;;  %v5383_v58 = vpop.f32.mrf.mxu1 }
 0xa3f   : > { %4108 = vmatprep.mubr.f32.mxu0 %v3966_v13 }
 0xa40   : > { %v3976_v36 = vpop.f32.mrf.mxu1 }
 0xa42   : > { %4109 = vmatmul.mubr.f32.gmra.mxu0 %v3852_v51  ;;  %v5386_v60 = vpop.f32.mrf.mxu1 }
 0xa43   : > { %4113 = vmatprep.mubr.f32.mxu0 %v5380_v46 }
 0xa44   : > { %v3986_v41 = vpop.f32.mrf.mxu1 }
 0xa46   : > { %4114 = vmatmul.mubr.f32.gmra.mxu0 %v3853_v32 }
 0xa47   : > { %4118 = vmatprep.mubr.f32.mxu0 %v3976_v36 }
 0xa4a   : > { %4119 = vmatmul.mubr.f32.gmra.mxu0 %v3854_v44 }
 0xa4b   : > { %4123 = vmatprep.mubr.f32.mxu0 %v5383_v58 }
 0xa4e   : > { %4124 = vmatmul.mubr.f32.gmra.mxu0 %v7602_v20 }
 0xa4f   : > { %4128 = vmatprep.mubr.f32.mxu0 %v3986_v41 }
 0xa52   : > { %4129 = vmatmul.mubr.f32.gmra.mxu0 %v7598_v0 }
 0xa53   : > { %4133 = vmatprep.mubr.f32.mxu0 %v5386_v60 }
 0xa56   : > { %4134 = vmatmul.mubr.f32.gmra.mxu0 %v7596_v23 }
 0xafa   : > { %v4865_v62 = vpop.f32.mrf.mxu0 }
 0xafc   : > { %v4866_v38 = vpop.f32.mrf.mxu0 }
 0xafd   : > { %v4867_v25 = vadd.f32 %v4866_v38, %v4865_v62 }
 0xafe   : > { %v4868_v30 = vpop.f32.mrf.mxu0 }
 0xaff   : > { %v4101_v53 = vadd.f32 %v4867_v25, %v4538_v48 }
 0xb00   : > { %v4869_v29 = vpop.f32.mrf.mxu0 }
 0xb01   : > { %5737 = vtanh.f32 %v4101_v53  ;;  %v4870_v21 = vadd.f32 %v4869_v29, %v4868_v30  ;;  %v4539_v3 = vmul.f32 -1.442695, %v4101_v53 }
 0xb02   : > { %v4871_v49 = vpop.f32.mrf.mxu0 }
 0xb03   : > { %v4106_v43 = vadd.f32 %v4870_v21, %v4538_v48 }
 0xb04   : > { %v4872_v1 = vpop.f32.mrf.mxu0 }
 0xb05   : > { %5739 = vtanh.f32 %v4106_v43  ;;  %v4873_v17 = vadd.f32 %v4872_v1, %v4871_v49  ;;  %v4540_v47 = vmul.f32 -1.442695, %v4106_v43 }
 0xb06   : > { %v4874_v12 = vpop.f32.mrf.mxu0 }
 0xb07   : > { %v4111_v4 = vadd.f32 %v4873_v17, %v4538_v48 }
 0xb08   : > { %v4875_v26 = vpop.f32.mrf.mxu0 }
 0xb09   : > { %5741 = vtanh.f32 %v4111_v4  ;;  %v4876_v40 = vadd.f32 %v4875_v26, %v4874_v12  ;;  %v4541_v59 = vmul.f32 -1.442695, %v4111_v4 }
 0xb0a   : > { %v4877_v54 = vpop.f32.mrf.mxu0 }
 0xb0b   : > { %v4116_v37 = vadd.f32 %v4876_v40, %v4538_v48 }
 0xb0c   : > { %v4878_v24 = vpop.f32.mrf.mxu0 }
 0xb0d   : > { %5743 = vtanh.f32 %v4116_v37  ;;  %v4879_v52 = vadd.f32 %v4878_v24, %v4877_v54  ;;  %v4542_v42 = vmul.f32 -1.442695, %v4116_v37 }
 0xb0e   : > { %v5738_v45 = vpop.eup %5737  ;;  %v4880_v50 = vpop.f32.mrf.mxu0 }
 0xb0f   : > { %v4121_v23 = vadd.f32 %v4879_v52, %v4538_v48  ;;  %4211 = vrot.lane.b32.xlu0 %v5738_v45, %s5805_s30 }
 0xb10   : > { %v4881_v61 = vpop.f32.mrf.mxu0 }
 0xb11   : > { %5745 = vtanh.f32 %v4121_v23  ;;  %v4882_v9 = vadd.f32 %v4881_v61, %v4880_v50  ;;  %v4543_v15 = vmul.f32 -1.442695, %v4121_v23 }
 0xb12   : > { %v5740_v27 = vpop.eup %5739  ;;  %v4883_v6 = vpop.f32.mrf.mxu0 }
 0xb13   : > { %v4126_v0 = vadd.f32 %v4882_v9, %v4538_v48  ;;  %4213 = vrot.lane.b32.xlu1 %v5740_v27, %s5805_s30 }
 0xb14   : > { %v4884_v63 = vpop.f32.mrf.mxu0 }
 0xb15   : > { %5747 = vtanh.f32 %v4126_v0  ;;  %v4885_v18 = vadd.f32 %v4884_v63, %v4883_v6  ;;  %v4544_v11 = vmul.f32 -1.442695, %v4126_v0 }
 0xb16   : > { %v5742_v8 = vpop.eup %5741  ;;  %v4886_v20 = vpop.f32.mrf.mxu0 }
 0xb17   : > { %v4131_v35 = vadd.f32 %v4885_v18, %v4538_v48  ;;  %4215 = vrot.lane.b32.xlu1 %v5742_v8, %s5805_s30 }
 0xb18   : > { %v4887_v16 = vpop.f32.mrf.mxu0 }
 0xb19   : > { %5749 = vtanh.f32 %v4131_v35  ;;  %v4888_v44 = vadd.f32 %v4887_v16, %v4886_v20  ;;  %v4545_v19 = vmul.f32 -1.442695, %v4131_v35  ;;  %v4547_v16 = vld [vmem:[%s7708_s15] ss:$0 sm:$0xff] }
 0xb1a   : > { %v5744_v7 = vpop.eup %5743 }
 0xb1b   : > { %v4136_v32 = vadd.f32 %v4888_v44, %v4538_v48  ;;  %4217 = vrot.lane.b32.xlu0 %v5744_v7, %s5805_s30 }
 0xb1d   : > { %5751 = vtanh.f32 %v4136_v32  ;;  %v4546_v46 = vmul.f32 -1.442695, %v4136_v32 }
 0xb1e   : > { %v5746_v2 = vpop.eup %5745  ;;  %5753 = vpow2.f32 %v4539_v3 }
 0xb1f   : > { %4219 = vrot.lane.b32.xlu1 %v5746_v2, %s5805_s30  ;;  %5755 = vpow2.f32 %v4540_v47 }
 0xb20   : > { %5757 = vpow2.f32 %v4541_v59 }
 0xb21   : > { %5759 = vpow2.f32 %v4542_v42 }
 0xb22   : > { %v5748_v51 = vpop.eup %5747  ;;  %5761 = vpow2.f32 %v4543_v15 }
 0xb23   : > { %4221 = vrot.lane.b32.xlu0 %v5748_v51, %s5805_s30 }
 0xb26   : > { %v5750_v22 = vpop.eup %5749 }
 0xb27   : > { %4223 = vrot.lane.b32.xlu1 %v5750_v22, %s5805_s30 }
 0xb2a   : > { %v5752_v10 = vpop.eup %5751 }
 0xb2b   : > { %4225 = vrot.lane.b32.xlu0 %v5752_v10, %s5805_s30  ;;  %v5754_v39 = vpop.eup %5753 }
 0xb2c   : > { %v4163_v55 = vadd.f32 1.0, %v5754_v39  ;;  %v5756_v31 = vpop.eup %5755 }
 0xb2d   : > { %v4164_v5 = vadd.f32 1.0, %v5756_v31  ;;  %v5758_v33 = vpop.eup %5757 }
 0xb2e   : > { %5763 = vrcp.f32 %v4163_v55  ;;  %v4165_v56 = vadd.f32 1.0, %v5758_v33  ;;  %v5760_v13 = vpop.eup %5759 }
 0xb2f   : > { %5765 = vpow2.f32 %v4544_v11  ;;  %v4166_v58 = vadd.f32 1.0, %v5760_v13  ;;  %v5762_v36 = vpop.eup %5761 }
 0xb30   : > { %5767 = vrcp.f32 %v4164_v5  ;;  %v4167_v41 = vadd.f32 1.0, %v5762_v36 }
 0xb31   : > { %5769 = vpow2.f32 %v4545_v19 }
 0xb32   : > { %5771 = vrcp.f32 %v4165_v56 }
 0xb33   : > { %5773 = vpow2.f32 %v4546_v46 }
 0xb34   : > { %5775 = vrcp.f32 %v4166_v58 }
 0xb35   : > { %5777 = vrcp.f32 %v4167_v41 }
 0xb3b   : > { %v5764_v60 = vpop.eup %5763 }
 0xb3c   : > { %v5766_v34 = vpop.eup %5765  ;;  %v4195_v48 = vsub.f32 1.0, %v5764_v60 }
 0xb3d   : > { %v5768_v62 = vpop.eup %5767  ;;  %v4168_v38 = vadd.f32 1.0, %v5766_v34 }
 0xb3e   : > { %v5770_v25 = vpop.eup %5769  ;;  %v4196_v21 = vsub.f32 1.0, %v5768_v62 }
 0xb3f   : > { %v5772_v29 = vpop.eup %5771  ;;  %5779 = vrcp.f32 %v4168_v38  ;;  %v4169_v49 = vadd.f32 1.0, %v5770_v25 }
 0xb40   : > { %v5774_v28 = vpop.eup %5773  ;;  %v4197_v1 = vsub.f32 1.0, %v5772_v29 }
 0xb41   : > { %5781 = vrcp.f32 %v4169_v49  ;;  %v4170_v17 = vadd.f32 1.0, %v5774_v28  ;;  %v5776_v12 = vpop.eup %5775 }
 0xb42   : > { %v4198_v26 = vsub.f32 1.0, %v5776_v12  ;;  %v5778_v40 = vpop.eup %5777 }
 0xb43   : > { %5783 = vrcp.f32 %v4170_v17  ;;  %v4199_v24 = vsub.f32 1.0, %v5778_v40 }
 0xb4c   : > { %v5780_v52 = vpop.eup %5779 }
 0xb4d   : > { %v4200_v23 = vsub.f32 1.0, %v5780_v52 }
 0xb4e   : > { %v5782_v61 = vpop.eup %5781 }
 0xb4f   : > { %v4201_v6 = vsub.f32 1.0, %v5782_v61 }
 0xb50   : > { %v5784_v0 = vpop.eup %5783 }
 0xb51   : > { %v4202_v8 = vsub.f32 1.0, %v5784_v0 }
 0xb81   : > { %v4212_v30 = vpop.permute.xlu0 %4211 }
 0xb82   : > { %v4235_v53 = vmul.f32 %v4212_v30, %v4195_v48 }
 0xb84   : > { %5395 = vmatprep.mubr.msk.f32.mxu1 %vm4254_vm1, %v4235_v53 }
 0xb85   : > { %v4214_v57 = vpop.permute.xlu1 %4213 }
 0xb86   : > { %v4236_v43 = vmul.f32 %v4214_v57, %v4196_v21 }
 0xb88   : > { %5396 = vmatmul.mubr.msk.f32.vlgmr.msra.gmra.mxu1 %vm4254_vm1, %v4236_v43 }
 0xb89   : > { %v4216_v14 = vpop.permute.xlu1 %4215 }
 0xb8a   : > { %v4237_v4 = vmul.f32 %v4216_v14, %v4197_v1 }
 0xb8c   : > { %5398 = vmatprep.mubr.msk.f32.mxu1 %vm4254_vm1, %v4237_v4 }
 0xb8d   : > { %v4218_v54 = vpop.permute.xlu0 %4217 }
 0xb8e   : > { %v4238_v37 = vmul.f32 %v4218_v54, %v4198_v26 }
 0xb90   : > { %5399 = vmatmul.mubr.msk.f32.gmra.mxu1 %vm4254_vm1, %v4238_v37 }
 0xb91   : > { %v4220_v45 = vpop.permute.xlu1 %4219 }
 0xb92   : > { %v4239_v50 = vmul.f32 %v4220_v45, %v4199_v24 }
 0xb94   : > { %5401 = vmatprep.mubr.msk.f32.mxu1 %vm4254_vm1, %v4239_v50 }
 0xb95   : > { %v4222_v9 = vpop.permute.xlu0 %4221 }
 0xb96   : > { %v4240_v27 = vmul.f32 %v4222_v9, %v4200_v23 }
 0xb98   : > { %5402 = vmatmul.mubr.msk.f32.gmra.mxu1 %vm4254_vm1, %v4240_v27 }
 0xb99   : > { %v4224_v63 = vpop.permute.xlu1 %4223 }
 0xb9a   : > { %v4241_v18 = vmul.f32 %v4224_v63, %v4201_v6 }
 0xb9c   : > { %5404 = vmatprep.mubr.msk.f32.mxu1 %vm4254_vm1, %v4241_v18 }
 0xb9d   : > { %v4226_v20 = vpop.permute.xlu0 %4225 }
 0xb9e   : > { %v4242_v35 = vmul.f32 %v4226_v20, %v4202_v8 }
 0xba0   : > { %5405 = vmatmul.mubr.msk.f32.gmra.mxu1 %vm4254_vm1, %v4242_v35 }
 0xc48   : > { %v5397_v44 = vpop.f32.mrf.mxu1 }
 0xc49   : > { %v4351_v7 = vadd.f32 %v5397_v44, %v4547_v16 }
 0xc4a   : > { %v4345_v32 = vpop.f32.mrf.mxu1 }
 0xc4b   : > { %4385 = vst.msk [vmem:[%s521_s23 + $0x8] sm:$0xff] %vm573_vm0, %v4351_v7  ;;  %v4346_v2 = vadd.f32 %v4547_v16, %v4345_v32 }
 0xc4d   : > { %4384 = vst.msk [vmem:[%s521_s23] sm:$0xff] %vm573_vm0, %v4346_v2 }
 0xc50   : > { %v5400_v51 = vpop.f32.mrf.mxu1 }
 0xc51   : > { %v4361_v22 = vadd.f32 %v5400_v51, %v4547_v16 }
 0xc52   : > { %v4355_v10 = vpop.f32.mrf.mxu1 }
 0xc53   : > { %4387 = vst.msk [vmem:[%s521_s23 + $0x18] sm:$0xff] %vm573_vm0, %v4361_v22  ;;  %v4356_v3 = vadd.f32 %v4547_v16, %v4355_v10 }
 0xc55   : > { %4386 = vst.msk [vmem:[%s521_s23 + $0x10] sm:$0xff] %vm573_vm0, %v4356_v3 }
 0xc58   : > { %v5403_v47 = vpop.f32.mrf.mxu1 }
 0xc59   : > { %v4371_v59 = vadd.f32 %v5403_v47, %v4547_v16 }
 0xc5a   : > { %v4365_v42 = vpop.f32.mrf.mxu1 }
 0xc5b   : > { %4389 = vst.msk [vmem:[%s521_s23 + $0x28] sm:$0xff] %vm573_vm0, %v4371_v59  ;;  %v4366_v39 = vadd.f32 %v4547_v16, %v4365_v42 }
 0xc5d   : > { %4388 = vst.msk [vmem:[%s521_s23 + $0x20] sm:$0xff] %vm573_vm0, %v4366_v39 }
 0xc60   : > { %v5406_v15 = vpop.f32.mrf.mxu1 }
 0xc61   : > { %v4381_v55 = vadd.f32 %v5406_v15, %v4547_v16 }
 0xc62   : > { %v4375_v31 = vpop.f32.mrf.mxu1 }
 0xc63   : > { %4391 = vst.msk [vmem:[%s521_s23 + $0x38] sm:$0xff] %vm573_vm0, %v4381_v55  ;;  %v4376_v11 = vadd.f32 %v4547_v16, %v4375_v31 }
 0xc65   : > { %4390 = vst.msk [vmem:[%s521_s23 + $0x30] sm:$0xff] %vm573_vm0, %v4376_v11 }
 0xc66 PF: > { %s26_s21 = sadd.s32 1, %s5799_s21  }
 0xc67   : > { %p23_p4 = scmp.ge.s32.totalorder %s26_s21, 4  }
 0xc69   :  { %25 = sbr.rel (!%p23_p4) target bundleno = 2 (0x2), region = 114 }

</bundles_post_ra>
